<compile_context>
chip_gen: v5e
topology: v5e:2x2
jax: 0.10.0
libtpu: 0.0.40
codegen_flags: <defaults>
</compile_context>

<pallas_src>
import numpy as np
import jax
import jax.numpy as jnp
from jax import lax
from jax.experimental import pallas as pl
from jax.experimental.pallas import tpu as pltpu


# ------------------------------- fused forward kernel -------------------------------
def _fused_kernel(
    x_ref,                                               # (R, state_dim), R = T * B_pad
    ew1, eb1, ew2, eb2, ew3, eb3, ew4, eb4, ew5, eb5,    # StateEncoder MLP
    wihi, wihf, wihg, wiho,                              # LSTM input weights, per gate (H_enc, H)
    whhi, whhf, whhg, whho,                              # LSTM recurrent weights, per gate (H, H)
    bi, bf, bg, bo,                                      # combined (b_ih + b_hh), per gate (1, H)
    hw1, hb1, hw2, hb2, hw3, hb3,                        # exist head
    swap_ref,                                            # (32, 32) pair-swap permutation
    o_ref,                                               # (R, 32) pairwise log-probs
    gxi, gxf, gxg, gxo,                                  # scratch: (R, H) hoisted gate inputs
    hseq,                                                # scratch: (R, H) LSTM hidden per row
    h_sc, c_sc,                                          # scratch: (B_pad, H) recurrent state
):
    def lin_relu(h, w, b):
        return jnp.maximum(
            jnp.dot(h, w[...], preferred_element_type=jnp.float32) + b[...], 0.0
        )

    # 1) State encoder over all (t, b) rows at once.
    h = lin_relu(x_ref[...], ew1, eb1)
    h = lin_relu(h, ew2, eb2)
    h = lin_relu(h, ew3, eb3)
    h = lin_relu(h, ew4, eb4)
    enc = lin_relu(h, ew5, eb5)                          # (R, H)

    # 2) Hoisted LSTM input projection (per gate -> lane aligned, no 4H slicing).
    gxi[...] = jnp.dot(enc, wihi[...], preferred_element_type=jnp.float32) + bi[...]
    gxf[...] = jnp.dot(enc, wihf[...], preferred_element_type=jnp.float32) + bf[...]
    gxg[...] = jnp.dot(enc, wihg[...], preferred_element_type=jnp.float32) + bg[...]
    gxo[...] = jnp.dot(enc, wiho[...], preferred_element_type=jnp.float32) + bo[...]

    # 3) Recurrence: only h @ W_hh on the serial path.
    B_pad = h_sc.shape[0]
    T = x_ref.shape[0] // B_pad
    h_sc[...] = jnp.zeros_like(h_sc)
    c_sc[...] = jnp.zeros_like(c_sc)

    def step(t, carry):
        r0 = pl.multiple_of(t * B_pad, B_pad)            # sublane-aligned row block
        hp = h_sc[...]
        cp = c_sc[...]
        ig = jax.nn.sigmoid(
            gxi[pl.ds(r0, B_pad), :]
            + jnp.dot(hp, whhi[...], preferred_element_type=jnp.float32))
        fg = jax.nn.sigmoid(
            gxf[pl.ds(r0, B_pad), :]
            + jnp.dot(hp, whhf[...], preferred_element_type=jnp.float32))
        gg = jnp.tanh(
            gxg[pl.ds(r0, B_pad), :]
            + jnp.dot(hp, whhg[...], preferred_element_type=jnp.float32))
        og = jax.nn.sigmoid(
            gxo[pl.ds(r0, B_pad), :]
            + jnp.dot(hp, whho[...], preferred_element_type=jnp.float32))
        c_new = fg * cp + ig * gg
        h_new = og * jnp.tanh(c_new)
        h_sc[...] = h_new
        c_sc[...] = c_new
        hseq[pl.ds(r0, B_pad), :] = h_new
        return carry

    lax.fori_loop(0, T, step, 0, unroll=(T <= 32))

    # 4) Exist head over all rows.
    hh = lin_relu(hseq[...], hw1, hb1)
    hh = lin_relu(hh, hw2, hb2)
    logits = jnp.dot(hh, hw3[...], preferred_element_type=jnp.float32) + hb3[...]  # (R, 32)

    # 5) Pairwise log-softmax over column pairs (2k, 2k+1) with per-pair max.
    #    partner[:, j] = logits[:, j ^ 1] via an exact permutation matmul.
    partner = jnp.dot(logits, swap_ref[...], preferred_element_type=jnp.float32)
    m = jnp.maximum(logits, partner)
    o_ref[...] = (logits - m) - jnp.log(jnp.exp(logits - m) + jnp.exp(partner - m))


# ------------------------------------ wrapper --------------------------------------
def tomnet_exist_pred(params, state_action, lens):
    """state_action: list of (T_b, state_dim) f32 arrays; lens: python list of ints
    (assumed sorted descending, as required by pack_padded_sequence(enforce_sorted=True);
    this implementation is actually order-independent)."""
    B = len(state_action)
    T = int(max(lens))
    state_dim = state_action[0].shape[-1]
    B_pad = max(8, -(-B // 8) * 8)                       # pad batch to a sublane multiple

    # Build time-major, flattened, zero-padded input: row r = t * B_pad + b.
    x_np = np.zeros((T, B_pad, state_dim), np.float32)
    for b, sa in enumerate(state_action):
        arr = np.asarray(sa, np.float32)
        x_np[: arr.shape[0], b, :] = arr
    R = T * B_pad
    x_flat = jnp.asarray(x_np.reshape(R, state_dim))

    # Split LSTM weights per gate (PyTorch order i, f, g, o), combine biases.
    wih, whh, b_all = params["lstm_wih"], params["lstm_whh"], params["lstm_b"]
    H = whh.shape[0]
    wih_g = [wih[:, k * H:(k + 1) * H] for k in range(4)]
    whh_g = [whh[:, k * H:(k + 1) * H] for k in range(4)]
    b_g = [b_all[:, k * H:(k + 1) * H] for k in range(4)]

    args = [x_flat]
    for w, bb in params["enc"]:
        args += [w, bb]
    args += wih_g + whh_g + b_g
    for w, bb in params["head"]:
        args += [w, bb]
    args.append(params["pair_swap"])

    out = pl.pallas_call(
        _fused_kernel,
        out_shape=jax.ShapeDtypeStruct((R, 32), jnp.float32),
        scratch_shapes=[
            pltpu.VMEM((R, H), jnp.float32),             # gxi
            pltpu.VMEM((R, H), jnp.float32),             # gxf
            pltpu.VMEM((R, H), jnp.float32),             # gxg
            pltpu.VMEM((R, H), jnp.float32),             # gxo
            pltpu.VMEM((R, H), jnp.float32),             # hseq
            pltpu.VMEM((B_pad, H), jnp.float32),         # h state
            pltpu.VMEM((B_pad, H), jnp.float32),         # c state
        ],
    )(*args)

    # torch.cat([padded_output[b, :lens[b]] for b]) -> gather valid rows (b outer, t inner).
    idx = np.concatenate(
        [np.arange(l, dtype=np.int32) * B_pad + b for b, l in enumerate(lens)]
    )
    valid = out[jnp.asarray(idx)]                        # (sum(lens), 32)
    return valid.reshape(valid.shape[0] * 16, 2)


# ------------------------------ pure-JAX reference ----------------------------------
def _ref_forward(params, state_action, lens):
    mm = lambda a, b: jnp.dot(a, b, precision=jax.lax.Precision.HIGHEST)

    def enc_mlp(x):
        h = x
        for w, b in params["enc"]:
            h = jnp.maximum(mm(h, w) + b, 0.0)
        return h

    outs = []
    H = params["lstm_whh"].shape[0]
    for sa, l in zip(state_action, lens):
        e = enc_mlp(sa.astype(jnp.float32))              # (l, H)
        h = jnp.zeros((H,), jnp.float32)
        c = jnp.zeros((H,), jnp.float32)
        for t in range(int(l)):
            g = mm(e[t:t + 1], params["lstm_wih"])[0] + mm(h[None], params["lstm_whh"])[0] \
                + params["lstm_b"][0]
            i = jax.nn.sigmoid(g[0:H]); f = jax.nn.sigmoid(g[H:2 * H])
            gg = jnp.tanh(g[2 * H:3 * H]); o = jax.nn.sigmoid(g[3 * H:4 * H])
            c = f * c + i * gg
            h = o * jnp.tanh(c)
            outs.append(h)
    x = jnp.stack(outs)
    (w1, b1), (w2, b2), (w3, b3) = params["head"]
    x = jnp.maximum(mm(x, w1) + b1, 0.0)
    x = jnp.maximum(mm(x, w2) + b2, 0.0)
    logits = mm(x, w3) + b3
    logits = logits.reshape(logits.shape[0] * 16, 2)
    return jax.nn.log_softmax(logits, axis=-1)


# -------------------------------- parameter init ------------------------------------
def _init_linear(key, fan_in, fan_out):
    k1, k2 = jax.random.split(key)
    bound = 1.0 / np.sqrt(fan_in)
    w = jax.random.uniform(k1, (fan_in, fan_out), jnp.float32, -bound, bound)
    b = jax.random.uniform(k2, (1, fan_out), jnp.float32, -bound, bound)
    return w, b


def init_params(key, state_dim, hidden_dim):
    H2 = hidden_dim // 2
    ks = jax.random.split(key, 12)
    enc_dims = [(state_dim, hidden_dim), (hidden_dim, 2 * hidden_dim),
                (2 * hidden_dim, 2 * hidden_dim), (2 * hidden_dim, hidden_dim),
                (hidden_dim, H2)]
    enc = [_init_linear(k, fi, fo) for k, (fi, fo) in zip(ks[:5], enc_dims)]
    bound = 1.0 / np.sqrt(H2)
    lstm_wih = jax.random.uniform(ks[5], (H2, 4 * H2), jnp.float32, -bound, bound)
    lstm_whh = jax.random.uniform(ks[6], (H2, 4 * H2), jnp.float32, -bound, bound)
    lstm_b = (jax.random.uniform(ks[7], (1, 4 * H2), jnp.float32, -bound, bound)
              + jax.random.uniform(ks[8], (1, 4 * H2), jnp.float32, -bound, bound))
    head = [_init_linear(ks[9], H2, H2),
            _init_linear(ks[10], H2, hidden_dim),
            _init_linear(ks[11], hidden_dim, 32)]
    # swap permutation: P[i, i^1] = 1 (partner column within each (2k, 2k+1) pair)
    idx = np.arange(32)
    swap = np.zeros((32, 32), np.float32)
    swap[idx, idx ^ 1] = 1.0
    return {"enc": enc, "lstm_wih": lstm_wih, "lstm_whh": lstm_whh, "lstm_b": lstm_b,
            "head": head, "pair_swap": jnp.asarray(swap)}


if __name__ == "__main__":
    key = jax.random.PRNGKey(0)
    state_dim, hidden_dim = 20, 32      # small shapes; module defaults are 145 / 128
    lens = [8, 5]                       # batch=2, sorted descending
    kp, kx0, kx1 = jax.random.split(key, 3)
    params = init_params(kp, state_dim, hidden_dim)
    state_action = [
        jax.random.normal(kx0, (lens[0], state_dim), jnp.float32),
        jax.random.normal(kx1, (lens[1], state_dim), jnp.float32),
    ]

    out = tomnet_exist_pred(params, state_action, lens)
    out = jax.block_until_ready(out)
    assert out.shape == (sum(lens) * 16, 2), out.shape

    ref = _ref_forward(params, state_action, lens)
    np.testing.assert_allclose(np.asarray(out), np.asarray(ref), atol=1e-3, rtol=1e-2)

    print("KERNEL_OK")
</pallas_src>

<mosaic_0001>
module attributes {stable_mosaic.version = 11 : i64} {
  func.func @_fused_kernel(%arg0: memref<64x20xf32, #tpu.memory_space<vmem>>, %arg1: memref<20x32xf32, #tpu.memory_space<vmem>>, %arg2: memref<1x32xf32, #tpu.memory_space<vmem>>, %arg3: memref<32x64xf32, #tpu.memory_space<vmem>>, %arg4: memref<1x64xf32, #tpu.memory_space<vmem>>, %arg5: memref<64x64xf32, #tpu.memory_space<vmem>>, %arg6: memref<1x64xf32, #tpu.memory_space<vmem>>, %arg7: memref<64x32xf32, #tpu.memory_space<vmem>>, %arg8: memref<1x32xf32, #tpu.memory_space<vmem>>, %arg9: memref<32x16xf32, #tpu.memory_space<vmem>>, %arg10: memref<1x16xf32, #tpu.memory_space<vmem>>, %arg11: memref<16x16xf32, #tpu.memory_space<vmem>>, %arg12: memref<16x16xf32, #tpu.memory_space<vmem>>, %arg13: memref<16x16xf32, #tpu.memory_space<vmem>>, %arg14: memref<16x16xf32, #tpu.memory_space<vmem>>, %arg15: memref<16x16xf32, #tpu.memory_space<vmem>>, %arg16: memref<16x16xf32, #tpu.memory_space<vmem>>, %arg17: memref<16x16xf32, #tpu.memory_space<vmem>>, %arg18: memref<16x16xf32, #tpu.memory_space<vmem>>, %arg19: memref<1x16xf32, #tpu.memory_space<vmem>>, %arg20: memref<1x16xf32, #tpu.memory_space<vmem>>, %arg21: memref<1x16xf32, #tpu.memory_space<vmem>>, %arg22: memref<1x16xf32, #tpu.memory_space<vmem>>, %arg23: memref<16x16xf32, #tpu.memory_space<vmem>>, %arg24: memref<1x16xf32, #tpu.memory_space<vmem>>, %arg25: memref<16x32xf32, #tpu.memory_space<vmem>>, %arg26: memref<1x32xf32, #tpu.memory_space<vmem>>, %arg27: memref<32x32xf32, #tpu.memory_space<vmem>>, %arg28: memref<1x32xf32, #tpu.memory_space<vmem>>, %arg29: memref<32x32xf32, #tpu.memory_space<vmem>>, %arg30: memref<64x32xf32, #tpu.memory_space<vmem>>, %arg31: memref<64x16xf32, #tpu.memory_space<vmem>>, %arg32: memref<64x16xf32, #tpu.memory_space<vmem>>, %arg33: memref<64x16xf32, #tpu.memory_space<vmem>>, %arg34: memref<64x16xf32, #tpu.memory_space<vmem>>, %arg35: memref<64x16xf32, #tpu.memory_space<vmem>>, %arg36: memref<8x16xf32, #tpu.memory_space<vmem>>, %arg37: memref<8x16xf32, #tpu.memory_space<vmem>>) attributes {dimension_semantics = [], scalar_prefetch = 0 : i64, scratch_operands = 7 : i64, tpu.core_type = #tpu.core_type<tc>} {
    %c0 = arith.constant 0 : index
    %c0_0 = arith.constant 0 : index
    %0 = vector.load %arg0[%c0, %c0_0] : memref<64x20xf32, #tpu.memory_space<vmem>>, vector<64x20xf32>
    %c0_1 = arith.constant 0 : index
    %c0_2 = arith.constant 0 : index
    %1 = vector.load %arg1[%c0_1, %c0_2] : memref<20x32xf32, #tpu.memory_space<vmem>>, vector<20x32xf32>
    %cst = arith.constant dense<0.000000e+00> : vector<64x32xf32>
    %2 = tpu.matmul %0, %1, %cst {dimension_numbers = #tpu.dot_dimension_numbers<[1], [0], [0], [1], [0, 0, 1, 1], [], []>} : vector<64x20xf32>, vector<20x32xf32>, vector<64x32xf32> -> vector<64x32xf32>
    %c0_3 = arith.constant 0 : index
    %c0_4 = arith.constant 0 : index
    %3 = vector.load %arg2[%c0_3, %c0_4] : memref<1x32xf32, #tpu.memory_space<vmem>>, vector<1x32xf32>
    %4 = vector.broadcast %3 : vector<1x32xf32> to vector<64x32xf32>
    %5 = arith.addf %2, %4 : vector<64x32xf32>
    %cst_5 = arith.constant 0.000000e+00 : f32
    %6 = vector.broadcast %cst_5 : f32 to vector<64x32xf32>
    %7 = arith.maximumf %5, %6 : vector<64x32xf32>
    %c0_6 = arith.constant 0 : index
    %c0_7 = arith.constant 0 : index
    %8 = vector.load %arg3[%c0_6, %c0_7] : memref<32x64xf32, #tpu.memory_space<vmem>>, vector<32x64xf32>
    %cst_8 = arith.constant dense<0.000000e+00> : vector<64x64xf32>
    %9 = tpu.matmul %7, %8, %cst_8 {dimension_numbers = #tpu.dot_dimension_numbers<[1], [0], [0], [1], [0, 0, 1, 1], [], []>} : vector<64x32xf32>, vector<32x64xf32>, vector<64x64xf32> -> vector<64x64xf32>
    %c0_9 = arith.constant 0 : index
    %c0_10 = arith.constant 0 : index
    %10 = vector.load %arg4[%c0_9, %c0_10] : memref<1x64xf32, #tpu.memory_space<vmem>>, vector<1x64xf32>
    %11 = vector.broadcast %10 : vector<1x64xf32> to vector<64x64xf32>
    %12 = arith.addf %9, %11 : vector<64x64xf32>
    %cst_11 = arith.constant 0.000000e+00 : f32
    %13 = vector.broadcast %cst_11 : f32 to vector<64x64xf32>
    %14 = arith.maximumf %12, %13 : vector<64x64xf32>
    %c0_12 = arith.constant 0 : index
    %c0_13 = arith.constant 0 : index
    %15 = vector.load %arg5[%c0_12, %c0_13] : memref<64x64xf32, #tpu.memory_space<vmem>>, vector<64x64xf32>
    %cst_14 = arith.constant dense<0.000000e+00> : vector<64x64xf32>
    %16 = tpu.matmul %14, %15, %cst_14 {dimension_numbers = #tpu.dot_dimension_numbers<[1], [0], [0], [1], [0, 0, 1, 1], [], []>} : vector<64x64xf32>, vector<64x64xf32>, vector<64x64xf32> -> vector<64x64xf32>
    %c0_15 = arith.constant 0 : index
    %c0_16 = arith.constant 0 : index
    %17 = vector.load %arg6[%c0_15, %c0_16] : memref<1x64xf32, #tpu.memory_space<vmem>>, vector<1x64xf32>
    %18 = vector.broadcast %17 : vector<1x64xf32> to vector<64x64xf32>
    %19 = arith.addf %16, %18 : vector<64x64xf32>
    %cst_17 = arith.constant 0.000000e+00 : f32
    %20 = vector.broadcast %cst_17 : f32 to vector<64x64xf32>
    %21 = arith.maximumf %19, %20 : vector<64x64xf32>
    %c0_18 = arith.constant 0 : index
    %c0_19 = arith.constant 0 : index
    %22 = vector.load %arg7[%c0_18, %c0_19] : memref<64x32xf32, #tpu.memory_space<vmem>>, vector<64x32xf32>
    %cst_20 = arith.constant dense<0.000000e+00> : vector<64x32xf32>
    %23 = tpu.matmul %21, %22, %cst_20 {dimension_numbers = #tpu.dot_dimension_numbers<[1], [0], [0], [1], [0, 0, 1, 1], [], []>} : vector<64x64xf32>, vector<64x32xf32>, vector<64x32xf32> -> vector<64x32xf32>
    %c0_21 = arith.constant 0 : index
    %c0_22 = arith.constant 0 : index
    %24 = vector.load %arg8[%c0_21, %c0_22] : memref<1x32xf32, #tpu.memory_space<vmem>>, vector<1x32xf32>
    %25 = vector.broadcast %24 : vector<1x32xf32> to vector<64x32xf32>
    %26 = arith.addf %23, %25 : vector<64x32xf32>
    %cst_23 = arith.constant 0.000000e+00 : f32
    %27 = vector.broadcast %cst_23 : f32 to vector<64x32xf32>
    %28 = arith.maximumf %26, %27 : vector<64x32xf32>
    %c0_24 = arith.constant 0 : index
    %c0_25 = arith.constant 0 : index
    %29 = vector.load %arg9[%c0_24, %c0_25] : memref<32x16xf32, #tpu.memory_space<vmem>>, vector<32x16xf32>
    %cst_26 = arith.constant dense<0.000000e+00> : vector<64x16xf32>
    %30 = tpu.matmul %28, %29, %cst_26 {dimension_numbers = #tpu.dot_dimension_numbers<[1], [0], [0], [1], [0, 0, 1, 1], [], []>} : vector<64x32xf32>, vector<32x16xf32>, vector<64x16xf32> -> vector<64x16xf32>
    %c0_27 = arith.constant 0 : index
    %c0_28 = arith.constant 0 : index
    %31 = vector.load %arg10[%c0_27, %c0_28] : memref<1x16xf32, #tpu.memory_space<vmem>>, vector<1x16xf32>
    %32 = vector.broadcast %31 : vector<1x16xf32> to vector<64x16xf32>
    %33 = arith.addf %30, %32 : vector<64x16xf32>
    %cst_29 = arith.constant 0.000000e+00 : f32
    %34 = vector.broadcast %cst_29 : f32 to vector<64x16xf32>
    %35 = arith.maximumf %33, %34 : vector<64x16xf32>
    %c0_30 = arith.constant 0 : index
    %c0_31 = arith.constant 0 : index
    %36 = vector.load %arg11[%c0_30, %c0_31] : memref<16x16xf32, #tpu.memory_space<vmem>>, vector<16x16xf32>
    %cst_32 = arith.constant dense<0.000000e+00> : vector<64x16xf32>
    %37 = tpu.matmul %35, %36, %cst_32 {dimension_numbers = #tpu.dot_dimension_numbers<[1], [0], [0], [1], [0, 0, 1, 1], [], []>} : vector<64x16xf32>, vector<16x16xf32>, vector<64x16xf32> -> vector<64x16xf32>
    %c0_33 = arith.constant 0 : index
    %c0_34 = arith.constant 0 : index
    %38 = vector.load %arg19[%c0_33, %c0_34] : memref<1x16xf32, #tpu.memory_space<vmem>>, vector<1x16xf32>
    %39 = vector.broadcast %38 : vector<1x16xf32> to vector<64x16xf32>
    %40 = arith.addf %37, %39 : vector<64x16xf32>
    %c0_35 = arith.constant 0 : index
    %c0_36 = arith.constant 0 : index
    %41 = vector.load %arg31[%c0_35, %c0_36] : memref<64x16xf32, #tpu.memory_space<vmem>>, vector<64x16xf32>
    tpu.vector_store %arg31[%c0_35, %c0_36], %40 {strides = array<i32>} : memref<64x16xf32, #tpu.memory_space<vmem>>, vector<64x16xf32>,
    %c0_37 = arith.constant 0 : index
    %c0_38 = arith.constant 0 : index
    %42 = vector.load %arg12[%c0_37, %c0_38] : memref<16x16xf32, #tpu.memory_space<vmem>>, vector<16x16xf32>
    %cst_39 = arith.constant dense<0.000000e+00> : vector<64x16xf32>
    %43 = tpu.matmul %35, %42, %cst_39 {dimension_numbers = #tpu.dot_dimension_numbers<[1], [0], [0], [1], [0, 0, 1, 1], [], []>} : vector<64x16xf32>, vector<16x16xf32>, vector<64x16xf32> -> vector<64x16xf32>
    %c0_40 = arith.constant 0 : index
    %c0_41 = arith.constant 0 : index
    %44 = vector.load %arg20[%c0_40, %c0_41] : memref<1x16xf32, #tpu.memory_space<vmem>>, vector<1x16xf32>
    %45 = vector.broadcast %44 : vector<1x16xf32> to vector<64x16xf32>
    %46 = arith.addf %43, %45 : vector<64x16xf32>
    %c0_42 = arith.constant 0 : index
    %c0_43 = arith.constant 0 : index
    %47 = vector.load %arg32[%c0_42, %c0_43] : memref<64x16xf32, #tpu.memory_space<vmem>>, vector<64x16xf32>
    tpu.vector_store %arg32[%c0_42, %c0_43], %46 {strides = array<i32>} : memref<64x16xf32, #tpu.memory_space<vmem>>, vector<64x16xf32>,
    %c0_44 = arith.constant 0 : index
    %c0_45 = arith.constant 0 : index
    %48 = vector.load %arg13[%c0_44, %c0_45] : memref<16x16xf32, #tpu.memory_space<vmem>>, vector<16x16xf32>
    %cst_46 = arith.constant dense<0.000000e+00> : vector<64x16xf32>
    %49 = tpu.matmul %35, %48, %cst_46 {dimension_numbers = #tpu.dot_dimension_numbers<[1], [0], [0], [1], [0, 0, 1, 1], [], []>} : vector<64x16xf32>, vector<16x16xf32>, vector<64x16xf32> -> vector<64x16xf32>
    %c0_47 = arith.constant 0 : index
    %c0_48 = arith.constant 0 : index
    %50 = vector.load %arg21[%c0_47, %c0_48] : memref<1x16xf32, #tpu.memory_space<vmem>>, vector<1x16xf32>
    %51 = vector.broadcast %50 : vector<1x16xf32> to vector<64x16xf32>
    %52 = arith.addf %49, %51 : vector<64x16xf32>
    %c0_49 = arith.constant 0 : index
    %c0_50 = arith.constant 0 : index
    %53 = vector.load %arg33[%c0_49, %c0_50] : memref<64x16xf32, #tpu.memory_space<vmem>>, vector<64x16xf32>
    tpu.vector_store %arg33[%c0_49, %c0_50], %52 {strides = array<i32>} : memref<64x16xf32, #tpu.memory_space<vmem>>, vector<64x16xf32>,
    %c0_51 = arith.constant 0 : index
    %c0_52 = arith.constant 0 : index
    %54 = vector.load %arg14[%c0_51, %c0_52] : memref<16x16xf32, #tpu.memory_space<vmem>>, vector<16x16xf32>
    %cst_53 = arith.constant dense<0.000000e+00> : vector<64x16xf32>
    %55 = tpu.matmul %35, %54, %cst_53 {dimension_numbers = #tpu.dot_dimension_numbers<[1], [0], [0], [1], [0, 0, 1, 1], [], []>} : vector<64x16xf32>, vector<16x16xf32>, vector<64x16xf32> -> vector<64x16xf32>
    %c0_54 = arith.constant 0 : index
    %c0_55 = arith.constant 0 : index
    %56 = vector.load %arg22[%c0_54, %c0_55] : memref<1x16xf32, #tpu.memory_space<vmem>>, vector<1x16xf32>
    %57 = vector.broadcast %56 : vector<1x16xf32> to vector<64x16xf32>
    %58 = arith.addf %55, %57 : vector<64x16xf32>
    %c0_56 = arith.constant 0 : index
    %c0_57 = arith.constant 0 : index
    %59 = vector.load %arg34[%c0_56, %c0_57] : memref<64x16xf32, #tpu.memory_space<vmem>>, vector<64x16xf32>
    tpu.vector_store %arg34[%c0_56, %c0_57], %58 {strides = array<i32>} : memref<64x16xf32, #tpu.memory_space<vmem>>, vector<64x16xf32>,
    %cst_58 = arith.constant 0.000000e+00 : f32
    %60 = vector.broadcast %cst_58 : f32 to vector<8x16xf32>
    %c0_59 = arith.constant 0 : index
    %c0_60 = arith.constant 0 : index
    %61 = vector.load %arg36[%c0_59, %c0_60] : memref<8x16xf32, #tpu.memory_space<vmem>>, vector<8x16xf32>
    tpu.vector_store %arg36[%c0_59, %c0_60], %60 {strides = array<i32>} : memref<8x16xf32, #tpu.memory_space<vmem>>, vector<8x16xf32>,
    %cst_61 = arith.constant 0.000000e+00 : f32
    %62 = vector.broadcast %cst_61 : f32 to vector<8x16xf32>
    %c0_62 = arith.constant 0 : index
    %c0_63 = arith.constant 0 : index
    %63 = vector.load %arg37[%c0_62, %c0_63] : memref<8x16xf32, #tpu.memory_space<vmem>>, vector<8x16xf32>
    tpu.vector_store %arg37[%c0_62, %c0_63], %62 {strides = array<i32>} : memref<8x16xf32, #tpu.memory_space<vmem>>, vector<8x16xf32>,
    %c0_i32 = arith.constant 0 : i32
    %c8_i32 = arith.constant 8 : i32
    %64 = arith.muli %c0_i32, %c8_i32 : i32
    %65 = tpu.assume_multiple %64, 8 : i32
    %c0_64 = arith.constant 0 : index
    %c0_65 = arith.constant 0 : index
    %66 = vector.load %arg36[%c0_64, %c0_65] : memref<8x16xf32, #tpu.memory_space<vmem>>, vector<8x16xf32>
    %c0_66 = arith.constant 0 : index
    %c0_67 = arith.constant 0 : index
    %67 = vector.load %arg37[%c0_66, %c0_67] : memref<8x16xf32, #tpu.memory_space<vmem>>, vector<8x16xf32>
    %68 = arith.index_cast %65 : i32 to index
    %c0_68 = arith.constant 0 : index
    %69 = vector.load %arg31[%68, %c0_68] : memref<64x16xf32, #tpu.memory_space<vmem>>, vector<8x16xf32>
    %c0_69 = arith.constant 0 : index
    %c0_70 = arith.constant 0 : index
    %70 = vector.load %arg15[%c0_69, %c0_70] : memref<16x16xf32, #tpu.memory_space<vmem>>, vector<16x16xf32>
    %cst_71 = arith.constant dense<0.000000e+00> : vector<8x16xf32>
    %71 = tpu.matmul %66, %70, %cst_71 {dimension_numbers = #tpu.dot_dimension_numbers<[1], [0], [0], [1], [0, 0, 1, 1], [], []>} : vector<8x16xf32>, vector<16x16xf32>, vector<8x16xf32> -> vector<8x16xf32>
    %72 = arith.addf %69, %71 : vector<8x16xf32>
    %73 = arith.negf %72 : vector<8x16xf32>
    %74 = math.exp %73 : vector<8x16xf32>
    %cst_72 = arith.constant 1.000000e+00 : f32
    %75 = vector.broadcast %cst_72 : f32 to vector<8x16xf32>
    %76 = arith.addf %75, %74 : vector<8x16xf32>
    %77 = arith.divf %75, %76 : vector<8x16xf32>
    %78 = arith.index_cast %65 : i32 to index
    %c0_73 = arith.constant 0 : index
    %79 = vector.load %arg32[%78, %c0_73] : memref<64x16xf32, #tpu.memory_space<vmem>>, vector<8x16xf32>
    %c0_74 = arith.constant 0 : index
    %c0_75 = arith.constant 0 : index
    %80 = vector.load %arg16[%c0_74, %c0_75] : memref<16x16xf32, #tpu.memory_space<vmem>>, vector<16x16xf32>
    %cst_76 = arith.constant dense<0.000000e+00> : vector<8x16xf32>
    %81 = tpu.matmul %66, %80, %cst_76 {dimension_numbers = #tpu.dot_dimension_numbers<[1], [0], [0], [1], [0, 0, 1, 1], [], []>} : vector<8x16xf32>, vector<16x16xf32>, vector<8x16xf32> -> vector<8x16xf32>
    %82 = arith.addf %79, %81 : vector<8x16xf32>
    %83 = arith.negf %82 : vector<8x16xf32>
    %84 = math.exp %83 : vector<8x16xf32>
    %cst_77 = arith.constant 1.000000e+00 : f32
    %85 = vector.broadcast %cst_77 : f32 to vector<8x16xf32>
    %86 = arith.addf %85, %84 : vector<8x16xf32>
    %87 = arith.divf %85, %86 : vector<8x16xf32>
    %88 = arith.index_cast %65 : i32 to index
    %c0_78 = arith.constant 0 : index
    %89 = vector.load %arg33[%88, %c0_78] : memref<64x16xf32, #tpu.memory_space<vmem>>, vector<8x16xf32>
    %c0_79 = arith.constant 0 : index
    %c0_80 = arith.constant 0 : index
    %90 = vector.load %arg17[%c0_79, %c0_80] : memref<16x16xf32, #tpu.memory_space<vmem>>, vector<16x16xf32>
    %cst_81 = arith.constant dense<0.000000e+00> : vector<8x16xf32>
    %91 = tpu.matmul %66, %90, %cst_81 {dimension_numbers = #tpu.dot_dimension_numbers<[1], [0], [0], [1], [0, 0, 1, 1], [], []>} : vector<8x16xf32>, vector<16x16xf32>, vector<8x16xf32> -> vector<8x16xf32>
    %92 = arith.addf %89, %91 : vector<8x16xf32>
    %93 = math.tanh %92 : vector<8x16xf32>
    %94 = arith.index_cast %65 : i32 to index
    %c0_82 = arith.constant 0 : index
    %95 = vector.load %arg34[%94, %c0_82] : memref<64x16xf32, #tpu.memory_space<vmem>>, vector<8x16xf32>
    %c0_83 = arith.constant 0 : index
    %c0_84 = arith.constant 0 : index
    %96 = vector.load %arg18[%c0_83, %c0_84] : memref<16x16xf32, #tpu.memory_space<vmem>>, vector<16x16xf32>
    %cst_85 = arith.constant dense<0.000000e+00> : vector<8x16xf32>
    %97 = tpu.matmul %66, %96, %cst_85 {dimension_numbers = #tpu.dot_dimension_numbers<[1], [0], [0], [1], [0, 0, 1, 1], [], []>} : vector<8x16xf32>, vector<16x16xf32>, vector<8x16xf32> -> vector<8x16xf32>
    %98 = arith.addf %95, %97 : vector<8x16xf32>
    %99 = arith.negf %98 : vector<8x16xf32>
    %100 = math.exp %99 : vector<8x16xf32>
    %cst_86 = arith.constant 1.000000e+00 : f32
    %101 = vector.broadcast %cst_86 : f32 to vector<8x16xf32>
    %102 = arith.addf %101, %100 : vector<8x16xf32>
    %103 = arith.divf %101, %102 : vector<8x16xf32>
    %104 = arith.mulf %87, %67 : vector<8x16xf32>
    %105 = arith.mulf %77, %93 : vector<8x16xf32>
    %106 = arith.addf %104, %105 : vector<8x16xf32>
    %107 = math.tanh %106 : vector<8x16xf32>
    %108 = arith.mulf %103, %107 : vector<8x16xf32>
    %c0_87 = arith.constant 0 : index
    %c0_88 = arith.constant 0 : index
    %109 = vector.load %arg36[%c0_87, %c0_88] : memref<8x16xf32, #tpu.memory_space<vmem>>, vector<8x16xf32>
    tpu.vector_store %arg36[%c0_87, %c0_88], %108 {strides = array<i32>} : memref<8x16xf32, #tpu.memory_space<vmem>>, vector<8x16xf32>,
    %c0_89 = arith.constant 0 : index
    %c0_90 = arith.constant 0 : index
    %110 = vector.load %arg37[%c0_89, %c0_90] : memref<8x16xf32, #tpu.memory_space<vmem>>, vector<8x16xf32>
    tpu.vector_store %arg37[%c0_89, %c0_90], %106 {strides = array<i32>} : memref<8x16xf32, #tpu.memory_space<vmem>>, vector<8x16xf32>,
    %111 = arith.index_cast %65 : i32 to index
    %c0_91 = arith.constant 0 : index
    %112 = vector.load %arg35[%111, %c0_91] : memref<64x16xf32, #tpu.memory_space<vmem>>, vector<8x16xf32>
    tpu.vector_store %arg35[%111, %c0_91], %108 {strides = array<i32>} : memref<64x16xf32, #tpu.memory_space<vmem>>, vector<8x16xf32>,
    %c1_i32 = arith.constant 1 : i32
    %c8_i32_92 = arith.constant 8 : i32
    %113 = arith.muli %c1_i32, %c8_i32_92 : i32
    %114 = tpu.assume_multiple %113, 8 : i32
    %c0_93 = arith.constant 0 : index
    %c0_94 = arith.constant 0 : index
    %115 = vector.load %arg36[%c0_93, %c0_94] : memref<8x16xf32, #tpu.memory_space<vmem>>, vector<8x16xf32>
    %c0_95 = arith.constant 0 : index
    %c0_96 = arith.constant 0 : index
    %116 = vector.load %arg37[%c0_95, %c0_96] : memref<8x16xf32, #tpu.memory_space<vmem>>, vector<8x16xf32>
    %117 = arith.index_cast %114 : i32 to index
    %c0_97 = arith.constant 0 : index
    %118 = vector.load %arg31[%117, %c0_97] : memref<64x16xf32, #tpu.memory_space<vmem>>, vector<8x16xf32>
    %c0_98 = arith.constant 0 : index
    %c0_99 = arith.constant 0 : index
    %119 = vector.load %arg15[%c0_98, %c0_99] : memref<16x16xf32, #tpu.memory_space<vmem>>, vector<16x16xf32>
    %cst_100 = arith.constant dense<0.000000e+00> : vector<8x16xf32>
    %120 = tpu.matmul %115, %119, %cst_100 {dimension_numbers = #tpu.dot_dimension_numbers<[1], [0], [0], [1], [0, 0, 1, 1], [], []>} : vector<8x16xf32>, vector<16x16xf32>, vector<8x16xf32> -> vector<8x16xf32>
    %121 = arith.addf %118, %120 : vector<8x16xf32>
    %122 = arith.negf %121 : vector<8x16xf32>
    %123 = math.exp %122 : vector<8x16xf32>
    %cst_101 = arith.constant 1.000000e+00 : f32
    %124 = vector.broadcast %cst_101 : f32 to vector<8x16xf32>
    %125 = arith.addf %124, %123 : vector<8x16xf32>
    %126 = arith.divf %124, %125 : vector<8x16xf32>
    %127 = arith.index_cast %114 : i32 to index
    %c0_102 = arith.constant 0 : index
    %128 = vector.load %arg32[%127, %c0_102] : memref<64x16xf32, #tpu.memory_space<vmem>>, vector<8x16xf32>
    %c0_103 = arith.constant 0 : index
    %c0_104 = arith.constant 0 : index
    %129 = vector.load %arg16[%c0_103, %c0_104] : memref<16x16xf32, #tpu.memory_space<vmem>>, vector<16x16xf32>
    %cst_105 = arith.constant dense<0.000000e+00> : vector<8x16xf32>
    %130 = tpu.matmul %115, %129, %cst_105 {dimension_numbers = #tpu.dot_dimension_numbers<[1], [0], [0], [1], [0, 0, 1, 1], [], []>} : vector<8x16xf32>, vector<16x16xf32>, vector<8x16xf32> -> vector<8x16xf32>
    %131 = arith.addf %128, %130 : vector<8x16xf32>
    %132 = arith.negf %131 : vector<8x16xf32>
    %133 = math.exp %132 : vector<8x16xf32>
    %cst_106 = arith.constant 1.000000e+00 : f32
    %134 = vector.broadcast %cst_106 : f32 to vector<8x16xf32>
    %135 = arith.addf %134, %133 : vector<8x16xf32>
    %136 = arith.divf %134, %135 : vector<8x16xf32>
    %137 = arith.index_cast %114 : i32 to index
    %c0_107 = arith.constant 0 : index
    %138 = vector.load %arg33[%137, %c0_107] : memref<64x16xf32, #tpu.memory_space<vmem>>, vector<8x16xf32>
    %c0_108 = arith.constant 0 : index
    %c0_109 = arith.constant 0 : index
    %139 = vector.load %arg17[%c0_108, %c0_109] : memref<16x16xf32, #tpu.memory_space<vmem>>, vector<16x16xf32>
    %cst_110 = arith.constant dense<0.000000e+00> : vector<8x16xf32>
    %140 = tpu.matmul %115, %139, %cst_110 {dimension_numbers = #tpu.dot_dimension_numbers<[1], [0], [0], [1], [0, 0, 1, 1], [], []>} : vector<8x16xf32>, vector<16x16xf32>, vector<8x16xf32> -> vector<8x16xf32>
    %141 = arith.addf %138, %140 : vector<8x16xf32>
    %142 = math.tanh %141 : vector<8x16xf32>
    %143 = arith.index_cast %114 : i32 to index
    %c0_111 = arith.constant 0 : index
    %144 = vector.load %arg34[%143, %c0_111] : memref<64x16xf32, #tpu.memory_space<vmem>>, vector<8x16xf32>
    %c0_112 = arith.constant 0 : index
    %c0_113 = arith.constant 0 : index
    %145 = vector.load %arg18[%c0_112, %c0_113] : memref<16x16xf32, #tpu.memory_space<vmem>>, vector<16x16xf32>
    %cst_114 = arith.constant dense<0.000000e+00> : vector<8x16xf32>
    %146 = tpu.matmul %115, %145, %cst_114 {dimension_numbers = #tpu.dot_dimension_numbers<[1], [0], [0], [1], [0, 0, 1, 1], [], []>} : vector<8x16xf32>, vector<16x16xf32>, vector<8x16xf32> -> vector<8x16xf32>
    %147 = arith.addf %144, %146 : vector<8x16xf32>
    %148 = arith.negf %147 : vector<8x16xf32>
    %149 = math.exp %148 : vector<8x16xf32>
    %cst_115 = arith.constant 1.000000e+00 : f32
    %150 = vector.broadcast %cst_115 : f32 to vector<8x16xf32>
    %151 = arith.addf %150, %149 : vector<8x16xf32>
    %152 = arith.divf %150, %151 : vector<8x16xf32>
    %153 = arith.mulf %136, %116 : vector<8x16xf32>
    %154 = arith.mulf %126, %142 : vector<8x16xf32>
    %155 = arith.addf %153, %154 : vector<8x16xf32>
    %156 = math.tanh %155 : vector<8x16xf32>
    %157 = arith.mulf %152, %156 : vector<8x16xf32>
    %c0_116 = arith.constant 0 : index
    %c0_117 = arith.constant 0 : index
    %158 = vector.load %arg36[%c0_116, %c0_117] : memref<8x16xf32, #tpu.memory_space<vmem>>, vector<8x16xf32>
    tpu.vector_store %arg36[%c0_116, %c0_117], %157 {strides = array<i32>} : memref<8x16xf32, #tpu.memory_space<vmem>>, vector<8x16xf32>,
    %c0_118 = arith.constant 0 : index
    %c0_119 = arith.constant 0 : index
    %159 = vector.load %arg37[%c0_118, %c0_119] : memref<8x16xf32, #tpu.memory_space<vmem>>, vector<8x16xf32>
    tpu.vector_store %arg37[%c0_118, %c0_119], %155 {strides = array<i32>} : memref<8x16xf32, #tpu.memory_space<vmem>>, vector<8x16xf32>,
    %160 = arith.index_cast %114 : i32 to index
    %c0_120 = arith.constant 0 : index
    %161 = vector.load %arg35[%160, %c0_120] : memref<64x16xf32, #tpu.memory_space<vmem>>, vector<8x16xf32>
    tpu.vector_store %arg35[%160, %c0_120], %157 {strides = array<i32>} : memref<64x16xf32, #tpu.memory_space<vmem>>, vector<8x16xf32>,
    %c2_i32 = arith.constant 2 : i32
    %c8_i32_121 = arith.constant 8 : i32
    %162 = arith.muli %c2_i32, %c8_i32_121 : i32
    %163 = tpu.assume_multiple %162, 8 : i32
    %c0_122 = arith.constant 0 : index
    %c0_123 = arith.constant 0 : index
    %164 = vector.load %arg36[%c0_122, %c0_123] : memref<8x16xf32, #tpu.memory_space<vmem>>, vector<8x16xf32>
    %c0_124 = arith.constant 0 : index
    %c0_125 = arith.constant 0 : index
    %165 = vector.load %arg37[%c0_124, %c0_125] : memref<8x16xf32, #tpu.memory_space<vmem>>, vector<8x16xf32>
    %166 = arith.index_cast %163 : i32 to index
    %c0_126 = arith.constant 0 : index
    %167 = vector.load %arg31[%166, %c0_126] : memref<64x16xf32, #tpu.memory_space<vmem>>, vector<8x16xf32>
    %c0_127 = arith.constant 0 : index
    %c0_128 = arith.constant 0 : index
    %168 = vector.load %arg15[%c0_127, %c0_128] : memref<16x16xf32, #tpu.memory_space<vmem>>, vector<16x16xf32>
    %cst_129 = arith.constant dense<0.000000e+00> : vector<8x16xf32>
    %169 = tpu.matmul %164, %168, %cst_129 {dimension_numbers = #tpu.dot_dimension_numbers<[1], [0], [0], [1], [0, 0, 1, 1], [], []>} : vector<8x16xf32>, vector<16x16xf32>, vector<8x16xf32> -> vector<8x16xf32>
    %170 = arith.addf %167, %169 : vector<8x16xf32>
    %171 = arith.negf %170 : vector<8x16xf32>
    %172 = math.exp %171 : vector<8x16xf32>
    %cst_130 = arith.constant 1.000000e+00 : f32
    %173 = vector.broadcast %cst_130 : f32 to vector<8x16xf32>
    %174 = arith.addf %173, %172 : vector<8x16xf32>
    %175 = arith.divf %173, %174 : vector<8x16xf32>
    %176 = arith.index_cast %163 : i32 to index
    %c0_131 = arith.constant 0 : index
    %177 = vector.load %arg32[%176, %c0_131] : memref<64x16xf32, #tpu.memory_space<vmem>>, vector<8x16xf32>
    %c0_132 = arith.constant 0 : index
    %c0_133 = arith.constant 0 : index
    %178 = vector.load %arg16[%c0_132, %c0_133] : memref<16x16xf32, #tpu.memory_space<vmem>>, vector<16x16xf32>
    %cst_134 = arith.constant dense<0.000000e+00> : vector<8x16xf32>
    %179 = tpu.matmul %164, %178, %cst_134 {dimension_numbers = #tpu.dot_dimension_numbers<[1], [0], [0], [1], [0, 0, 1, 1], [], []>} : vector<8x16xf32>, vector<16x16xf32>, vector<8x16xf32> -> vector<8x16xf32>
    %180 = arith.addf %177, %179 : vector<8x16xf32>
    %181 = arith.negf %180 : vector<8x16xf32>
    %182 = math.exp %181 : vector<8x16xf32>
    %cst_135 = arith.constant 1.000000e+00 : f32
    %183 = vector.broadcast %cst_135 : f32 to vector<8x16xf32>
    %184 = arith.addf %183, %182 : vector<8x16xf32>
    %185 = arith.divf %183, %184 : vector<8x16xf32>
    %186 = arith.index_cast %163 : i32 to index
    %c0_136 = arith.constant 0 : index
    %187 = vector.load %arg33[%186, %c0_136] : memref<64x16xf32, #tpu.memory_space<vmem>>, vector<8x16xf32>
    %c0_137 = arith.constant 0 : index
    %c0_138 = arith.constant 0 : index
    %188 = vector.load %arg17[%c0_137, %c0_138] : memref<16x16xf32, #tpu.memory_space<vmem>>, vector<16x16xf32>
    %cst_139 = arith.constant dense<0.000000e+00> : vector<8x16xf32>
    %189 = tpu.matmul %164, %188, %cst_139 {dimension_numbers = #tpu.dot_dimension_numbers<[1], [0], [0], [1], [0, 0, 1, 1], [], []>} : vector<8x16xf32>, vector<16x16xf32>, vector<8x16xf32> -> vector<8x16xf32>
    %190 = arith.addf %187, %189 : vector<8x16xf32>
    %191 = math.tanh %190 : vector<8x16xf32>
    %192 = arith.index_cast %163 : i32 to index
    %c0_140 = arith.constant 0 : index
    %193 = vector.load %arg34[%192, %c0_140] : memref<64x16xf32, #tpu.memory_space<vmem>>, vector<8x16xf32>
    %c0_141 = arith.constant 0 : index
    %c0_142 = arith.constant 0 : index
    %194 = vector.load %arg18[%c0_141, %c0_142] : memref<16x16xf32, #tpu.memory_space<vmem>>, vector<16x16xf32>
    %cst_143 = arith.constant dense<0.000000e+00> : vector<8x16xf32>
    %195 = tpu.matmul %164, %194, %cst_143 {dimension_numbers = #tpu.dot_dimension_numbers<[1], [0], [0], [1], [0, 0, 1, 1], [], []>} : vector<8x16xf32>, vector<16x16xf32>, vector<8x16xf32> -> vector<8x16xf32>
    %196 = arith.addf %193, %195 : vector<8x16xf32>
    %197 = arith.negf %196 : vector<8x16xf32>
    %198 = math.exp %197 : vector<8x16xf32>
    %cst_144 = arith.constant 1.000000e+00 : f32
    %199 = vector.broadcast %cst_144 : f32 to vector<8x16xf32>
    %200 = arith.addf %199, %198 : vector<8x16xf32>
    %201 = arith.divf %199, %200 : vector<8x16xf32>
    %202 = arith.mulf %185, %165 : vector<8x16xf32>
    %203 = arith.mulf %175, %191 : vector<8x16xf32>
    %204 = arith.addf %202, %203 : vector<8x16xf32>
    %205 = math.tanh %204 : vector<8x16xf32>
    %206 = arith.mulf %201, %205 : vector<8x16xf32>
    %c0_145 = arith.constant 0 : index
    %c0_146 = arith.constant 0 : index
    %207 = vector.load %arg36[%c0_145, %c0_146] : memref<8x16xf32, #tpu.memory_space<vmem>>, vector<8x16xf32>
    tpu.vector_store %arg36[%c0_145, %c0_146], %206 {strides = array<i32>} : memref<8x16xf32, #tpu.memory_space<vmem>>, vector<8x16xf32>,
    %c0_147 = arith.constant 0 : index
    %c0_148 = arith.constant 0 : index
    %208 = vector.load %arg37[%c0_147, %c0_148] : memref<8x16xf32, #tpu.memory_space<vmem>>, vector<8x16xf32>
    tpu.vector_store %arg37[%c0_147, %c0_148], %204 {strides = array<i32>} : memref<8x16xf32, #tpu.memory_space<vmem>>, vector<8x16xf32>,
    %209 = arith.index_cast %163 : i32 to index
    %c0_149 = arith.constant 0 : index
    %210 = vector.load %arg35[%209, %c0_149] : memref<64x16xf32, #tpu.memory_space<vmem>>, vector<8x16xf32>
    tpu.vector_store %arg35[%209, %c0_149], %206 {strides = array<i32>} : memref<64x16xf32, #tpu.memory_space<vmem>>, vector<8x16xf32>,
    %c3_i32 = arith.constant 3 : i32
    %c8_i32_150 = arith.constant 8 : i32
    %211 = arith.muli %c3_i32, %c8_i32_150 : i32
    %212 = tpu.assume_multiple %211, 8 : i32
    %c0_151 = arith.constant 0 : index
    %c0_152 = arith.constant 0 : index
    %213 = vector.load %arg36[%c0_151, %c0_152] : memref<8x16xf32, #tpu.memory_space<vmem>>, vector<8x16xf32>
    %c0_153 = arith.constant 0 : index
    %c0_154 = arith.constant 0 : index
    %214 = vector.load %arg37[%c0_153, %c0_154] : memref<8x16xf32, #tpu.memory_space<vmem>>, vector<8x16xf32>
    %215 = arith.index_cast %212 : i32 to index
    %c0_155 = arith.constant 0 : index
    %216 = vector.load %arg31[%215, %c0_155] : memref<64x16xf32, #tpu.memory_space<vmem>>, vector<8x16xf32>
    %c0_156 = arith.constant 0 : index
    %c0_157 = arith.constant 0 : index
    %217 = vector.load %arg15[%c0_156, %c0_157] : memref<16x16xf32, #tpu.memory_space<vmem>>, vector<16x16xf32>
    %cst_158 = arith.constant dense<0.000000e+00> : vector<8x16xf32>
    %218 = tpu.matmul %213, %217, %cst_158 {dimension_numbers = #tpu.dot_dimension_numbers<[1], [0], [0], [1], [0, 0, 1, 1], [], []>} : vector<8x16xf32>, vector<16x16xf32>, vector<8x16xf32> -> vector<8x16xf32>
    %219 = arith.addf %216, %218 : vector<8x16xf32>
    %220 = arith.negf %219 : vector<8x16xf32>
    %221 = math.exp %220 : vector<8x16xf32>
    %cst_159 = arith.constant 1.000000e+00 : f32
    %222 = vector.broadcast %cst_159 : f32 to vector<8x16xf32>
    %223 = arith.addf %222, %221 : vector<8x16xf32>
    %224 = arith.divf %222, %223 : vector<8x16xf32>
    %225 = arith.index_cast %212 : i32 to index
    %c0_160 = arith.constant 0 : index
    %226 = vector.load %arg32[%225, %c0_160] : memref<64x16xf32, #tpu.memory_space<vmem>>, vector<8x16xf32>
    %c0_161 = arith.constant 0 : index
    %c0_162 = arith.constant 0 : index
    %227 = vector.load %arg16[%c0_161, %c0_162] : memref<16x16xf32, #tpu.memory_space<vmem>>, vector<16x16xf32>
    %cst_163 = arith.constant dense<0.000000e+00> : vector<8x16xf32>
    %228 = tpu.matmul %213, %227, %cst_163 {dimension_numbers = #tpu.dot_dimension_numbers<[1], [0], [0], [1], [0, 0, 1, 1], [], []>} : vector<8x16xf32>, vector<16x16xf32>, vector<8x16xf32> -> vector<8x16xf32>
    %229 = arith.addf %226, %228 : vector<8x16xf32>
    %230 = arith.negf %229 : vector<8x16xf32>
    %231 = math.exp %230 : vector<8x16xf32>
    %cst_164 = arith.constant 1.000000e+00 : f32
    %232 = vector.broadcast %cst_164 : f32 to vector<8x16xf32>
    %233 = arith.addf %232, %231 : vector<8x16xf32>
    %234 = arith.divf %232, %233 : vector<8x16xf32>
    %235 = arith.index_cast %212 : i32 to index
    %c0_165 = arith.constant 0 : index
    %236 = vector.load %arg33[%235, %c0_165] : memref<64x16xf32, #tpu.memory_space<vmem>>, vector<8x16xf32>
    %c0_166 = arith.constant 0 : index
    %c0_167 = arith.constant 0 : index
    %237 = vector.load %arg17[%c0_166, %c0_167] : memref<16x16xf32, #tpu.memory_space<vmem>>, vector<16x16xf32>
    %cst_168 = arith.constant dense<0.000000e+00> : vector<8x16xf32>
    %238 = tpu.matmul %213, %237, %cst_168 {dimension_numbers = #tpu.dot_dimension_numbers<[1], [0], [0], [1], [0, 0, 1, 1], [], []>} : vector<8x16xf32>, vector<16x16xf32>, vector<8x16xf32> -> vector<8x16xf32>
    %239 = arith.addf %236, %238 : vector<8x16xf32>
    %240 = math.tanh %239 : vector<8x16xf32>
    %241 = arith.index_cast %212 : i32 to index
    %c0_169 = arith.constant 0 : index
    %242 = vector.load %arg34[%241, %c0_169] : memref<64x16xf32, #tpu.memory_space<vmem>>, vector<8x16xf32>
    %c0_170 = arith.constant 0 : index
    %c0_171 = arith.constant 0 : index
    %243 = vector.load %arg18[%c0_170, %c0_171] : memref<16x16xf32, #tpu.memory_space<vmem>>, vector<16x16xf32>
    %cst_172 = arith.constant dense<0.000000e+00> : vector<8x16xf32>
    %244 = tpu.matmul %213, %243, %cst_172 {dimension_numbers = #tpu.dot_dimension_numbers<[1], [0], [0], [1], [0, 0, 1, 1], [], []>} : vector<8x16xf32>, vector<16x16xf32>, vector<8x16xf32> -> vector<8x16xf32>
    %245 = arith.addf %242, %244 : vector<8x16xf32>
    %246 = arith.negf %245 : vector<8x16xf32>
    %247 = math.exp %246 : vector<8x16xf32>
    %cst_173 = arith.constant 1.000000e+00 : f32
    %248 = vector.broadcast %cst_173 : f32 to vector<8x16xf32>
    %249 = arith.addf %248, %247 : vector<8x16xf32>
    %250 = arith.divf %248, %249 : vector<8x16xf32>
    %251 = arith.mulf %234, %214 : vector<8x16xf32>
    %252 = arith.mulf %224, %240 : vector<8x16xf32>
    %253 = arith.addf %251, %252 : vector<8x16xf32>
    %254 = math.tanh %253 : vector<8x16xf32>
    %255 = arith.mulf %250, %254 : vector<8x16xf32>
    %c0_174 = arith.constant 0 : index
    %c0_175 = arith.constant 0 : index
    %256 = vector.load %arg36[%c0_174, %c0_175] : memref<8x16xf32, #tpu.memory_space<vmem>>, vector<8x16xf32>
    tpu.vector_store %arg36[%c0_174, %c0_175], %255 {strides = array<i32>} : memref<8x16xf32, #tpu.memory_space<vmem>>, vector<8x16xf32>,
    %c0_176 = arith.constant 0 : index
    %c0_177 = arith.constant 0 : index
    %257 = vector.load %arg37[%c0_176, %c0_177] : memref<8x16xf32, #tpu.memory_space<vmem>>, vector<8x16xf32>
    tpu.vector_store %arg37[%c0_176, %c0_177], %253 {strides = array<i32>} : memref<8x16xf32, #tpu.memory_space<vmem>>, vector<8x16xf32>,
    %258 = arith.index_cast %212 : i32 to index
    %c0_178 = arith.constant 0 : index
    %259 = vector.load %arg35[%258, %c0_178] : memref<64x16xf32, #tpu.memory_space<vmem>>, vector<8x16xf32>
    tpu.vector_store %arg35[%258, %c0_178], %255 {strides = array<i32>} : memref<64x16xf32, #tpu.memory_space<vmem>>, vector<8x16xf32>,
    %c4_i32 = arith.constant 4 : i32
    %c8_i32_179 = arith.constant 8 : i32
    %260 = arith.muli %c4_i32, %c8_i32_179 : i32
    %261 = tpu.assume_multiple %260, 8 : i32
    %c0_180 = arith.constant 0 : index
    %c0_181 = arith.constant 0 : index
    %262 = vector.load %arg36[%c0_180, %c0_181] : memref<8x16xf32, #tpu.memory_space<vmem>>, vector<8x16xf32>
    %c0_182 = arith.constant 0 : index
    %c0_183 = arith.constant 0 : index
    %263 = vector.load %arg37[%c0_182, %c0_183] : memref<8x16xf32, #tpu.memory_space<vmem>>, vector<8x16xf32>
    %264 = arith.index_cast %261 : i32 to index
    %c0_184 = arith.constant 0 : index
    %265 = vector.load %arg31[%264, %c0_184] : memref<64x16xf32, #tpu.memory_space<vmem>>, vector<8x16xf32>
    %c0_185 = arith.constant 0 : index
    %c0_186 = arith.constant 0 : index
    %266 = vector.load %arg15[%c0_185, %c0_186] : memref<16x16xf32, #tpu.memory_space<vmem>>, vector<16x16xf32>
    %cst_187 = arith.constant dense<0.000000e+00> : vector<8x16xf32>
    %267 = tpu.matmul %262, %266, %cst_187 {dimension_numbers = #tpu.dot_dimension_numbers<[1], [0], [0], [1], [0, 0, 1, 1], [], []>} : vector<8x16xf32>, vector<16x16xf32>, vector<8x16xf32> -> vector<8x16xf32>
    %268 = arith.addf %265, %267 : vector<8x16xf32>
    %269 = arith.negf %268 : vector<8x16xf32>
    %270 = math.exp %269 : vector<8x16xf32>
    %cst_188 = arith.constant 1.000000e+00 : f32
    %271 = vector.broadcast %cst_188 : f32 to vector<8x16xf32>
    %272 = arith.addf %271, %270 : vector<8x16xf32>
    %273 = arith.divf %271, %272 : vector<8x16xf32>
    %274 = arith.index_cast %261 : i32 to index
    %c0_189 = arith.constant 0 : index
    %275 = vector.load %arg32[%274, %c0_189] : memref<64x16xf32, #tpu.memory_space<vmem>>, vector<8x16xf32>
    %c0_190 = arith.constant 0 : index
    %c0_191 = arith.constant 0 : index
    %276 = vector.load %arg16[%c0_190, %c0_191] : memref<16x16xf32, #tpu.memory_space<vmem>>, vector<16x16xf32>
    %cst_192 = arith.constant dense<0.000000e+00> : vector<8x16xf32>
    %277 = tpu.matmul %262, %276, %cst_192 {dimension_numbers = #tpu.dot_dimension_numbers<[1], [0], [0], [1], [0, 0, 1, 1], [], []>} : vector<8x16xf32>, vector<16x16xf32>, vector<8x16xf32> -> vector<8x16xf32>
    %278 = arith.addf %275, %277 : vector<8x16xf32>
    %279 = arith.negf %278 : vector<8x16xf32>
    %280 = math.exp %279 : vector<8x16xf32>
    %cst_193 = arith.constant 1.000000e+00 : f32
    %281 = vector.broadcast %cst_193 : f32 to vector<8x16xf32>
    %282 = arith.addf %281, %280 : vector<8x16xf32>
    %283 = arith.divf %281, %282 : vector<8x16xf32>
    %284 = arith.index_cast %261 : i32 to index
    %c0_194 = arith.constant 0 : index
    %285 = vector.load %arg33[%284, %c0_194] : memref<64x16xf32, #tpu.memory_space<vmem>>, vector<8x16xf32>
    %c0_195 = arith.constant 0 : index
    %c0_196 = arith.constant 0 : index
    %286 = vector.load %arg17[%c0_195, %c0_196] : memref<16x16xf32, #tpu.memory_space<vmem>>, vector<16x16xf32>
    %cst_197 = arith.constant dense<0.000000e+00> : vector<8x16xf32>
    %287 = tpu.matmul %262, %286, %cst_197 {dimension_numbers = #tpu.dot_dimension_numbers<[1], [0], [0], [1], [0, 0, 1, 1], [], []>} : vector<8x16xf32>, vector<16x16xf32>, vector<8x16xf32> -> vector<8x16xf32>
    %288 = arith.addf %285, %287 : vector<8x16xf32>
    %289 = math.tanh %288 : vector<8x16xf32>
    %290 = arith.index_cast %261 : i32 to index
    %c0_198 = arith.constant 0 : index
    %291 = vector.load %arg34[%290, %c0_198] : memref<64x16xf32, #tpu.memory_space<vmem>>, vector<8x16xf32>
    %c0_199 = arith.constant 0 : index
    %c0_200 = arith.constant 0 : index
    %292 = vector.load %arg18[%c0_199, %c0_200] : memref<16x16xf32, #tpu.memory_space<vmem>>, vector<16x16xf32>
    %cst_201 = arith.constant dense<0.000000e+00> : vector<8x16xf32>
    %293 = tpu.matmul %262, %292, %cst_201 {dimension_numbers = #tpu.dot_dimension_numbers<[1], [0], [0], [1], [0, 0, 1, 1], [], []>} : vector<8x16xf32>, vector<16x16xf32>, vector<8x16xf32> -> vector<8x16xf32>
    %294 = arith.addf %291, %293 : vector<8x16xf32>
    %295 = arith.negf %294 : vector<8x16xf32>
    %296 = math.exp %295 : vector<8x16xf32>
    %cst_202 = arith.constant 1.000000e+00 : f32
    %297 = vector.broadcast %cst_202 : f32 to vector<8x16xf32>
    %298 = arith.addf %297, %296 : vector<8x16xf32>
    %299 = arith.divf %297, %298 : vector<8x16xf32>
    %300 = arith.mulf %283, %263 : vector<8x16xf32>
    %301 = arith.mulf %273, %289 : vector<8x16xf32>
    %302 = arith.addf %300, %301 : vector<8x16xf32>
    %303 = math.tanh %302 : vector<8x16xf32>
    %304 = arith.mulf %299, %303 : vector<8x16xf32>
    %c0_203 = arith.constant 0 : index
    %c0_204 = arith.constant 0 : index
    %305 = vector.load %arg36[%c0_203, %c0_204] : memref<8x16xf32, #tpu.memory_space<vmem>>, vector<8x16xf32>
    tpu.vector_store %arg36[%c0_203, %c0_204], %304 {strides = array<i32>} : memref<8x16xf32, #tpu.memory_space<vmem>>, vector<8x16xf32>,
    %c0_205 = arith.constant 0 : index
    %c0_206 = arith.constant 0 : index
    %306 = vector.load %arg37[%c0_205, %c0_206] : memref<8x16xf32, #tpu.memory_space<vmem>>, vector<8x16xf32>
    tpu.vector_store %arg37[%c0_205, %c0_206], %302 {strides = array<i32>} : memref<8x16xf32, #tpu.memory_space<vmem>>, vector<8x16xf32>,
    %307 = arith.index_cast %261 : i32 to index
    %c0_207 = arith.constant 0 : index
    %308 = vector.load %arg35[%307, %c0_207] : memref<64x16xf32, #tpu.memory_space<vmem>>, vector<8x16xf32>
    tpu.vector_store %arg35[%307, %c0_207], %304 {strides = array<i32>} : memref<64x16xf32, #tpu.memory_space<vmem>>, vector<8x16xf32>,
    %c5_i32 = arith.constant 5 : i32
    %c8_i32_208 = arith.constant 8 : i32
    %309 = arith.muli %c5_i32, %c8_i32_208 : i32
    %310 = tpu.assume_multiple %309, 8 : i32
    %c0_209 = arith.constant 0 : index
    %c0_210 = arith.constant 0 : index
    %311 = vector.load %arg36[%c0_209, %c0_210] : memref<8x16xf32, #tpu.memory_space<vmem>>, vector<8x16xf32>
    %c0_211 = arith.constant 0 : index
    %c0_212 = arith.constant 0 : index
    %312 = vector.load %arg37[%c0_211, %c0_212] : memref<8x16xf32, #tpu.memory_space<vmem>>, vector<8x16xf32>
    %313 = arith.index_cast %310 : i32 to index
    %c0_213 = arith.constant 0 : index
    %314 = vector.load %arg31[%313, %c0_213] : memref<64x16xf32, #tpu.memory_space<vmem>>, vector<8x16xf32>
    %c0_214 = arith.constant 0 : index
    %c0_215 = arith.constant 0 : index
    %315 = vector.load %arg15[%c0_214, %c0_215] : memref<16x16xf32, #tpu.memory_space<vmem>>, vector<16x16xf32>
    %cst_216 = arith.constant dense<0.000000e+00> : vector<8x16xf32>
    %316 = tpu.matmul %311, %315, %cst_216 {dimension_numbers = #tpu.dot_dimension_numbers<[1], [0], [0], [1], [0, 0, 1, 1], [], []>} : vector<8x16xf32>, vector<16x16xf32>, vector<8x16xf32> -> vector<8x16xf32>
    %317 = arith.addf %314, %316 : vector<8x16xf32>
    %318 = arith.negf %317 : vector<8x16xf32>
    %319 = math.exp %318 : vector<8x16xf32>
    %cst_217 = arith.constant 1.000000e+00 : f32
    %320 = vector.broadcast %cst_217 : f32 to vector<8x16xf32>
    %321 = arith.addf %320, %319 : vector<8x16xf32>
    %322 = arith.divf %320, %321 : vector<8x16xf32>
    %323 = arith.index_cast %310 : i32 to index
    %c0_218 = arith.constant 0 : index
    %324 = vector.load %arg32[%323, %c0_218] : memref<64x16xf32, #tpu.memory_space<vmem>>, vector<8x16xf32>
    %c0_219 = arith.constant 0 : index
    %c0_220 = arith.constant 0 : index
    %325 = vector.load %arg16[%c0_219, %c0_220] : memref<16x16xf32, #tpu.memory_space<vmem>>, vector<16x16xf32>
    %cst_221 = arith.constant dense<0.000000e+00> : vector<8x16xf32>
    %326 = tpu.matmul %311, %325, %cst_221 {dimension_numbers = #tpu.dot_dimension_numbers<[1], [0], [0], [1], [0, 0, 1, 1], [], []>} : vector<8x16xf32>, vector<16x16xf32>, vector<8x16xf32> -> vector<8x16xf32>
    %327 = arith.addf %324, %326 : vector<8x16xf32>
    %328 = arith.negf %327 : vector<8x16xf32>
    %329 = math.exp %328 : vector<8x16xf32>
    %cst_222 = arith.constant 1.000000e+00 : f32
    %330 = vector.broadcast %cst_222 : f32 to vector<8x16xf32>
    %331 = arith.addf %330, %329 : vector<8x16xf32>
    %332 = arith.divf %330, %331 : vector<8x16xf32>
    %333 = arith.index_cast %310 : i32 to index
    %c0_223 = arith.constant 0 : index
    %334 = vector.load %arg33[%333, %c0_223] : memref<64x16xf32, #tpu.memory_space<vmem>>, vector<8x16xf32>
    %c0_224 = arith.constant 0 : index
    %c0_225 = arith.constant 0 : index
    %335 = vector.load %arg17[%c0_224, %c0_225] : memref<16x16xf32, #tpu.memory_space<vmem>>, vector<16x16xf32>
    %cst_226 = arith.constant dense<0.000000e+00> : vector<8x16xf32>
    %336 = tpu.matmul %311, %335, %cst_226 {dimension_numbers = #tpu.dot_dimension_numbers<[1], [0], [0], [1], [0, 0, 1, 1], [], []>} : vector<8x16xf32>, vector<16x16xf32>, vector<8x16xf32> -> vector<8x16xf32>
    %337 = arith.addf %334, %336 : vector<8x16xf32>
    %338 = math.tanh %337 : vector<8x16xf32>
    %339 = arith.index_cast %310 : i32 to index
    %c0_227 = arith.constant 0 : index
    %340 = vector.load %arg34[%339, %c0_227] : memref<64x16xf32, #tpu.memory_space<vmem>>, vector<8x16xf32>
    %c0_228 = arith.constant 0 : index
    %c0_229 = arith.constant 0 : index
    %341 = vector.load %arg18[%c0_228, %c0_229] : memref<16x16xf32, #tpu.memory_space<vmem>>, vector<16x16xf32>
    %cst_230 = arith.constant dense<0.000000e+00> : vector<8x16xf32>
    %342 = tpu.matmul %311, %341, %cst_230 {dimension_numbers = #tpu.dot_dimension_numbers<[1], [0], [0], [1], [0, 0, 1, 1], [], []>} : vector<8x16xf32>, vector<16x16xf32>, vector<8x16xf32> -> vector<8x16xf32>
    %343 = arith.addf %340, %342 : vector<8x16xf32>
    %344 = arith.negf %343 : vector<8x16xf32>
    %345 = math.exp %344 : vector<8x16xf32>
    %cst_231 = arith.constant 1.000000e+00 : f32
    %346 = vector.broadcast %cst_231 : f32 to vector<8x16xf32>
    %347 = arith.addf %346, %345 : vector<8x16xf32>
    %348 = arith.divf %346, %347 : vector<8x16xf32>
    %349 = arith.mulf %332, %312 : vector<8x16xf32>
    %350 = arith.mulf %322, %338 : vector<8x16xf32>
    %351 = arith.addf %349, %350 : vector<8x16xf32>
    %352 = math.tanh %351 : vector<8x16xf32>
    %353 = arith.mulf %348, %352 : vector<8x16xf32>
    %c0_232 = arith.constant 0 : index
    %c0_233 = arith.constant 0 : index
    %354 = vector.load %arg36[%c0_232, %c0_233] : memref<8x16xf32, #tpu.memory_space<vmem>>, vector<8x16xf32>
    tpu.vector_store %arg36[%c0_232, %c0_233], %353 {strides = array<i32>} : memref<8x16xf32, #tpu.memory_space<vmem>>, vector<8x16xf32>,
    %c0_234 = arith.constant 0 : index
    %c0_235 = arith.constant 0 : index
    %355 = vector.load %arg37[%c0_234, %c0_235] : memref<8x16xf32, #tpu.memory_space<vmem>>, vector<8x16xf32>
    tpu.vector_store %arg37[%c0_234, %c0_235], %351 {strides = array<i32>} : memref<8x16xf32, #tpu.memory_space<vmem>>, vector<8x16xf32>,
    %356 = arith.index_cast %310 : i32 to index
    %c0_236 = arith.constant 0 : index
    %357 = vector.load %arg35[%356, %c0_236] : memref<64x16xf32, #tpu.memory_space<vmem>>, vector<8x16xf32>
    tpu.vector_store %arg35[%356, %c0_236], %353 {strides = array<i32>} : memref<64x16xf32, #tpu.memory_space<vmem>>, vector<8x16xf32>,
    %c6_i32 = arith.constant 6 : i32
    %c8_i32_237 = arith.constant 8 : i32
    %358 = arith.muli %c6_i32, %c8_i32_237 : i32
    %359 = tpu.assume_multiple %358, 8 : i32
    %c0_238 = arith.constant 0 : index
    %c0_239 = arith.constant 0 : index
    %360 = vector.load %arg36[%c0_238, %c0_239] : memref<8x16xf32, #tpu.memory_space<vmem>>, vector<8x16xf32>
    %c0_240 = arith.constant 0 : index
    %c0_241 = arith.constant 0 : index
    %361 = vector.load %arg37[%c0_240, %c0_241] : memref<8x16xf32, #tpu.memory_space<vmem>>, vector<8x16xf32>
    %362 = arith.index_cast %359 : i32 to index
    %c0_242 = arith.constant 0 : index
    %363 = vector.load %arg31[%362, %c0_242] : memref<64x16xf32, #tpu.memory_space<vmem>>, vector<8x16xf32>
    %c0_243 = arith.constant 0 : index
    %c0_244 = arith.constant 0 : index
    %364 = vector.load %arg15[%c0_243, %c0_244] : memref<16x16xf32, #tpu.memory_space<vmem>>, vector<16x16xf32>
    %cst_245 = arith.constant dense<0.000000e+00> : vector<8x16xf32>
    %365 = tpu.matmul %360, %364, %cst_245 {dimension_numbers = #tpu.dot_dimension_numbers<[1], [0], [0], [1], [0, 0, 1, 1], [], []>} : vector<8x16xf32>, vector<16x16xf32>, vector<8x16xf32> -> vector<8x16xf32>
    %366 = arith.addf %363, %365 : vector<8x16xf32>
    %367 = arith.negf %366 : vector<8x16xf32>
    %368 = math.exp %367 : vector<8x16xf32>
    %cst_246 = arith.constant 1.000000e+00 : f32
    %369 = vector.broadcast %cst_246 : f32 to vector<8x16xf32>
    %370 = arith.addf %369, %368 : vector<8x16xf32>
    %371 = arith.divf %369, %370 : vector<8x16xf32>
    %372 = arith.index_cast %359 : i32 to index
    %c0_247 = arith.constant 0 : index
    %373 = vector.load %arg32[%372, %c0_247] : memref<64x16xf32, #tpu.memory_space<vmem>>, vector<8x16xf32>
    %c0_248 = arith.constant 0 : index
    %c0_249 = arith.constant 0 : index
    %374 = vector.load %arg16[%c0_248, %c0_249] : memref<16x16xf32, #tpu.memory_space<vmem>>, vector<16x16xf32>
    %cst_250 = arith.constant dense<0.000000e+00> : vector<8x16xf32>
    %375 = tpu.matmul %360, %374, %cst_250 {dimension_numbers = #tpu.dot_dimension_numbers<[1], [0], [0], [1], [0, 0, 1, 1], [], []>} : vector<8x16xf32>, vector<16x16xf32>, vector<8x16xf32> -> vector<8x16xf32>
    %376 = arith.addf %373, %375 : vector<8x16xf32>
    %377 = arith.negf %376 : vector<8x16xf32>
    %378 = math.exp %377 : vector<8x16xf32>
    %cst_251 = arith.constant 1.000000e+00 : f32
    %379 = vector.broadcast %cst_251 : f32 to vector<8x16xf32>
    %380 = arith.addf %379, %378 : vector<8x16xf32>
    %381 = arith.divf %379, %380 : vector<8x16xf32>
    %382 = arith.index_cast %359 : i32 to index
    %c0_252 = arith.constant 0 : index
    %383 = vector.load %arg33[%382, %c0_252] : memref<64x16xf32, #tpu.memory_space<vmem>>, vector<8x16xf32>
    %c0_253 = arith.constant 0 : index
    %c0_254 = arith.constant 0 : index
    %384 = vector.load %arg17[%c0_253, %c0_254] : memref<16x16xf32, #tpu.memory_space<vmem>>, vector<16x16xf32>
    %cst_255 = arith.constant dense<0.000000e+00> : vector<8x16xf32>
    %385 = tpu.matmul %360, %384, %cst_255 {dimension_numbers = #tpu.dot_dimension_numbers<[1], [0], [0], [1], [0, 0, 1, 1], [], []>} : vector<8x16xf32>, vector<16x16xf32>, vector<8x16xf32> -> vector<8x16xf32>
    %386 = arith.addf %383, %385 : vector<8x16xf32>
    %387 = math.tanh %386 : vector<8x16xf32>
    %388 = arith.index_cast %359 : i32 to index
    %c0_256 = arith.constant 0 : index
    %389 = vector.load %arg34[%388, %c0_256] : memref<64x16xf32, #tpu.memory_space<vmem>>, vector<8x16xf32>
    %c0_257 = arith.constant 0 : index
    %c0_258 = arith.constant 0 : index
    %390 = vector.load %arg18[%c0_257, %c0_258] : memref<16x16xf32, #tpu.memory_space<vmem>>, vector<16x16xf32>
    %cst_259 = arith.constant dense<0.000000e+00> : vector<8x16xf32>
    %391 = tpu.matmul %360, %390, %cst_259 {dimension_numbers = #tpu.dot_dimension_numbers<[1], [0], [0], [1], [0, 0, 1, 1], [], []>} : vector<8x16xf32>, vector<16x16xf32>, vector<8x16xf32> -> vector<8x16xf32>
    %392 = arith.addf %389, %391 : vector<8x16xf32>
    %393 = arith.negf %392 : vector<8x16xf32>
    %394 = math.exp %393 : vector<8x16xf32>
    %cst_260 = arith.constant 1.000000e+00 : f32
    %395 = vector.broadcast %cst_260 : f32 to vector<8x16xf32>
    %396 = arith.addf %395, %394 : vector<8x16xf32>
    %397 = arith.divf %395, %396 : vector<8x16xf32>
    %398 = arith.mulf %381, %361 : vector<8x16xf32>
    %399 = arith.mulf %371, %387 : vector<8x16xf32>
    %400 = arith.addf %398, %399 : vector<8x16xf32>
    %401 = math.tanh %400 : vector<8x16xf32>
    %402 = arith.mulf %397, %401 : vector<8x16xf32>
    %c0_261 = arith.constant 0 : index
    %c0_262 = arith.constant 0 : index
    %403 = vector.load %arg36[%c0_261, %c0_262] : memref<8x16xf32, #tpu.memory_space<vmem>>, vector<8x16xf32>
    tpu.vector_store %arg36[%c0_261, %c0_262], %402 {strides = array<i32>} : memref<8x16xf32, #tpu.memory_space<vmem>>, vector<8x16xf32>,
    %c0_263 = arith.constant 0 : index
    %c0_264 = arith.constant 0 : index
    %404 = vector.load %arg37[%c0_263, %c0_264] : memref<8x16xf32, #tpu.memory_space<vmem>>, vector<8x16xf32>
    tpu.vector_store %arg37[%c0_263, %c0_264], %400 {strides = array<i32>} : memref<8x16xf32, #tpu.memory_space<vmem>>, vector<8x16xf32>,
    %405 = arith.index_cast %359 : i32 to index
    %c0_265 = arith.constant 0 : index
    %406 = vector.load %arg35[%405, %c0_265] : memref<64x16xf32, #tpu.memory_space<vmem>>, vector<8x16xf32>
    tpu.vector_store %arg35[%405, %c0_265], %402 {strides = array<i32>} : memref<64x16xf32, #tpu.memory_space<vmem>>, vector<8x16xf32>,
    %c7_i32 = arith.constant 7 : i32
    %c8_i32_266 = arith.constant 8 : i32
    %407 = arith.muli %c7_i32, %c8_i32_266 : i32
    %408 = tpu.assume_multiple %407, 8 : i32
    %c0_267 = arith.constant 0 : index
    %c0_268 = arith.constant 0 : index
    %409 = vector.load %arg36[%c0_267, %c0_268] : memref<8x16xf32, #tpu.memory_space<vmem>>, vector<8x16xf32>
    %c0_269 = arith.constant 0 : index
    %c0_270 = arith.constant 0 : index
    %410 = vector.load %arg37[%c0_269, %c0_270] : memref<8x16xf32, #tpu.memory_space<vmem>>, vector<8x16xf32>
    %411 = arith.index_cast %408 : i32 to index
    %c0_271 = arith.constant 0 : index
    %412 = vector.load %arg31[%411, %c0_271] : memref<64x16xf32, #tpu.memory_space<vmem>>, vector<8x16xf32>
    %c0_272 = arith.constant 0 : index
    %c0_273 = arith.constant 0 : index
    %413 = vector.load %arg15[%c0_272, %c0_273] : memref<16x16xf32, #tpu.memory_space<vmem>>, vector<16x16xf32>
    %cst_274 = arith.constant dense<0.000000e+00> : vector<8x16xf32>
    %414 = tpu.matmul %409, %413, %cst_274 {dimension_numbers = #tpu.dot_dimension_numbers<[1], [0], [0], [1], [0, 0, 1, 1], [], []>} : vector<8x16xf32>, vector<16x16xf32>, vector<8x16xf32> -> vector<8x16xf32>
    %415 = arith.addf %412, %414 : vector<8x16xf32>
    %416 = arith.negf %415 : vector<8x16xf32>
    %417 = math.exp %416 : vector<8x16xf32>
    %cst_275 = arith.constant 1.000000e+00 : f32
    %418 = vector.broadcast %cst_275 : f32 to vector<8x16xf32>
    %419 = arith.addf %418, %417 : vector<8x16xf32>
    %420 = arith.divf %418, %419 : vector<8x16xf32>
    %421 = arith.index_cast %408 : i32 to index
    %c0_276 = arith.constant 0 : index
    %422 = vector.load %arg32[%421, %c0_276] : memref<64x16xf32, #tpu.memory_space<vmem>>, vector<8x16xf32>
    %c0_277 = arith.constant 0 : index
    %c0_278 = arith.constant 0 : index
    %423 = vector.load %arg16[%c0_277, %c0_278] : memref<16x16xf32, #tpu.memory_space<vmem>>, vector<16x16xf32>
    %cst_279 = arith.constant dense<0.000000e+00> : vector<8x16xf32>
    %424 = tpu.matmul %409, %423, %cst_279 {dimension_numbers = #tpu.dot_dimension_numbers<[1], [0], [0], [1], [0, 0, 1, 1], [], []>} : vector<8x16xf32>, vector<16x16xf32>, vector<8x16xf32> -> vector<8x16xf32>
    %425 = arith.addf %422, %424 : vector<8x16xf32>
    %426 = arith.negf %425 : vector<8x16xf32>
    %427 = math.exp %426 : vector<8x16xf32>
    %cst_280 = arith.constant 1.000000e+00 : f32
    %428 = vector.broadcast %cst_280 : f32 to vector<8x16xf32>
    %429 = arith.addf %428, %427 : vector<8x16xf32>
    %430 = arith.divf %428, %429 : vector<8x16xf32>
    %431 = arith.index_cast %408 : i32 to index
    %c0_281 = arith.constant 0 : index
    %432 = vector.load %arg33[%431, %c0_281] : memref<64x16xf32, #tpu.memory_space<vmem>>, vector<8x16xf32>
    %c0_282 = arith.constant 0 : index
    %c0_283 = arith.constant 0 : index
    %433 = vector.load %arg17[%c0_282, %c0_283] : memref<16x16xf32, #tpu.memory_space<vmem>>, vector<16x16xf32>
    %cst_284 = arith.constant dense<0.000000e+00> : vector<8x16xf32>
    %434 = tpu.matmul %409, %433, %cst_284 {dimension_numbers = #tpu.dot_dimension_numbers<[1], [0], [0], [1], [0, 0, 1, 1], [], []>} : vector<8x16xf32>, vector<16x16xf32>, vector<8x16xf32> -> vector<8x16xf32>
    %435 = arith.addf %432, %434 : vector<8x16xf32>
    %436 = math.tanh %435 : vector<8x16xf32>
    %437 = arith.index_cast %408 : i32 to index
    %c0_285 = arith.constant 0 : index
    %438 = vector.load %arg34[%437, %c0_285] : memref<64x16xf32, #tpu.memory_space<vmem>>, vector<8x16xf32>
    %c0_286 = arith.constant 0 : index
    %c0_287 = arith.constant 0 : index
    %439 = vector.load %arg18[%c0_286, %c0_287] : memref<16x16xf32, #tpu.memory_space<vmem>>, vector<16x16xf32>
    %cst_288 = arith.constant dense<0.000000e+00> : vector<8x16xf32>
    %440 = tpu.matmul %409, %439, %cst_288 {dimension_numbers = #tpu.dot_dimension_numbers<[1], [0], [0], [1], [0, 0, 1, 1], [], []>} : vector<8x16xf32>, vector<16x16xf32>, vector<8x16xf32> -> vector<8x16xf32>
    %441 = arith.addf %438, %440 : vector<8x16xf32>
    %442 = arith.negf %441 : vector<8x16xf32>
    %443 = math.exp %442 : vector<8x16xf32>
    %cst_289 = arith.constant 1.000000e+00 : f32
    %444 = vector.broadcast %cst_289 : f32 to vector<8x16xf32>
    %445 = arith.addf %444, %443 : vector<8x16xf32>
    %446 = arith.divf %444, %445 : vector<8x16xf32>
    %447 = arith.mulf %430, %410 : vector<8x16xf32>
    %448 = arith.mulf %420, %436 : vector<8x16xf32>
    %449 = arith.addf %447, %448 : vector<8x16xf32>
    %450 = math.tanh %449 : vector<8x16xf32>
    %451 = arith.mulf %446, %450 : vector<8x16xf32>
    %c0_290 = arith.constant 0 : index
    %c0_291 = arith.constant 0 : index
    %452 = vector.load %arg36[%c0_290, %c0_291] : memref<8x16xf32, #tpu.memory_space<vmem>>, vector<8x16xf32>
    tpu.vector_store %arg36[%c0_290, %c0_291], %451 {strides = array<i32>} : memref<8x16xf32, #tpu.memory_space<vmem>>, vector<8x16xf32>,
    %c0_292 = arith.constant 0 : index
    %c0_293 = arith.constant 0 : index
    %453 = vector.load %arg37[%c0_292, %c0_293] : memref<8x16xf32, #tpu.memory_space<vmem>>, vector<8x16xf32>
    tpu.vector_store %arg37[%c0_292, %c0_293], %449 {strides = array<i32>} : memref<8x16xf32, #tpu.memory_space<vmem>>, vector<8x16xf32>,
    %454 = arith.index_cast %408 : i32 to index
    %c0_294 = arith.constant 0 : index
    %455 = vector.load %arg35[%454, %c0_294] : memref<64x16xf32, #tpu.memory_space<vmem>>, vector<8x16xf32>
    tpu.vector_store %arg35[%454, %c0_294], %451 {strides = array<i32>} : memref<64x16xf32, #tpu.memory_space<vmem>>, vector<8x16xf32>,
    %c8_i32_295 = arith.constant 8 : i32
    %c0_296 = arith.constant 0 : index
    %c0_297 = arith.constant 0 : index
    %456 = vector.load %arg35[%c0_296, %c0_297] : memref<64x16xf32, #tpu.memory_space<vmem>>, vector<64x16xf32>
    %c0_298 = arith.constant 0 : index
    %c0_299 = arith.constant 0 : index
    %457 = vector.load %arg23[%c0_298, %c0_299] : memref<16x16xf32, #tpu.memory_space<vmem>>, vector<16x16xf32>
    %cst_300 = arith.constant dense<0.000000e+00> : vector<64x16xf32>
    %458 = tpu.matmul %456, %457, %cst_300 {dimension_numbers = #tpu.dot_dimension_numbers<[1], [0], [0], [1], [0, 0, 1, 1], [], []>} : vector<64x16xf32>, vector<16x16xf32>, vector<64x16xf32> -> vector<64x16xf32>
    %c0_301 = arith.constant 0 : index
    %c0_302 = arith.constant 0 : index
    %459 = vector.load %arg24[%c0_301, %c0_302] : memref<1x16xf32, #tpu.memory_space<vmem>>, vector<1x16xf32>
    %460 = vector.broadcast %459 : vector<1x16xf32> to vector<64x16xf32>
    %461 = arith.addf %458, %460 : vector<64x16xf32>
    %cst_303 = arith.constant 0.000000e+00 : f32
    %462 = vector.broadcast %cst_303 : f32 to vector<64x16xf32>
    %463 = arith.maximumf %461, %462 : vector<64x16xf32>
    %c0_304 = arith.constant 0 : index
    %c0_305 = arith.constant 0 : index
    %464 = vector.load %arg25[%c0_304, %c0_305] : memref<16x32xf32, #tpu.memory_space<vmem>>, vector<16x32xf32>
    %cst_306 = arith.constant dense<0.000000e+00> : vector<64x32xf32>
    %465 = tpu.matmul %463, %464, %cst_306 {dimension_numbers = #tpu.dot_dimension_numbers<[1], [0], [0], [1], [0, 0, 1, 1], [], []>} : vector<64x16xf32>, vector<16x32xf32>, vector<64x32xf32> -> vector<64x32xf32>
    %c0_307 = arith.constant 0 : index
    %c0_308 = arith.constant 0 : index
    %466 = vector.load %arg26[%c0_307, %c0_308] : memref<1x32xf32, #tpu.memory_space<vmem>>, vector<1x32xf32>
    %467 = vector.broadcast %466 : vector<1x32xf32> to vector<64x32xf32>
    %468 = arith.addf %465, %467 : vector<64x32xf32>
    %cst_309 = arith.constant 0.000000e+00 : f32
    %469 = vector.broadcast %cst_309 : f32 to vector<64x32xf32>
    %470 = arith.maximumf %468, %469 : vector<64x32xf32>
    %c0_310 = arith.constant 0 : index
    %c0_311 = arith.constant 0 : index
    %471 = vector.load %arg27[%c0_310, %c0_311] : memref<32x32xf32, #tpu.memory_space<vmem>>, vector<32x32xf32>
    %cst_312 = arith.constant dense<0.000000e+00> : vector<64x32xf32>
    %472 = tpu.matmul %470, %471, %cst_312 {dimension_numbers = #tpu.dot_dimension_numbers<[1], [0], [0], [1], [0, 0, 1, 1], [], []>} : vector<64x32xf32>, vector<32x32xf32>, vector<64x32xf32> -> vector<64x32xf32>
    %c0_313 = arith.constant 0 : index
    %c0_314 = arith.constant 0 : index
    %473 = vector.load %arg28[%c0_313, %c0_314] : memref<1x32xf32, #tpu.memory_space<vmem>>, vector<1x32xf32>
    %474 = vector.broadcast %473 : vector<1x32xf32> to vector<64x32xf32>
    %475 = arith.addf %472, %474 : vector<64x32xf32>
    %c0_315 = arith.constant 0 : index
    %c0_316 = arith.constant 0 : index
    %476 = vector.load %arg29[%c0_315, %c0_316] : memref<32x32xf32, #tpu.memory_space<vmem>>, vector<32x32xf32>
    %cst_317 = arith.constant dense<0.000000e+00> : vector<64x32xf32>
    %477 = tpu.matmul %475, %476, %cst_317 {dimension_numbers = #tpu.dot_dimension_numbers<[1], [0], [0], [1], [0, 0, 1, 1], [], []>} : vector<64x32xf32>, vector<32x32xf32>, vector<64x32xf32> -> vector<64x32xf32>
    %478 = arith.maximumf %475, %477 : vector<64x32xf32>
    %479 = arith.subf %475, %478 : vector<64x32xf32>
    %480 = arith.subf %475, %478 : vector<64x32xf32>
    %481 = math.exp %480 : vector<64x32xf32>
    %482 = arith.subf %477, %478 : vector<64x32xf32>
    %483 = math.exp %482 : vector<64x32xf32>
    %484 = arith.addf %481, %483 : vector<64x32xf32>
    %485 = math.log %484 : vector<64x32xf32>
    %486 = arith.subf %479, %485 : vector<64x32xf32>
    %c0_318 = arith.constant 0 : index
    %c0_319 = arith.constant 0 : index
    %487 = vector.load %arg30[%c0_318, %c0_319] : memref<64x32xf32, #tpu.memory_space<vmem>>, vector<64x32xf32>
    tpu.vector_store %arg30[%c0_318, %c0_319], %486 {strides = array<i32>} : memref<64x32xf32, #tpu.memory_space<vmem>>, vector<64x32xf32>,
    return
  }
}

</mosaic_0001>

<bundles_post_ra>
// kernel: tpu_custom_call.1
= control target key start
LH: loop header
LB: loop body
LE: loop exit
PB: predicated region body
PF: predicated region fallthrough
CT: control target
= control target key end

     0   :  { %s3611_s6 = smov 1   ;;  %s3612_s10 = smov 2   ;;  %s4385_s0 = inlined_call_operand.smem [shape: u32[31], index: -1, kind: input, shape index: {}] }
   0x1   :  { %s3667_s5 = sld [smem:[%s4385_s0]]   ;;  %s3613_s14 = smov 3  }
   0x2   :  { %s3672_s9 = sld [smem:[%s4385_s0 + %s3611_s6]]   ;;  %s3614_s18 = smov 4  }
   0x3   :  { %s3677_s13 = sld [smem:[%s4385_s0 + %s3612_s10]]   ;;  %s3615_s22 = smov 5  }
   0x4   :  { %s3682_s17 = sld [smem:[%s4385_s0 + %s3613_s14]]   ;;  %s3616_s26 = smov 6  }
   0x5   :  { %s3687_s21 = sld [smem:[%s4385_s0 + %s3614_s18]]   ;;  %s3617_s30 = smov 7  }
   0x6   :  { %s3692_s25 = sld [smem:[%s4385_s0 + %s3615_s22]]   ;;  %s3618_s4 = smov 8  }
   0x7   :  { %4394 = sst [smem:[#allocation40_spill]] %s3667_s5  ;;  %s3619_s10 = smov 9  }
   0x8   :  { %s3697_s29 = sld [smem:[%s4385_s0 + %s3616_s26]]   ;;  %s3620_s15 = smov 10  }
   0x9   :  { %s3702_s3 = sld [smem:[%s4385_s0 + %s3617_s30]]   ;;  %s3621_s20 = smov 11  }
   0xa   :  { %4395 = sst [smem:[#allocation41_spill]] %s3682_s17  ;;  %s3622_s26 = smov 12  }
   0xb   :  { %4396 = sst [smem:[#allocation42_spill]] %s3687_s21  ;;  %s3623_s1 = smov 13  }
   0xc   :  { %4397 = sst [smem:[#allocation43_spill]] %s3692_s25  ;;  %s3624_s7 = smov 14  }
   0xd   :  { %s3707_s8 = sld [smem:[%s4385_s0 + %s3618_s4]]   ;;  %s3626_s22 = smov 16  }
   0xe   :  { %s3712_s14 = sld [smem:[%s4385_s0 + %s3619_s10]]   ;;  %s3627_s28 = smov 17  }
   0xf   :  { %4398 = sst [smem:[#allocation44_spill]] %s3702_s3 }
  0x10   :  { %s3717_s19 = sld [smem:[%s4385_s0 + %s3620_s15]]   ;;  %s3625_s15 = smov 15  }
  0x11   :  { %s3722_s24 = sld [smem:[%s4385_s0 + %s3621_s20]]  }
  0x12   :  { %s3727_s30 = sld [smem:[%s4385_s0 + %s3622_s26]]  }
  0x13   :  { %s3732_s6 = sld [smem:[%s4385_s0 + %s3623_s1]]  }
  0x14   :  { %4399 = sst [smem:[#allocation45_spill]] %s3712_s14 }
  0x15   :  { %s3737_s12 = sld [smem:[%s4385_s0 + %s3624_s7]]   ;;  %s3628_s7 = smov 18  }
  0x16   :  { %s3742_s20 = sld [smem:[%s4385_s0 + %s3625_s15]]   ;;  %s3629_s15 = smov 19  }
  0x17   :  { %4400 = sst [smem:[#allocation46_spill]] %s3722_s24 }
  0x18   :  { %s3747_s27 = sld [smem:[%s4385_s0 + %s3626_s22]]   ;;  %s3630_s22 = smov 20  }
  0x19   :  { %s3752_s4 = sld [smem:[%s4385_s0 + %s3627_s28]]   ;;  %s3631_s28 = smov 21  }
  0x1a   :  { %s3757_s24 = sld [smem:[%s4385_s0 + %s3628_s7]]   ;;  %s3632_s7 = smov 22  }
  0x1b   :  { %s3762_s14 = sld [smem:[%s4385_s0 + %s3629_s15]]   ;;  %s3633_s15 = smov 23  }
  0x1c   :  { %s3767_s3 = sld [smem:[%s4385_s0 + %s3630_s22]]   ;;  %s3634_s22 = smov 24  }
  0x1d   :  { %s3772_s21 = sld [smem:[%s4385_s0 + %s3631_s28]]   ;;  %s3635_s28 = smov 25  }
  0x1e   :  { %s3782_s25 = sld [smem:[%s4385_s0 + %s3633_s15]]   ;;  %s3637_s15 = smov 27  }
  0x1f   :  { %s3787_s17 = sld [smem:[%s4385_s0 + %s3634_s22]]   ;;  %s3638_s22 = smov 28  }
  0x20   :  { %4401 = sst [smem:[#allocation47_spill]] %s3757_s24 }
  0x21   :  { %s3777_s24 = sld [smem:[%s4385_s0 + %s3632_s7]]   ;;  %s3636_s7 = smov 26  }
  0x22   :  { %s3802_s5 = sld [smem:[%s4385_s0 + %s3637_s15]]  }
  0x23   :  { %4402 = sst [smem:[#allocation48_spill]] %s3772_s21 }
  0x24   :  { %s3792_s21 = sld [smem:[%s4385_s0 + %s3635_s28]]   ;;  %s3639_s28 = smov 29  }
  0x25   :  { %4404 = sst [smem:[#allocation50_spill]] %s3787_s17 }
  0x26   :  { %s3807_s17 = sld [smem:[%s4385_s0 + %s3638_s22]]  }
  0x27   :  { %4403 = sst [smem:[#allocation49_spill]] %s3777_s24 }
  0x28   :  { %s3797_s24 = sld [smem:[%s4385_s0 + %s3636_s7]]   ;;  %s3640_s7 = smov 30  }
  0x2a   :  { %4405 = sst [smem:[#allocation51_spill]] %s3792_s21 }
  0x2b   :  { %s3812_s21 = sld [smem:[%s4385_s0 + %s3639_s28]]  }
  0x2e   :  { %4406 = sst [smem:[#allocation52_spill]] %s3797_s24 }
  0x2f   :  { %s3817_s24 = sld [smem:[%s4385_s0 + %s3640_s7]]  }
  0x30   :  { %66 = vsyncpa [#allocation10], 0 }
  0x31   :  { %67 = vsyncpa [#allocation12], 0 }
  0x32   :  { %68 = vsyncpa [#allocation15], 0 }
  0x33   :  { %69 = vsyncpa [#allocation18], 0 }
  0x34   :  { %70 = vsyncpa [#allocation21], 0 }
  0x35   :  { %71 = vsyncpa [#allocation24], 0 }
  0x36   :  { %72 = vsyncpa [#allocation27], 0  ;;  %s94_s15 = sshll.u32 %s3677_s13, 4  ;;  %s95_s15 = int_to_ptr.hbm [resolvable:$true] %s94_s15 }
  0x37   :  { %73 = vsyncpa [#allocation30], 0  ;;  %s3641_s16 = smov [#allocation11]   ;;  %s124_s22 = sshll.u32 %s3707_s8, 4  ;;  %s125_s22 = int_to_ptr.hbm [resolvable:$true] %s124_s22 }
  0x38   :  { %s96_s18 = sshll.u32 %s3641_s16, 4  ;;  %s3235_s0 = sshra.s32 %s95_s15, 4  ;;  %s97_s18 = int_to_ptr.vmem [resolvable:$true] %s96_s18  ;;  %s3236_s0 = int_to_ptr.hbm [resolvable:$true] %s3235_s0 }
  0x39   :  { %s3237_s23 = scalar_lea.hbm %s3236_s0, 1  ;;  %s3239_s26 = scalar_lea.hbm %s3677_s13, 1 }
  0x3a   :  { %p3238_p0 = scmp.ne.s32.totalorder %s3236_s0, %s3237_s23  ;;  %p3240_p1 = scmp.lt.s32.totalorder %s3236_s0, %s3677_s13 }
  0x3b   :  { %p3241_p2 = scmp.lt.s32.totalorder %s3239_s26, %s3237_s23 }
  0x3d   :  { %p3242_p3 = por %p3241_p2, %p3240_p1 }
  0x3f   :  { %p3243_p4 = pnand %p3242_p3, %p3238_p0 }
  0x41   :  { %3246 = shalt.err (!%p3243_p4)
}
  0x42   :  { %99 = dma.hbm_to_vmem [thread:$0]  %s95_s15, 16, %s97_s18, [#allocation12]  }
  0x43   :  { %s3642_s28 = smov [#allocation14]   ;;  %s3259_s2 = sshra.s32 %s125_s22, 4  ;;  %s3260_s2 = int_to_ptr.hbm [resolvable:$true] %s3259_s2 }
  0x44   :  { %s126_s1 = sshll.u32 %s3642_s28, 4  ;;  %s3261_s7 = scalar_lea.hbm %s3260_s2, 1  ;;  %s127_s1 = int_to_ptr.vmem [resolvable:$true] %s126_s1 }
  0x45   :  { %p3262_p5 = scmp.ne.s32.totalorder %s3260_s2, %s3261_s7  ;;  %s3263_s10 = scalar_lea.hbm %s3707_s8, 1 }
  0x46   :  { %p3264_p6 = scmp.lt.s32.totalorder %s3260_s2, %s3707_s8  ;;  %p3265_p7 = scmp.lt.s32.totalorder %s3263_s10, %s3261_s7 }
  0x48   :  { %p3266_p8 = por %p3265_p7, %p3264_p6 }
  0x4a   :  { %p3267_p9 = pnand %p3266_p8, %p3262_p5 }
  0x4c   :  { %3270 = shalt.err (!%p3267_p9)
}
  0x4d   :  { %129 = dma.hbm_to_vmem [thread:$0]  %s125_s22, 16, %s127_s1, [#allocation15]  }
  0x4e   :  { %s149_s13 = sshll.u32 %s3727_s30, 4  ;;  %s3643_s11 = smov [#allocation17]   ;;  %s150_s13 = int_to_ptr.hbm [resolvable:$true] %s149_s13 }
  0x4f   :  { %s151_s15 = sshll.u32 %s3643_s11, 4  ;;  %s175_s16 = sshll.u32 %s3737_s12, 4  ;;  %s152_s15 = int_to_ptr.vmem [resolvable:$true] %s151_s15  ;;  %s176_s16 = int_to_ptr.hbm [resolvable:$true] %s175_s16 }
  0x50   :  { %s3283_s18 = sshra.s32 %s150_s13, 4  ;;  %s3287_s8 = scalar_lea.hbm %s3727_s30, 16  ;;  %s3284_s18 = int_to_ptr.hbm [resolvable:$true] %s3283_s18 }
  0x51   :  { %s3285_s0 = scalar_lea.hbm %s3284_s18, 16  ;;  %p3288_p11 = scmp.lt.s32.totalorder %s3284_s18, %s3727_s30 }
  0x52   :  { %p3286_p10 = scmp.ne.s32.totalorder %s3284_s18, %s3285_s0  ;;  %p3289_p12 = scmp.lt.s32.totalorder %s3287_s8, %s3285_s0 }
  0x54   :  { %p3290_p13 = por %p3289_p12, %p3288_p11 }
  0x56   :  { %p3291_p0 = pnand %p3290_p13, %p3286_p10 }
  0x58   :  { %3294 = shalt.err (!%p3291_p0)
}
  0x59   :  { %s3644_s22 = smov 128   ;;  %s3645_s23 = smov 8  }
  0x5a   :  { %157 = dma.hbm_to_vmem [thread:$0]  %s150_s13, 256, %s152_s15, [#allocation18], %s3644_s22, %s3644_s22, %s3645_s23  }
  0x5b   :  { %s3646_s26 = smov [#allocation20]   ;;  %s201_s1 = sshll.u32 %s3747_s27, 4  ;;  %s3833_s1 = int_to_ptr.hbm [resolvable:$true] %s201_s1 }
  0x5c   :  { %s177_s28 = sshll.u32 %s3646_s26, 4  ;;  %s3307_s30 = sshra.s32 %s176_s16, 4  ;;  %s178_s28 = int_to_ptr.vmem [resolvable:$true] %s177_s28  ;;  %s3308_s30 = int_to_ptr.hbm [resolvable:$true] %s3307_s30 }
  0x5d   :  { %s3309_s2 = scalar_lea.hbm %s3308_s30, 16  ;;  %s3311_s7 = scalar_lea.hbm %s3737_s12, 16 }
  0x5e   :  { %p3310_p1 = scmp.ne.s32.totalorder %s3308_s30, %s3309_s2  ;;  %p3312_p2 = scmp.lt.s32.totalorder %s3308_s30, %s3737_s12 }
  0x5f   :  { %p3313_p3 = scmp.lt.s32.totalorder %s3311_s7, %s3309_s2 }
  0x61   :  { %p3314_p4 = por %p3313_p3, %p3312_p2 }
  0x63   :  { %p3315_p5 = pnand %p3314_p4, %p3310_p1 }
  0x65   :  { %3318 = shalt.err (!%p3315_p5)
}
  0x66   :  { %183 = dma.hbm_to_vmem [thread:$0]  %s176_s16, 256, %s178_s28, [#allocation21], %s3644_s22, %s3644_s22, %s3645_s23  }
  0x67   :  { %s230_s10 = sshll.u32 %s3762_s14, 4  ;;  %s3647_s13 = smov [#allocation23]   ;;  %s231_s10 = int_to_ptr.hbm [resolvable:$true] %s230_s10 }
  0x68   :  { %s203_s11 = sshll.u32 %s3647_s13, 4  ;;  %s3331_s15 = sshra.s32 %s3833_s1, 4  ;;  %s204_s11 = int_to_ptr.vmem [resolvable:$true] %s203_s11  ;;  %s3332_s15 = int_to_ptr.hbm [resolvable:$true] %s3331_s15 }
  0x69   :  { %s3333_s12 = scalar_lea.hbm %s3332_s15, 16  ;;  %s3335_s18 = scalar_lea.hbm %s3747_s27, 16 }
  0x6a   :  { %p3334_p6 = scmp.ne.s32.totalorder %s3332_s15, %s3333_s12  ;;  %p3336_p7 = scmp.lt.s32.totalorder %s3332_s15, %s3747_s27 }
  0x6b   :  { %p3337_p8 = scmp.lt.s32.totalorder %s3335_s18, %s3333_s12 }
  0x6d   :  { %p3338_p9 = por %p3337_p8, %p3336_p7 }
  0x6f   :  { %p3339_p10 = pnand %p3338_p9, %p3334_p6 }
  0x71   :  { %3342 = shalt.err (!%p3339_p10)
}
  0x72   :  { %209 = dma.hbm_to_vmem [thread:$0]  %s3833_s1, 256, %s204_s11, [#allocation24], %s3644_s22, %s3644_s22, %s3645_s23  }
  0x73   :  { %s3648_s16 = smov [#allocation26]   ;;  %s255_s8 = sshll.u32 %s3782_s25, 4  ;;  %s3849_s8 = int_to_ptr.hbm [resolvable:$true] %s255_s8 }
  0x74   :  { %s232_s0 = sshll.u32 %s3648_s16, 4  ;;  %s3355_s26 = sshra.s32 %s231_s10, 4  ;;  %s233_s0 = int_to_ptr.vmem [resolvable:$true] %s232_s0  ;;  %s3356_s26 = int_to_ptr.hbm [resolvable:$true] %s3355_s26 }
  0x75   :  { %s3357_s27 = scalar_lea.hbm %s3356_s26, 1  ;;  %s3359_s28 = scalar_lea.hbm %s3762_s14, 1 }
  0x76   :  { %p3358_p11 = scmp.ne.s32.totalorder %s3356_s26, %s3357_s27  ;;  %p3360_p12 = scmp.lt.s32.totalorder %s3356_s26, %s3762_s14 }
  0x77   :  { %p3361_p13 = scmp.lt.s32.totalorder %s3359_s28, %s3357_s27 }
  0x79   :  { %p3362_p0 = por %p3361_p13, %p3360_p12 }
  0x7b   :  { %p3363_p1 = pnand %p3362_p0, %p3358_p11 }
  0x7d   :  { %3366 = shalt.err (!%p3363_p1)
}
  0x7e   :  { %235 = dma.hbm_to_vmem [thread:$0]  %s231_s10, 16, %s233_s0, [#allocation27]  }
  0x7f   :  { %s80_s1 = sshll.u32 %s3672_s9, 4  ;;  %s3649_s30 = smov [#allocation29]   ;;  %s3854_s1 = int_to_ptr.hbm [resolvable:$true] %s80_s1 }
  0x80   :  { %s257_s2 = sshll.u32 %s3649_s30, 4  ;;  %s3379_s7 = sshra.s32 %s3849_s8, 4  ;;  %s258_s2 = int_to_ptr.vmem [resolvable:$true] %s257_s2  ;;  %s3380_s7 = int_to_ptr.hbm [resolvable:$true] %s3379_s7 }
  0x81   :  { %s3381_s13 = scalar_lea.hbm %s3380_s7, 16  ;;  %s3383_s14 = scalar_lea.hbm %s3782_s25, 16 }
  0x82   :  { %p3382_p2 = scmp.ne.s32.totalorder %s3380_s7, %s3381_s13  ;;  %p3384_p3 = scmp.lt.s32.totalorder %s3380_s7, %s3782_s25 }
  0x83   :  { %p3385_p4 = scmp.lt.s32.totalorder %s3383_s14, %s3381_s13 }
  0x85   :  { %p3386_p5 = por %p3385_p4, %p3384_p3 }
  0x87   :  { %p3387_p6 = pnand %p3386_p5, %p3382_p2 }
  0x89   :  { %3390 = shalt.err (!%p3387_p6)
}
  0x8a   :  { %263 = dma.hbm_to_vmem [thread:$0]  %s3849_s8, 256, %s258_s2, [#allocation30], %s3644_s22, %s3644_s22, %s3645_s23  }
  0x8b   :  { %s3650_s10 = smov [#allocation9]   ;;  %s111_s15 = sshll.u32 %s3697_s29, 4  ;;  %s112_s15 = int_to_ptr.hbm [resolvable:$true] %s111_s15 }
  0x8c   :  { %s82_s11 = sshll.u32 %s3650_s10, 4  ;;  %s3403_s12 = sshra.s32 %s3854_s1, 4  ;;  %s83_s11 = int_to_ptr.vmem [resolvable:$true] %s82_s11  ;;  %s3404_s12 = int_to_ptr.hbm [resolvable:$true] %s3403_s12 }
  0x8d   :  { %s3405_s25 = scalar_lea.hbm %s3404_s12, 24  ;;  %s3407_s18 = scalar_lea.hbm %s3672_s9, 24 }
  0x8e   :  { %p3406_p7 = scmp.ne.s32.totalorder %s3404_s12, %s3405_s25  ;;  %p3408_p8 = scmp.lt.s32.totalorder %s3404_s12, %s3672_s9 }
  0x8f   :  { %p3409_p9 = scmp.lt.s32.totalorder %s3407_s18, %s3405_s25 }
  0x91   :  { %p3410_p10 = por %p3409_p9, %p3408_p8 }
  0x93   :  { %p3411_p11 = pnand %p3410_p10, %p3406_p7 }
  0x95   :  { %3414 = shalt.err (!%p3411_p11)
}
  0x96   :  { %88 = dma.hbm_to_vmem [thread:$0]  %s3854_s1, 384, %s83_s11, [#allocation10], %s3644_s22, %s3644_s22, %s3645_s23  }
  0x97   :  { %s137_s16 = sshll.u32 %s3717_s19, 4  ;;  %s3651_s0 = smov [#allocation13]   ;;  %s138_s16 = int_to_ptr.hbm [resolvable:$true] %s137_s16 }
  0x98   :  { %s113_s8 = sshll.u32 %s3651_s0, 4  ;;  %s3427_s26 = sshra.s32 %s112_s15, 4  ;;  %s114_s8 = int_to_ptr.vmem [resolvable:$true] %s113_s8  ;;  %s3428_s26 = int_to_ptr.hbm [resolvable:$true] %s3427_s26 }
  0x99   :  { %s3429_s9 = scalar_lea.hbm %s3428_s26, 1  ;;  %s3431_s27 = scalar_lea.hbm %s3697_s29, 1 }
  0x9a   :  { %p3430_p12 = scmp.ne.s32.totalorder %s3428_s26, %s3429_s9  ;;  %p3432_p13 = scmp.lt.s32.totalorder %s3428_s26, %s3697_s29 }
  0x9b   :  { %p3433_p0 = scmp.lt.s32.totalorder %s3431_s27, %s3429_s9 }
  0x9d   :  { %p3434_p1 = por %p3433_p0, %p3432_p13 }
  0x9f   :  { %p3435_p2 = pnand %p3434_p1, %p3430_p12 }
  0xa1   :  { %3438 = shalt.err (!%p3435_p2)
}
  0xa2   :  { %116 = dma.hbm_to_vmem [thread:$0]  %s112_s15, 16, %s114_s8, [#allocation12]  }
  0xa3   :  { %s3652_s28 = smov [#allocation16]   ;;  %s162_s30 = sshll.u32 %s3732_s6, 4  ;;  %s3875_s30 = int_to_ptr.hbm [resolvable:$true] %s162_s30 }
  0xa4   :  { %s139_s1 = sshll.u32 %s3652_s28, 4  ;;  %s3451_s2 = sshra.s32 %s138_s16, 4  ;;  %s140_s1 = int_to_ptr.vmem [resolvable:$true] %s139_s1  ;;  %s3452_s2 = int_to_ptr.hbm [resolvable:$true] %s3451_s2 }
  0xa5   :  { %s3453_s7 = scalar_lea.hbm %s3452_s2, 1  ;;  %s3455_s13 = scalar_lea.hbm %s3717_s19, 1 }
  0xa6   :  { %p3454_p3 = scmp.ne.s32.totalorder %s3452_s2, %s3453_s7  ;;  %p3456_p4 = scmp.lt.s32.totalorder %s3452_s2, %s3717_s19 }
  0xa7   :  { %p3457_p5 = scmp.lt.s32.totalorder %s3455_s13, %s3453_s7 }
  0xa9   :  { %p3458_p6 = por %p3457_p5, %p3456_p4 }
  0xab   :  { %p3459_p7 = pnand %p3458_p6, %p3454_p3 }
  0xad   :  { %3462 = shalt.err (!%p3459_p7)
}
  0xae   :  { %142 = dma.hbm_to_vmem [thread:$0]  %s138_s16, 16, %s140_s1, [#allocation15]  }
  0xaf   :  { %s188_s29 = sshll.u32 %s3742_s20, 4  ;;  %s3653_s14 = smov [#allocation19]   ;;  %s3880_s29 = int_to_ptr.hbm [resolvable:$true] %s188_s29 }
  0xb0   :  { %s164_s10 = sshll.u32 %s3653_s14, 4  ;;  %s3475_s11 = sshra.s32 %s3875_s30, 4  ;;  %s165_s10 = int_to_ptr.vmem [resolvable:$true] %s164_s10  ;;  %s3476_s11 = int_to_ptr.hbm [resolvable:$true] %s3475_s11 }
  0xb1   :  { %s3477_s15 = scalar_lea.hbm %s3476_s11, 16  ;;  %s3479_s19 = scalar_lea.hbm %s3732_s6, 16 }
  0xb2   :  { %p3478_p8 = scmp.ne.s32.totalorder %s3476_s11, %s3477_s15  ;;  %p3480_p9 = scmp.lt.s32.totalorder %s3476_s11, %s3732_s6 }
  0xb3   :  { %p3481_p10 = scmp.lt.s32.totalorder %s3479_s19, %s3477_s15 }
  0xb5   :  { %p3482_p11 = por %p3481_p10, %p3480_p9 }
  0xb7   :  { %p3483_p12 = pnand %p3482_p11, %p3478_p8 }
  0xb9   :  { %3486 = shalt.err (!%p3483_p12)
}
  0xba   :  { %170 = dma.hbm_to_vmem [thread:$0]  %s3875_s30, 256, %s165_s10, [#allocation18], %s3644_s22, %s3644_s22, %s3645_s23  }
  0xbb   :  { %s3654_s12 = smov [#allocation22]   ;;  %s214_s18 = sshll.u32 %s3752_s4, 4  ;;  %s3890_s18 = int_to_ptr.hbm [resolvable:$true] %s214_s18 }
  0xbc   :  { %s190_s25 = sshll.u32 %s3654_s12, 4  ;;  %s3499_s6 = sshra.s32 %s3880_s29, 4  ;;  %s191_s25 = int_to_ptr.vmem [resolvable:$true] %s190_s25  ;;  %s3500_s6 = int_to_ptr.hbm [resolvable:$true] %s3499_s6 }
  0xbd   :  { %s3501_s16 = scalar_lea.hbm %s3500_s6, 16  ;;  %s3503_s0 = scalar_lea.hbm %s3742_s20, 16 }
  0xbe   :  { %p3502_p13 = scmp.ne.s32.totalorder %s3500_s6, %s3501_s16  ;;  %p3504_p0 = scmp.lt.s32.totalorder %s3500_s6, %s3742_s20 }
  0xbf   :  { %p3505_p1 = scmp.lt.s32.totalorder %s3503_s0, %s3501_s16 }
  0xc1   :  { %p3506_p2 = por %p3505_p1, %p3504_p0 }
  0xc3   :  { %p3507_p3 = pnand %p3506_p2, %p3502_p13 }
  0xc5   :  { %3510 = shalt.err (!%p3507_p3)
}
  0xc6   :  { %196 = dma.hbm_to_vmem [thread:$0]  %s3880_s29, 256, %s191_s25, [#allocation21], %s3644_s22, %s3644_s22, %s3645_s23  }
  0xc7   :  { %s241_s8 = sshll.u32 %s3767_s3, 4  ;;  %s3655_s26 = smov [#allocation25]   ;;  %s242_s8 = int_to_ptr.hbm [resolvable:$true] %s241_s8 }
  0xc8   :  { %s216_s9 = sshll.u32 %s3655_s26, 4  ;;  %s3523_s27 = sshra.s32 %s3890_s18, 4  ;;  %s217_s9 = int_to_ptr.vmem [resolvable:$true] %s216_s9  ;;  %s3524_s27 = int_to_ptr.hbm [resolvable:$true] %s3523_s27 }
  0xc9   :  { %s3525_s20 = scalar_lea.hbm %s3524_s27, 16  ;;  %s3527_s28 = scalar_lea.hbm %s3752_s4, 16 }
  0xca   :  { %p3526_p4 = scmp.ne.s32.totalorder %s3524_s27, %s3525_s20  ;;  %p3528_p5 = scmp.lt.s32.totalorder %s3524_s27, %s3752_s4 }
  0xcb   :  { %p3529_p6 = scmp.lt.s32.totalorder %s3527_s28, %s3525_s20 }
  0xcd   :  { %p3530_p7 = por %p3529_p6, %p3528_p5 }
  0xcf   :  { %p3531_p8 = pnand %p3530_p7, %p3526_p4 }
  0xd1   :  { %3534 = shalt.err (!%p3531_p8)
}
  0xd2   :  { %s4407_s1 = sld [smem:[#allocation51_spill]]  ;;  %s3656_s30 = smov [#allocation28]  }
  0xd3   :  { %222 = dma.hbm_to_vmem [thread:$0]  %s3890_s18, 256, %s217_s9, [#allocation24], %s3644_s22, %s3644_s22, %s3645_s23  }
  0xd4   :  { %s243_s2 = sshll.u32 %s3656_s30, 4  ;;  %s3547_s13 = sshra.s32 %s242_s8, 4  ;;  %s244_s2 = int_to_ptr.vmem [resolvable:$true] %s243_s2  ;;  %s3548_s13 = int_to_ptr.hbm [resolvable:$true] %s3547_s13 }
  0xd5   :  { %s3549_s29 = scalar_lea.hbm %s3548_s13, 1  ;;  %s3551_s4 = scalar_lea.hbm %s3767_s3, 1 }
  0xd6   :  { %p3550_p9 = scmp.ne.s32.totalorder %s3548_s13, %s3549_s29  ;;  %p3552_p10 = scmp.lt.s32.totalorder %s3548_s13, %s3767_s3 }
  0xd7   :  { %p3553_p11 = scmp.lt.s32.totalorder %s3551_s4, %s3549_s29 }
  0xd8   :  { %s270_s7 = sshll.u32 %s4407_s1, 4  ;;  %s271_s7 = int_to_ptr.hbm [resolvable:$true] %s270_s7 }
  0xd9   :  { %p3554_p12 = por %p3553_p11, %p3552_p10 }
  0xdb   :  { %p3555_p13 = pnand %p3554_p12, %p3550_p9 }
  0xdd   :  { %3558 = shalt.err (!%p3555_p13)
}
  0xde   :  { %246 = dma.hbm_to_vmem [thread:$0]  %s242_s8, 16, %s244_s2, [#allocation27]  }
  0xdf   :  { %s3657_s14 = smov [#allocation31]   ;;  %s3571_s11 = sshra.s32 %s271_s7, 4  ;;  %s3572_s11 = int_to_ptr.hbm [resolvable:$true] %s3571_s11 }
  0xe0   :  { %s272_s10 = sshll.u32 %s3657_s14, 4  ;;  %s3573_s15 = scalar_lea.hbm %s3572_s11, 16  ;;  %s273_s10 = int_to_ptr.vmem [resolvable:$true] %s272_s10 }
  0xe1   :  { %p3574_p0 = scmp.ne.s32.totalorder %s3572_s11, %s3573_s15  ;;  %s3575_s19 = scalar_lea.hbm %s4407_s1, 16 }
  0xe2   :  { %p3576_p1 = scmp.lt.s32.totalorder %s3572_s11, %s4407_s1  ;;  %p3577_p2 = scmp.lt.s32.totalorder %s3575_s19, %s3573_s15 }
  0xe4   :  { %p3578_p3 = por %p3577_p2, %p3576_p1 }
  0xe6   :  { %p3579_p4 = pnand %p3578_p3, %p3574_p0 }
  0xe8   :  { %3582 = shalt.err (!%p3579_p4)
}
  0xe9   :  { %278 = dma.hbm_to_vmem [thread:$0]  %s271_s7, 256, %s273_s10, [#allocation30], %s3644_s22, %s3644_s22, %s3645_s23  }
  0xea   :  { %3595 = dma.done.wait [#allocation10], 384  }
  0xeb   :  { %3596 = vsyncadd [#allocation10], 4294966912 }
  0xec   :  { %3597 = dma.done.wait [#allocation12], 32  }
  0xed   :  { %3598 = vsyncadd [#allocation12], 4294967264 }
  0xee   :  { %3599 = dma.done.wait [#allocation15], 32  }
  0xef   :  { %3600 = vsyncadd [#allocation15], 4294967264 }
  0xf0   :  { %3601 = dma.done.wait [#allocation18], 512  }
  0xf1   :  { %3602 = vsyncadd [#allocation18], 4294966784 }
  0xf2   :  { %3603 = dma.done.wait [#allocation21], 512  }
  0xf3   :  { %3604 = vsyncadd [#allocation21], 4294966784 }
  0xf4   :  { %3605 = dma.done.wait [#allocation24], 512  }
  0xf5   :  { %3606 = vsyncadd [#allocation24], 4294966784 }
  0xf6   :  { %3607 = dma.done.wait [#allocation27], 32  }
  0xf7   :  { %3608 = vsyncadd [#allocation27], 4294967264 }
  0xf8   :  { %3609 = dma.done.wait [#allocation30], 512  }
  0xf9   :  { %3610 = vsyncadd [#allocation30], 4294966784  ;;  %s4408_s3 = sld [smem:[#allocation40_spill]]  ;;  %vm387_vm0 = vcmask 1043456   ;;  %v357_v0 = vld [vmem:[#allocation9 + $0x10] sm:$0xf] }
  0xfa   :  { %s4409_s22 = sld [smem:[#allocation41_spill]]  ;;  %v356_v1 = vld [vmem:[#allocation9 + $0x8] sm:$0xff]  ;;  %2838 = vmatpush.msk.msra.mxu0 %vm387_vm0, %v357_v0  ;;  %v355_v2 = vld [vmem:[#allocation9] sm:$0xff]  ;;  %vm362_vm1 = vcmask 162816   ;;  %v3047_v15 = vld [vmem:[#allocation11] ss:$0 sm:$0xff] }
  0xfb   :  { %s4410_s23 = sld [smem:[#allocation43_spill]]  ;;  %vm448_vm2 = vcmask 261120   ;;  %vm534_vm3 = vcmask 523264   ;;  %vm780_vm4 = vcmask 130048  }
  0xfc   :  { %405 = vmatpush.msra.mxu0 %v356_v1  ;;  %s4411_s12 = sld [smem:[#allocation42_spill]] }
  0xfd   :  { %s4412_s25 = sld [smem:[#allocation44_spill]] }
  0xfe   :  { %406 = vmatpush.msra.mxu0 %v355_v2  ;;  %s4413_s18 = sld [smem:[#allocation45_spill]] }
  0xff   :  { %v347_v3 = vld [vmem:[%s4408_s3] sm:$0xff]  ;;  %v348_v4 = vld [vmem:[%s4408_s3 + $0x8] sm:$0xff]  ;;  %v349_v5 = vld [vmem:[%s4408_s3 + $0x10] sm:$0xff]  ;;  %s4414_s6 = sld [smem:[#allocation46_spill]] }
 0x100   :  { %2839 = vmatmul.msk.f32.vlgmr.msra.gmra.mxu0 %vm362_vm1, %v347_v3  ;;  %v350_v6 = vld [vmem:[%s4408_s3 + $0x18] sm:$0xff]  ;;  %v351_v8 = vld [vmem:[%s4408_s3 + $0x20] sm:$0xff]  ;;  %v352_v9 = vld [vmem:[%s4408_s3 + $0x28] sm:$0xff]  ;;  %s4415_s16 = sld [smem:[#allocation47_spill]] }
 0x101   :  { %v443_v7 = vld [vmem:[%s4409_s22 + $0x18] sm:$0xff]  ;;  %v353_v10 = vld [vmem:[%s4408_s3 + $0x30] sm:$0xff]  ;;  %v441_v13 = vld [vmem:[%s4409_s22 + $0x8] sm:$0xff]  ;;  %s4416_s0 = sld [smem:[#allocation49_spill]] }
 0x102   :  { %485 = vmatpush.msra.mxu1 %v443_v7  ;;  %v354_v11 = vld [vmem:[%s4408_s3 + $0x38] sm:$0xff]  ;;  %v442_v12 = vld [vmem:[%s4409_s22 + $0x10] sm:$0xff]  ;;  %v440_v14 = vld [vmem:[%s4409_s22] sm:$0xff]  ;;  %s4417_s8 = sld [smem:[#allocation48_spill]] }
 0x103   :  { %v529_v28 = vld [vmem:[%s4410_s23 + $0x38] sm:$0xff]  ;;  %v528_v29 = vld [vmem:[%s4410_s23 + $0x30] sm:$0xff]  ;;  %v527_v30 = vld [vmem:[%s4410_s23 + $0x28] sm:$0xff]  ;;  %s4420_s26 = sld [smem:[#allocation50_spill]] }
 0x104   :  { %486 = vmatpush.msra.mxu1 %v442_v12  ;;  %567 = vmatpush.msra.mxu2 %v529_v28  ;;  %v526_v33 = vld [vmem:[%s4410_s23 + $0x20] sm:$0xff]  ;;  %v525_v35 = vld [vmem:[%s4410_s23 + $0x18] sm:$0xff]  ;;  %v524_v45 = vld [vmem:[%s4410_s23 + $0x10] sm:$0xff]  ;;  %s4421_s9 = sld [smem:[#allocation52_spill]] }
 0x105   :  { %v523_v46 = vld [vmem:[%s4410_s23 + $0x8] sm:$0xff]  ;;  %v522_v47 = vld [vmem:[%s4410_s23] sm:$0xff]  ;;  %v615_v61 = vld [vmem:[%s4412_s25 + $0x38] sm:$0xff] }
 0x106   :  { %487 = vmatpush.msra.mxu1 %v441_v13  ;;  %568 = vmatpush.msra.mxu2 %v528_v29  ;;  %v3048_v48 = vld [vmem:[%s4411_s12] ss:$0 sm:$0xff]  ;;  %v614_v62 = vld [vmem:[%s4412_s25 + $0x30] sm:$0xff]  ;;  %v613_v63 = vld [vmem:[%s4412_s25 + $0x28] sm:$0xff] }
 0x107   :  { %652 = vmatpush.msra.mxu3 %v615_v61  ;;  %v612_v2 = vld [vmem:[%s4412_s25 + $0x20] sm:$0xff]  ;;  %v855_v61 = vld [vmem:[#allocation17 + $0x8] sm:$0xff] }
 0x108   :  { %2840 = vmatmul.msk.f32.gmra.mxu0 %vm362_vm1, %v348_v4  ;;  %488 = vmatpush.msra.mxu1 %v440_v14  ;;  %v611_v4 = vld [vmem:[%s4412_s25 + $0x18] sm:$0xff]  ;;  %v610_v14 = vld [vmem:[%s4412_s25 + $0x10] sm:$0xff] }
 0x109   :  { %569 = vmatpush.msra.mxu2 %v527_v30  ;;  %653 = vmatpush.msra.mxu3 %v614_v62  ;;  %v696_v30 = vld [vmem:[%s4413_s18 + $0x18] sm:$0xff]  ;;  %v774_v62 = vld [vmem:[%s4414_s6] sm:$0xff] }
 0x10a   :  { %737 = vmatpush.msrb.mxu0 %v696_v30 }
 0x10b   :  { %570 = vmatpush.msra.mxu2 %v526_v33  ;;  %654 = vmatpush.msra.mxu3 %v613_v63  ;;  %v909_v63 = vld [vmem:[#allocation19] sm:$0xff] }
 0x10d   :  { %571 = vmatpush.msra.mxu2 %v525_v35  ;;  %655 = vmatpush.msra.mxu3 %v612_v2  ;;  %v693_v35 = vld [vmem:[%s4413_s18] sm:$0xff] }
 0x10f   :  { %572 = vmatpush.msra.mxu2 %v524_v45  ;;  %656 = vmatpush.msra.mxu3 %v611_v4 }
 0x110   :  { %2841 = vmatmul.msk.f32.gmra.mxu0 %vm362_vm1, %v349_v5 }
 0x111   :  { %573 = vmatpush.msra.mxu2 %v523_v46  ;;  %657 = vmatpush.msra.mxu3 %v610_v14  ;;  %v3050_v46 = vld [vmem:[#allocation14] ss:$0 sm:$0xff]  ;;  %v964_v14 = vld [vmem:[#allocation20] sm:$0xff] }
 0x113   :  { %574 = vmatpush.msra.mxu2 %v522_v47 }
 0x115   :  { %874 = vmatpush.msrb.mxu2 %v855_v61 }
 0x118   :  { %2842 = vmatmul.msk.f32.gmra.mxu0 %vm362_vm1, %v350_v6 }
 0x120   :  { %2843 = vmatmul.msk.f32.gmra.mxu0 %vm362_vm1, %v351_v8 }
 0x128   :  { %2844 = vmatmul.msk.f32.gmra.mxu0 %vm362_vm1, %v352_v9 }
 0x130   :  { %2845 = vmatmul.msk.f32.gmra.mxu0 %vm362_vm1, %v353_v10 }
 0x138   :  { %2846 = vmatmul.msk.f32.gmra.mxu0 %vm362_vm1, %v354_v11 }
 0x17d   :  { %v408_v16 = vpop.f32.mrf.mxu0 }
 0x17e   :  { %v409_v17 = vadd.f32 %v3047_v15, %v408_v16  ;;  %v608_v16 = vld [vmem:[%s4412_s25] sm:$0xff] }
 0x180   :  { %v432_v18 = vmax.f32 %v409_v17, 0.0  ;;  %v3049_v17 = vld [vmem:[#allocation13] ss:$0 sm:$0xff] }
 0x182   :  { %2847 = vmatmul.msk.f32.vlgmr.msra.gmra.mxu1 %vm448_vm2, %v432_v18 }
 0x185   :  { %v411_v19 = vpop.f32.mrf.mxu0 }
 0x186   :  { %v412_v20 = vadd.f32 %v3047_v15, %v411_v19 }
 0x188   :  { %v433_v21 = vmax.f32 %v412_v20, 0.0 }
 0x18a   :  { %2848 = vmatmul.msk.f32.gmra.mxu1 %vm448_vm2, %v433_v21 }
 0x18d   :  { %v414_v22 = vpop.f32.mrf.mxu0 }
 0x18e   :  { %v415_v23 = vadd.f32 %v3047_v15, %v414_v22 }
 0x190   :  { %v434_v24 = vmax.f32 %v415_v23, 0.0 }
 0x192   :  { %2849 = vmatmul.msk.f32.gmra.mxu1 %vm448_vm2, %v434_v24 }
 0x195   :  { %v417_v25 = vpop.f32.mrf.mxu0 }
 0x196   :  { %v418_v26 = vadd.f32 %v3047_v15, %v417_v25 }
 0x198   :  { %v435_v27 = vmax.f32 %v418_v26, 0.0 }
 0x19a   :  { %2850 = vmatmul.msk.f32.gmra.mxu1 %vm448_vm2, %v435_v27 }
 0x19d   :  { %v420_v31 = vpop.f32.mrf.mxu0 }
 0x19e   :  { %v421_v32 = vadd.f32 %v3047_v15, %v420_v31  ;;  %v695_v31 = vld [vmem:[%s4413_s18 + $0x10] sm:$0xff] }
 0x19f   :  { %738 = vmatpush.msrb.mxu0 %v695_v31 }
 0x1a0   :  { %v436_v34 = vmax.f32 %v421_v32, 0.0  ;;  %v694_v32 = vld [vmem:[%s4413_s18 + $0x8] sm:$0xff] }
 0x1a1   :  { %739 = vmatpush.msrb.mxu0 %v694_v32 }
 0x1a2   :  { %2851 = vmatmul.msk.f32.gmra.mxu1 %vm448_vm2, %v436_v34 }
 0x1a3   :  { %740 = vmatpush.msrb.mxu0 %v693_v35 }
 0x1a5   :  { %v423_v36 = vpop.f32.mrf.mxu0 }
 0x1a6   :  { %v424_v37 = vadd.f32 %v3047_v15, %v423_v36 }
 0x1a8   :  { %v437_v38 = vmax.f32 %v424_v37, 0.0 }
 0x1aa   :  { %2852 = vmatmul.msk.f32.gmra.mxu1 %vm448_vm2, %v437_v38 }
 0x1ad   :  { %v426_v39 = vpop.f32.mrf.mxu0 }
 0x1ae   :  { %v427_v40 = vadd.f32 %v3047_v15, %v426_v39 }
 0x1b0   :  { %v438_v41 = vmax.f32 %v427_v40, 0.0 }
 0x1b2   :  { %2853 = vmatmul.msk.f32.gmra.mxu1 %vm448_vm2, %v438_v41 }
 0x1b5   :  { %v429_v42 = vpop.f32.mrf.mxu0 }
 0x1b6   :  { %v430_v43 = vadd.f32 %v3047_v15, %v429_v42  ;;  %v609_v15 = vld [vmem:[%s4412_s25 + $0x8] sm:$0xff] }
 0x1b7   :  { %658 = vmatpush.msra.mxu3 %v609_v15  ;;  %v3990_v15 = vld [vmem:[#allocation22 + $0x8] sm:$0xff] }
 0x1b8   :  { %v439_v44 = vmax.f32 %v430_v43, 0.0 }
 0x1b9   :  { %659 = vmatpush.msra.mxu3 %v608_v16  ;;  %v3994_v16 = vld [vmem:[%s4415_s16 + $0x8] sm:$0xff] }
 0x1ba   :  { %2854 = vmatmul.msk.f32.gmra.mxu1 %vm448_vm2, %v439_v44 }
 0x1ff   :  { %v490_v49 = vpop.f32.mrf.mxu1 }
 0x200   :  { %v491_v50 = vadd.f32 %v3048_v48, %v490_v49 }
 0x202   :  { %v514_v51 = vmax.f32 %v491_v50, 0.0 }
 0x204   :  { %2855 = vmatmul.msk.f32.vlgmr.msra.gmra.mxu2 %vm534_vm3, %v514_v51 }
 0x207   :  { %v493_v52 = vpop.f32.mrf.mxu1 }
 0x208   :  { %v494_v53 = vadd.f32 %v3048_v48, %v493_v52 }
 0x20a   :  { %v515_v54 = vmax.f32 %v494_v53, 0.0 }
 0x20c   :  { %2856 = vmatmul.msk.f32.gmra.mxu2 %vm534_vm3, %v515_v54 }
 0x20f   :  { %v496_v55 = vpop.f32.mrf.mxu1 }
 0x210   :  { %v497_v56 = vadd.f32 %v3048_v48, %v496_v55 }
 0x212   :  { %v516_v57 = vmax.f32 %v497_v56, 0.0 }
 0x214   :  { %2857 = vmatmul.msk.f32.gmra.mxu2 %vm534_vm3, %v516_v57 }
 0x217   :  { %v499_v58 = vpop.f32.mrf.mxu1 }
 0x218   :  { %v500_v59 = vadd.f32 %v3048_v48, %v499_v58 }
 0x21a   :  { %v517_v60 = vmax.f32 %v500_v59, 0.0  ;;  %v775_v59 = vld [vmem:[%s4414_s6 + $0x8] sm:$0xff] }
 0x21b   :  { %819 = vmatpush.msrb.mxu1 %v775_v59 }
 0x21c   :  { %2858 = vmatmul.msk.f32.gmra.mxu2 %vm534_vm3, %v517_v60  ;;  %v910_v60 = vld [vmem:[#allocation19 + $0x8] sm:$0xff] }
 0x21d   :  { %929 = vmatpush.msrb.mxu3 %v910_v60  ;;  %820 = vmatpush.msrb.mxu1 %v774_v62 }
 0x21f   :  { %v502_v0 = vpop.f32.mrf.mxu1  ;;  %930 = vmatpush.msrb.mxu3 %v909_v63  ;;  %1043 = vmatpush.msra.mxu1 %v3990_v15 }
 0x220   :  { %v503_v1 = vadd.f32 %v3048_v48, %v502_v0  ;;  %v854_v0 = vld [vmem:[#allocation17] sm:$0xff] }
 0x221   :  { %875 = vmatpush.msrb.mxu2 %v854_v0 }
 0x222   :  { %v518_v3 = vmax.f32 %v503_v1, 0.0 }
 0x224   :  { %2859 = vmatmul.msk.f32.gmra.mxu2 %vm534_vm3, %v518_v3 }
 0x227   :  { %v505_v5 = vpop.f32.mrf.mxu1 }
 0x228   :  { %v506_v6 = vadd.f32 %v3048_v48, %v505_v5 }
 0x22a   :  { %v519_v7 = vmax.f32 %v506_v6, 0.0 }
 0x22c   :  { %2860 = vmatmul.msk.f32.gmra.mxu2 %vm534_vm3, %v519_v7 }
 0x22f   :  { %v508_v8 = vpop.f32.mrf.mxu1 }
 0x230   :  { %v509_v9 = vadd.f32 %v3048_v48, %v508_v8 }
 0x232   :  { %v520_v10 = vmax.f32 %v509_v9, 0.0 }
 0x234   :  { %2861 = vmatmul.msk.f32.gmra.mxu2 %vm534_vm3, %v520_v10 }
 0x237   :  { %v511_v11 = vpop.f32.mrf.mxu1 }
 0x238   :  { %v512_v12 = vadd.f32 %v3048_v48, %v511_v11 }
 0x23a   :  { %v521_v13 = vmax.f32 %v512_v12, 0.0 }
 0x23c   :  { %2862 = vmatmul.msk.f32.gmra.mxu2 %vm534_vm3, %v521_v13  ;;  %v965_v13 = vld [vmem:[#allocation20 + $0x8] sm:$0xff] }
 0x23d   :  { %984 = vmatpush.msra.mxu0 %v965_v13 }
 0x23f   :  { %985 = vmatpush.msra.mxu0 %v964_v14 }
 0x287   :  { %v576_v18 = vpop.f32.mrf.mxu2 }
 0x288   :  { %v577_v19 = vadd.f32 %v3049_v17, %v576_v18  ;;  %v4000_v18 = vld [vmem:[#allocation16] ss:$0 sm:$0xff] }
 0x28a   :  { %v600_v20 = vmax.f32 %v577_v19, 0.0 }
 0x28c   :  { %2863 = vmatmul.msk.f32.vlgmr.msra.gmra.mxu3 %vm534_vm3, %v600_v20 }
 0x28d   :  { %1154 = vmatpush.msra.mxu3 %v3994_v16 }
 0x28f   :  { %v579_v21 = vpop.f32.mrf.mxu2 }
 0x290   :  { %v580_v22 = vadd.f32 %v3049_v17, %v579_v21 }
 0x292   :  { %v601_v23 = vmax.f32 %v580_v22, 0.0  ;;  %v4007_v22 = vld [vmem:[#allocation22] sm:$0xff] }
 0x293   :  { %1044 = vmatpush.msra.mxu1 %v4007_v22 }
 0x294   :  { %2864 = vmatmul.msk.f32.gmra.mxu3 %vm534_vm3, %v601_v23 }
 0x297   :  { %v582_v24 = vpop.f32.mrf.mxu2 }
 0x298   :  { %v583_v25 = vadd.f32 %v3049_v17, %v582_v24 }
 0x29a   :  { %v602_v26 = vmax.f32 %v583_v25, 0.0 }
 0x29c   :  { %2865 = vmatmul.msk.f32.gmra.mxu3 %vm534_vm3, %v602_v26 }
 0x29f   :  { %v585_v27 = vpop.f32.mrf.mxu2 }
 0x2a0   :  { %v586_v28 = vadd.f32 %v3049_v17, %v585_v27 }
 0x2a2   :  { %v603_v29 = vmax.f32 %v586_v28, 0.0 }
 0x2a4   :  { %2866 = vmatmul.msk.f32.gmra.mxu3 %vm534_vm3, %v603_v29  ;;  %v4017_v29 = vld [vmem:[%s4415_s16] sm:$0xff] }
 0x2a5   :  { %1155 = vmatpush.msra.mxu3 %v4017_v29 }
 0x2a7   :  { %v588_v33 = vpop.f32.mrf.mxu2 }
 0x2a8   :  { %v589_v34 = vadd.f32 %v3049_v17, %v588_v33  ;;  %v4026_v33 = vld [vmem:[#allocation25] sm:$0xff] }
 0x2aa   :  { %v604_v36 = vmax.f32 %v589_v34, 0.0  ;;  %v3658_v34 = vmov 0.0  }
 0x2ab   :  { %1019 = vst.msk [vmem:[#allocation7] sm:$0xff] %vm780_vm4, %v3658_v34 }
 0x2ac   :  { %2867 = vmatmul.msk.f32.gmra.mxu3 %vm534_vm3, %v604_v36  ;;  %1020 = vst.msk [vmem:[#allocation8] sm:$0xff] %vm780_vm4, %v3658_v34 }
 0x2af   :  { %v591_v37 = vpop.f32.mrf.mxu2 }
 0x2b0   :  { %v592_v38 = vadd.f32 %v3049_v17, %v591_v37 }
 0x2b2   :  { %v605_v39 = vmax.f32 %v592_v38, 0.0  ;;  %v4039_v38 = vld [vmem:[#allocation23 + $0x8] sm:$0xff] }
 0x2b4   :  { %2868 = vmatmul.msk.f32.gmra.mxu3 %vm534_vm3, %v605_v39  ;;  %v4043_v39 = vld [vmem:[#allocation23] sm:$0xff] }
 0x2b7   :  { %v594_v40 = vpop.f32.mrf.mxu2 }
 0x2b8   :  { %v595_v41 = vadd.f32 %v3049_v17, %v594_v40 }
 0x2ba   :  { %v606_v42 = vmax.f32 %v595_v41, 0.0 }
 0x2bc   :  { %2869 = vmatmul.msk.f32.gmra.mxu3 %vm534_vm3, %v606_v42 }
 0x2bf   :  { %v597_v43 = vpop.f32.mrf.mxu2 }
 0x2c0   :  { %v598_v44 = vadd.f32 %v3049_v17, %v597_v43  ;;  %v3997_v17 = vld [vmem:[#allocation25 + $0x8] sm:$0xff] }
 0x2c1   :  { %1129 = vmatpush.msra.mxu2 %v3997_v17 }
 0x2c2   :  { %v607_v45 = vmax.f32 %v598_v44, 0.0 }
 0x2c3   :  { %1130 = vmatpush.msra.mxu2 %v4026_v33 }
 0x2c4   :  { %2870 = vmatmul.msk.f32.gmra.mxu3 %vm534_vm3, %v607_v45 }
 0x30f   :  { %v661_v47 = vpop.f32.mrf.mxu3 }
 0x310   :  { %v662_v48 = vadd.f32 %v3050_v46, %v661_v47 }
 0x312   :  { %v685_v49 = vmax.f32 %v662_v48, 0.0 }
 0x314   :  { %2871 = vmatmul.msk.f32.vlgmr.msrb.gmra.mxu0 %vm448_vm2, %v685_v49  ;;  %v1021_v49 = vld [vmem:[#allocation7] sm:$0xff] }
 0x317   :  { %v664_v50 = vpop.f32.mrf.mxu3 }
 0x318   :  { %v665_v51 = vadd.f32 %v3050_v46, %v664_v50  ;;  %v4076_v50 = vld [vmem:[#allocation26] ss:$0 sm:$0xff] }
 0x31a   :  { %v686_v52 = vmax.f32 %v665_v51, 0.0  ;;  %v4079_v51 = vld [vmem:[%s4416_s0] ss:$0 sm:$0xff] }
 0x31c   :  { %2872 = vmatmul.msk.f32.gmra.mxu0 %vm448_vm2, %v686_v52 }
 0x31f   :  { %v667_v53 = vpop.f32.mrf.mxu3 }
 0x320   :  { %v668_v54 = vadd.f32 %v3050_v46, %v667_v53 }
 0x322   :  { %v687_v55 = vmax.f32 %v668_v54, 0.0 }
 0x324   :  { %2873 = vmatmul.msk.f32.gmra.mxu0 %vm448_vm2, %v687_v55 }
 0x327   :  { %v670_v56 = vpop.f32.mrf.mxu3 }
 0x328   :  { %v671_v57 = vadd.f32 %v3050_v46, %v670_v56  ;;  %v4084_v56 = vld [vmem:[#allocation28] ss:$0 sm:$0xff] }
 0x32a   :  { %v688_v58 = vmax.f32 %v671_v57, 0.0  ;;  %v4088_v57 = vld [vmem:[%s4417_s8] ss:$0 sm:$0xff] }
 0x32c   :  { %2874 = vmatmul.msk.f32.gmra.mxu0 %vm448_vm2, %v688_v58 }
 0x32f   :  { %v673_v1 = vpop.f32.mrf.mxu3 }
 0x330   :  { %v674_v2 = vadd.f32 %v3050_v46, %v673_v1 }
 0x332   :  { %v689_v3 = vmax.f32 %v674_v2, 0.0 }
 0x334   :  { %2875 = vmatmul.msk.f32.gmra.mxu0 %vm448_vm2, %v689_v3 }
 0x337   :  { %v676_v4 = vpop.f32.mrf.mxu3 }
 0x338   :  { %v677_v5 = vadd.f32 %v3050_v46, %v676_v4 }
 0x33a   :  { %v690_v6 = vmax.f32 %v677_v5, 0.0 }
 0x33c   :  { %2876 = vmatmul.msk.f32.gmra.mxu0 %vm448_vm2, %v690_v6 }
 0x33f   :  { %v679_v7 = vpop.f32.mrf.mxu3 }
 0x340   :  { %v680_v8 = vadd.f32 %v3050_v46, %v679_v7 }
 0x342   :  { %v691_v9 = vmax.f32 %v680_v8, 0.0 }
 0x344   :  { %2877 = vmatmul.msk.f32.gmra.mxu0 %vm448_vm2, %v691_v9 }
 0x347   :  { %v682_v10 = vpop.f32.mrf.mxu3 }
 0x348   :  { %v683_v11 = vadd.f32 %v3050_v46, %v682_v10 }
 0x34a   :  { %v692_v12 = vmax.f32 %v683_v11, 0.0 }
 0x34c   :  { %2878 = vmatmul.msk.f32.gmra.mxu0 %vm448_vm2, %v692_v12 }
 0x391   :  { %v742_v19 = vpop.f32.mrf.mxu0 }
 0x392   :  { %v743_v20 = vadd.f32 %v4000_v18, %v742_v19 }
 0x394   :  { %v766_v21 = vmax.f32 %v743_v20, 0.0 }
 0x396   :  { %2879 = vmatmul.msk.f32.vlgmr.msrb.gmra.mxu1 %vm780_vm4, %v766_v21  ;;  %2887 = vmatmul.msk.f32.vlgmr.msrb.gmra.mxu2 %vm780_vm4, %v766_v21 }
 0x397   :  { %2895 = vmatmul.msk.f32.vlgmr.msrb.gmra.mxu3 %vm780_vm4, %v766_v21  ;;  %2903 = vmatmul.msk.f32.vlgmr.msra.gmra.mxu0 %vm780_vm4, %v766_v21 }
 0x398   :  { %1299 = vmatpush.msrb.mxu3 %v3997_v17  ;;  %1086 = vmatpush.msrb.mxu1 %v4039_v38 }
 0x399   :  { %v745_v23 = vpop.f32.mrf.mxu0  ;;  %1255 = vmatpush.msrb.mxu2 %v4039_v38 }
 0x39a   :  { %v746_v24 = vadd.f32 %v4000_v18, %v745_v23  ;;  %1300 = vmatpush.msrb.mxu3 %v4026_v33  ;;  %1087 = vmatpush.msrb.mxu1 %v4043_v39 }
 0x39b   :  { %1256 = vmatpush.msrb.mxu2 %v4043_v39 }
 0x39c   :  { %v767_v25 = vmax.f32 %v746_v24, 0.0 }
 0x39e   :  { %2880 = vmatmul.msk.f32.gmra.mxu1 %vm780_vm4, %v767_v25  ;;  %2888 = vmatmul.msk.f32.gmra.mxu2 %vm780_vm4, %v767_v25 }
 0x39f   :  { %2896 = vmatmul.msk.f32.gmra.mxu3 %vm780_vm4, %v767_v25  ;;  %2904 = vmatmul.msk.f32.gmra.mxu0 %vm780_vm4, %v767_v25 }
 0x3a1   :  { %v748_v26 = vpop.f32.mrf.mxu0 }
 0x3a2   :  { %v749_v27 = vadd.f32 %v4000_v18, %v748_v26 }
 0x3a4   :  { %v768_v28 = vmax.f32 %v749_v27, 0.0 }
 0x3a6   :  { %2881 = vmatmul.msk.f32.gmra.mxu1 %vm780_vm4, %v768_v28  ;;  %2889 = vmatmul.msk.f32.gmra.mxu2 %vm780_vm4, %v768_v28 }
 0x3a7   :  { %2897 = vmatmul.msk.f32.gmra.mxu3 %vm780_vm4, %v768_v28  ;;  %2905 = vmatmul.msk.f32.gmra.mxu0 %vm780_vm4, %v768_v28 }
 0x3a9   :  { %v751_v30 = vpop.f32.mrf.mxu0 }
 0x3aa   :  { %v752_v31 = vadd.f32 %v4000_v18, %v751_v30 }
 0x3ac   :  { %v769_v32 = vmax.f32 %v752_v31, 0.0 }
 0x3ae   :  { %2882 = vmatmul.msk.f32.gmra.mxu1 %vm780_vm4, %v769_v32  ;;  %2890 = vmatmul.msk.f32.gmra.mxu2 %vm780_vm4, %v769_v32 }
 0x3af   :  { %2898 = vmatmul.msk.f32.gmra.mxu3 %vm780_vm4, %v769_v32  ;;  %2906 = vmatmul.msk.f32.gmra.mxu0 %vm780_vm4, %v769_v32 }
 0x3b1   :  { %v754_v35 = vpop.f32.mrf.mxu0 }
 0x3b2   :  { %v755_v36 = vadd.f32 %v4000_v18, %v754_v35 }
 0x3b4   :  { %v770_v37 = vmax.f32 %v755_v36, 0.0 }
 0x3b6   :  { %2883 = vmatmul.msk.f32.gmra.mxu1 %vm780_vm4, %v770_v37  ;;  %2891 = vmatmul.msk.f32.gmra.mxu2 %vm780_vm4, %v770_v37 }
 0x3b7   :  { %2899 = vmatmul.msk.f32.gmra.mxu3 %vm780_vm4, %v770_v37  ;;  %2907 = vmatmul.msk.f32.gmra.mxu0 %vm780_vm4, %v770_v37 }
 0x3b9   :  { %v757_v40 = vpop.f32.mrf.mxu0 }
 0x3ba   :  { %v758_v41 = vadd.f32 %v4000_v18, %v757_v40 }
 0x3bc   :  { %v771_v42 = vmax.f32 %v758_v41, 0.0 }
 0x3be   :  { %2884 = vmatmul.msk.f32.gmra.mxu1 %vm780_vm4, %v771_v42  ;;  %2892 = vmatmul.msk.f32.gmra.mxu2 %vm780_vm4, %v771_v42 }
 0x3bf   :  { %2900 = vmatmul.msk.f32.gmra.mxu3 %vm780_vm4, %v771_v42  ;;  %2908 = vmatmul.msk.f32.gmra.mxu0 %vm780_vm4, %v771_v42 }
 0x3c1   :  { %v760_v43 = vpop.f32.mrf.mxu0 }
 0x3c2   :  { %v761_v44 = vadd.f32 %v4000_v18, %v760_v43 }
 0x3c4   :  { %v772_v45 = vmax.f32 %v761_v44, 0.0 }
 0x3c6   :  { %2885 = vmatmul.msk.f32.gmra.mxu1 %vm780_vm4, %v772_v45  ;;  %2893 = vmatmul.msk.f32.gmra.mxu2 %vm780_vm4, %v772_v45 }
 0x3c7   :  { %2901 = vmatmul.msk.f32.gmra.mxu3 %vm780_vm4, %v772_v45  ;;  %2909 = vmatmul.msk.f32.gmra.mxu0 %vm780_vm4, %v772_v45 }
 0x3c9   :  { %v763_v46 = vpop.f32.mrf.mxu0 }
 0x3ca   :  { %v764_v47 = vadd.f32 %v4000_v18, %v763_v46 }
 0x3cc   :  { %v773_v48 = vmax.f32 %v764_v47, 0.0 }
 0x3ce   :  { %2886 = vmatmul.msk.f32.gmra.mxu1 %vm780_vm4, %v773_v48  ;;  %2894 = vmatmul.msk.f32.gmra.mxu2 %vm780_vm4, %v773_v48 }
 0x3cf   :  { %2902 = vmatmul.msk.f32.gmra.mxu3 %vm780_vm4, %v773_v48  ;;  %2910 = vmatmul.msk.f32.gmra.mxu0 %vm780_vm4, %v773_v48 }
 0x3d6   :  { %2911 = vmatmul.msk.f32.vlgmr.msra.gmra.mxu1 %vm780_vm4, %v1021_v49  ;;  %2915 = vmatmul.msk.f32.vlgmr.msra.gmra.mxu2 %vm780_vm4, %v1021_v49 }
 0x3d7   :  { %2916 = vmatmul.msk.f32.vlgmr.msra.gmra.mxu3 %vm780_vm4, %v1021_v49  ;;  %1211 = vmatpush.msra.mxu1 %v3990_v15 }
 0x3d8   :  { %1383 = vmatpush.msra.mxu2 %v3990_v15  ;;  %1427 = vmatpush.msra.mxu3 %v4039_v38 }
 0x3d9   :  { %1212 = vmatpush.msra.mxu1 %v4007_v22 }
 0x3da   :  { %1384 = vmatpush.msra.mxu2 %v4007_v22  ;;  %1428 = vmatpush.msra.mxu3 %v4043_v39 }
 0x3de   :  { %2913 = vmatmul.msk.f32.vlgmr.msrb.gmra.mxu1 %vm780_vm4, %v1021_v49 }
 0x3df   :  { %1325 = vmatpush.msrb.mxu1 %v3994_v16 }
 0x3e1   :  { %1326 = vmatpush.msrb.mxu1 %v4017_v29 }
 0x413   :  { %v822_v52 = vpop.f32.mrf.mxu1 }
 0x414   :  { %v823_v53 = vadd.f32 %v4076_v50, %v822_v52  ;;  %v987_v54 = vpop.f32.mrf.mxu0 }
 0x415   :  { %v988_v55 = vadd.f32 %v4079_v51, %v987_v54 }
 0x416   :  { %846 = vst.msk [vmem:[#allocation2] sm:$0xff] %vm780_vm4, %v823_v53 }
 0x417   :  { %1011 = vst.msk [vmem:[#allocation5] sm:$0xff] %vm780_vm4, %v988_v55 }
 0x419   :  { %v877_v58 = vpop.f32.mrf.mxu2 }
 0x41a   :  { %v878_v59 = vadd.f32 %v4084_v56, %v877_v58  ;;  %v932_v60 = vpop.f32.mrf.mxu3 }
 0x41b   :  { %v933_v61 = vadd.f32 %v4088_v57, %v932_v60  ;;  %v825_v62 = vpop.f32.mrf.mxu1 }
 0x41c   :  { %901 = vst.msk [vmem:[#allocation3] sm:$0xff] %vm780_vm4, %v878_v59  ;;  %v826_v63 = vadd.f32 %v4076_v50, %v825_v62  ;;  %v990_v0 = vpop.f32.mrf.mxu0 }
 0x41d   :  { %956 = vst.msk [vmem:[#allocation4] sm:$0xff] %vm780_vm4, %v933_v61  ;;  %v991_v1 = vadd.f32 %v4079_v51, %v990_v0 }
 0x41e   :  { %847 = vst.msk [vmem:[#allocation2 + $0x8] sm:$0xff] %vm780_vm4, %v826_v63 }
 0x41f   :  { %1012 = vst.msk [vmem:[#allocation5 + $0x8] sm:$0xff] %vm780_vm4, %v991_v1 }
 0x421   :  { %v880_v2 = vpop.f32.mrf.mxu2 }
 0x422   :  { %v881_v3 = vadd.f32 %v4084_v56, %v880_v2  ;;  %v935_v4 = vpop.f32.mrf.mxu3  ;;  %v1023_v2 = vld [vmem:[#allocation2] sm:$0xff] }
 0x423   :  { %v936_v5 = vadd.f32 %v4088_v57, %v935_v4  ;;  %v828_v6 = vpop.f32.mrf.mxu1 }
 0x424   :  { %902 = vst.msk [vmem:[#allocation3 + $0x8] sm:$0xff] %vm780_vm4, %v881_v3  ;;  %v829_v7 = vadd.f32 %v4076_v50, %v828_v6  ;;  %v993_v8 = vpop.f32.mrf.mxu0 }
 0x425   :  { %957 = vst.msk [vmem:[#allocation4 + $0x8] sm:$0xff] %vm780_vm4, %v936_v5  ;;  %v994_v9 = vadd.f32 %v4079_v51, %v993_v8 }
 0x426   :  { %848 = vst.msk [vmem:[#allocation2 + $0x10] sm:$0xff] %vm780_vm4, %v829_v7  ;;  %v1069_v7 = vld [vmem:[#allocation3] sm:$0xff] }
 0x427   :  { %1013 = vst.msk [vmem:[#allocation5 + $0x10] sm:$0xff] %vm780_vm4, %v994_v9 }
 0x429   :  { %v883_v10 = vpop.f32.mrf.mxu2 }
 0x42a   :  { %v884_v11 = vadd.f32 %v4084_v56, %v883_v10  ;;  %v938_v12 = vpop.f32.mrf.mxu3 }
 0x42b   :  { %v939_v13 = vadd.f32 %v4088_v57, %v938_v12  ;;  %v831_v14 = vpop.f32.mrf.mxu1 }
 0x42c   :  { %903 = vst.msk [vmem:[#allocation3 + $0x10] sm:$0xff] %vm780_vm4, %v884_v11  ;;  %v832_v18 = vadd.f32 %v4076_v50, %v831_v14  ;;  %v996_v19 = vpop.f32.mrf.mxu0 }
 0x42d   :  { %958 = vst.msk [vmem:[#allocation4 + $0x10] sm:$0xff] %vm780_vm4, %v939_v13  ;;  %v997_v20 = vadd.f32 %v4079_v51, %v996_v19 }
 0x42e   :  { %849 = vst.msk [vmem:[#allocation2 + $0x18] sm:$0xff] %vm780_vm4, %v832_v18 }
 0x42f   :  { %1014 = vst.msk [vmem:[#allocation5 + $0x18] sm:$0xff] %vm780_vm4, %v997_v20 }
 0x431   :  { %v886_v21 = vpop.f32.mrf.mxu2 }
 0x432   :  { %v887_v23 = vadd.f32 %v4084_v56, %v886_v21  ;;  %v941_v24 = vpop.f32.mrf.mxu3 }
 0x433   :  { %v942_v25 = vadd.f32 %v4088_v57, %v941_v24  ;;  %v834_v26 = vpop.f32.mrf.mxu1 }
 0x434   :  { %904 = vst.msk [vmem:[#allocation3 + $0x18] sm:$0xff] %vm780_vm4, %v887_v23  ;;  %v835_v27 = vadd.f32 %v4076_v50, %v834_v26  ;;  %v999_v28 = vpop.f32.mrf.mxu0  ;;  %v1112_v26 = vld [vmem:[#allocation4] sm:$0xff] }
 0x435   :  { %959 = vst.msk [vmem:[#allocation4 + $0x18] sm:$0xff] %vm780_vm4, %v942_v25  ;;  %v1000_v30 = vadd.f32 %v4079_v51, %v999_v28 }
 0x436   :  { %850 = vst.msk [vmem:[#allocation2 + $0x20] sm:$0xff] %vm780_vm4, %v835_v27 }
 0x437   :  { %1015 = vst.msk [vmem:[#allocation5 + $0x20] sm:$0xff] %vm780_vm4, %v1000_v30 }
 0x439   :  { %v889_v31 = vpop.f32.mrf.mxu2 }
 0x43a   :  { %v890_v32 = vadd.f32 %v4084_v56, %v889_v31  ;;  %v944_v34 = vpop.f32.mrf.mxu3 }
 0x43b   :  { %v945_v35 = vadd.f32 %v4088_v57, %v944_v34  ;;  %v837_v36 = vpop.f32.mrf.mxu1 }
 0x43c   :  { %905 = vst.msk [vmem:[#allocation3 + $0x20] sm:$0xff] %vm780_vm4, %v890_v32  ;;  %v838_v37 = vadd.f32 %v4076_v50, %v837_v36  ;;  %v1002_v40 = vpop.f32.mrf.mxu0 }
 0x43d   :  { %960 = vst.msk [vmem:[#allocation4 + $0x20] sm:$0xff] %vm780_vm4, %v945_v35  ;;  %v1003_v41 = vadd.f32 %v4079_v51, %v1002_v40 }
 0x43e   :  { %851 = vst.msk [vmem:[#allocation2 + $0x28] sm:$0xff] %vm780_vm4, %v838_v37 }
 0x43f   :  { %1016 = vst.msk [vmem:[#allocation5 + $0x28] sm:$0xff] %vm780_vm4, %v1003_v41 }
 0x441   :  { %v892_v42 = vpop.f32.mrf.mxu2 }
 0x442   :  { %v893_v43 = vadd.f32 %v4084_v56, %v892_v42  ;;  %v947_v44 = vpop.f32.mrf.mxu3 }
 0x443   :  { %v948_v45 = vadd.f32 %v4088_v57, %v947_v44  ;;  %v840_v46 = vpop.f32.mrf.mxu1 }
 0x444   :  { %906 = vst.msk [vmem:[#allocation3 + $0x28] sm:$0xff] %vm780_vm4, %v893_v43  ;;  %v841_v47 = vadd.f32 %v4076_v50, %v840_v46  ;;  %v1005_v48 = vpop.f32.mrf.mxu0 }
 0x445   :  { %961 = vst.msk [vmem:[#allocation4 + $0x28] sm:$0xff] %vm780_vm4, %v948_v45  ;;  %v1006_v49 = vadd.f32 %v4079_v51, %v1005_v48 }
 0x446   :  { %852 = vst.msk [vmem:[#allocation2 + $0x30] sm:$0xff] %vm780_vm4, %v841_v47  ;;  %v1022_v47 = vld [vmem:[#allocation8] sm:$0xff] }
 0x447   :  { %1017 = vst.msk [vmem:[#allocation5 + $0x30] sm:$0xff] %vm780_vm4, %v1006_v49 }
 0x449   :  { %v895_v52 = vpop.f32.mrf.mxu2 }
 0x44a   :  { %v896_v53 = vadd.f32 %v4084_v56, %v895_v52  ;;  %v950_v54 = vpop.f32.mrf.mxu3 }
 0x44b   :  { %v951_v55 = vadd.f32 %v4088_v57, %v950_v54  ;;  %v843_v58 = vpop.f32.mrf.mxu1 }
 0x44c   :  { %907 = vst.msk [vmem:[#allocation3 + $0x30] sm:$0xff] %vm780_vm4, %v896_v53  ;;  %v844_v59 = vadd.f32 %v4076_v50, %v843_v58  ;;  %v1008_v60 = vpop.f32.mrf.mxu0 }
 0x44d   :  { %962 = vst.msk [vmem:[#allocation4 + $0x30] sm:$0xff] %vm780_vm4, %v951_v55  ;;  %v1009_v61 = vadd.f32 %v4079_v51, %v1008_v60  ;;  %v1137_v51 = vld [vmem:[#allocation5] sm:$0xff] }
 0x44e   :  { %853 = vst.msk [vmem:[#allocation2 + $0x38] sm:$0xff] %vm780_vm4, %v844_v59 }
 0x44f   :  { %1018 = vst.msk [vmem:[#allocation5 + $0x38] sm:$0xff] %vm780_vm4, %v1009_v61 }
 0x451   :  { %v898_v62 = vpop.f32.mrf.mxu2 }
 0x452   :  { %v899_v63 = vadd.f32 %v4084_v56, %v898_v62  ;;  %v953_v0 = vpop.f32.mrf.mxu3 }
 0x453   :  { %v954_v1 = vadd.f32 %v4088_v57, %v953_v0  ;;  %v1046_v3 = vpop.f32.mrf.mxu1 }
 0x454   :  { %908 = vst.msk [vmem:[#allocation3 + $0x38] sm:$0xff] %vm780_vm4, %v899_v63  ;;  %v1049_v50 = vadd.f32 %v1046_v3, %v1023_v2 }
 0x455   :  { %963 = vst.msk [vmem:[#allocation4 + $0x38] sm:$0xff] %vm780_vm4, %v954_v1 }
 0x456   :  { %v2912_v4 = vmul.f32 -1.442695, %v1049_v50 }
 0x458   :  { %3059 = vpow2.f32 %v2912_v4  ;;  %v1191_v4 = vld [vmem:[#allocation2 + $0x8] sm:$0xff] }
 0x459   :  { %v1132_v24 = vpop.f32.mrf.mxu2 }
 0x45a   :  { %v1157_v5 = vpop.f32.mrf.mxu3  ;;  %v1135_v28 = vadd.f32 %v1132_v24, %v1112_v26 }
 0x45b   :  { %v1160_v6 = vadd.f32 %v1157_v5, %v1137_v51  ;;  %v1089_v8 = vpop.f32.mrf.mxu1 }
 0x45c   :  { %v1092_v9 = vadd.f32 %v1089_v8, %v1069_v7  ;;  %v1238_v7 = vld [vmem:[#allocation3 + $0x8] sm:$0xff] }
 0x45d   :  { %v2917_v10 = vmul.f32 -1.442695, %v1160_v6 }
 0x45e   :  { %v3060_v56 = vpop.eup %3059  ;;  %v2914_v11 = vmul.f32 -1.442695, %v1092_v9  ;;  %v1308_v9 = vld [vmem:[#allocation5 + $0x8] sm:$0xff] }
 0x45f   :  { %v1053_v12 = vadd.f32 1.0, %v3060_v56  ;;  %3061 = vpow2.f32 %v2917_v10 }
 0x460   :  { %3063 = vpow2.f32 %v2914_v11 }
 0x461   :  { %3065 = vrcp.f32 %v1053_v12  ;;  %v1065_v32 = vand.u32 2147483648, %v1053_v12  ;;  %vm1059_vm6 = vweird.f32 %v1053_v12  ;;  %v1063_v35 = vand.u32 2147483647, %v1053_v12 }
 0x463   :  { %v1066_v43 = vor.u32 1.1754944e-38, %v1065_v32  ;;  %vm1064_vm9 = vcmp.eq.f32.partialorder %v1063_v35, 8.507059e+37 }
 0x465   :  { %v3062_v57 = vpop.eup %3061 }
 0x466   :  { %v3064_v13 = vpop.eup %3063  ;;  %v1164_v14 = vadd.f32 1.0, %v3062_v57 }
 0x467   :  { %v3066_v18 = vpop.eup %3065  ;;  %v1096_v19 = vadd.f32 1.0, %v3064_v13 }
 0x468   :  { %v1055_v20 = vmul.f32 %v3066_v18, %v1053_v12  ;;  %3067 = vrcp.f32 %v1164_v14  ;;  %vm1060_vm5 = vweird.f32 %v3066_v18  ;;  %v1176_v61 = vand.u32 2147483648, %v1164_v14 }
 0x469   :  { %3069 = vrcp.f32 %v1096_v19  ;;  %vm1061_vm7 = vmor %vm1059_vm6, %vm1060_vm5  ;;  %v1108_v37 = vand.u32 2147483648, %v1096_v19  ;;  %v1106_v42 = vand.u32 2147483647, %v1096_v19  ;;  %vm1102_vm10 = vweird.f32 %v1096_v19 }
 0x46a   :  { %v1056_v21 = vsub.f32 1.0, %v1055_v20  ;;  %3071 = vtanh.f32 %v1135_v28  ;;  %vm1170_vm14 = vweird.f32 %v1164_v14  ;;  %v1174_v62 = vand.u32 2147483647, %v1164_v14 }
 0x46b   :  { %v1109_v48 = vor.u32 1.1754944e-38, %v1108_v37  ;;  %vm1107_vm12 = vcmp.eq.f32.partialorder %v1106_v42, 8.507059e+37  ;;  %v1177_v0 = vor.u32 1.1754944e-38, %v1176_v61 }
 0x46c   :  { %v1057_v23 = vmul.f32 %v3066_v18, %v1056_v21  ;;  %vm1175_vm0 = vcmp.eq.f32.partialorder %v1174_v62, 8.507059e+37 }
 0x46e   :  { %v3068_v25 = vpop.eup %3067  ;;  %v1058_v30 = vadd.f32 %v3066_v18, %v1057_v23 }
 0x46f   :  { %v3070_v27 = vpop.eup %3069  ;;  %v1166_v34 = vmul.f32 %v3068_v25, %v1164_v14  ;;  %vm1171_vm13 = vweird.f32 %v3068_v25 }
 0x470   :  { %v1098_v31 = vmul.f32 %v3070_v27, %v1096_v19  ;;  %v1062_v40 = vsel %vm1061_vm7, %v3066_v18, %v1058_v30  ;;  %vm1103_vm8 = vweird.f32 %v3070_v27  ;;  %v3072_v52 = vpop.eup %3071  ;;  %vm1172_vm15 = vmor %vm1170_vm14, %vm1171_vm13 }
 0x471   :  { %v1167_v44 = vsub.f32 1.0, %v1166_v34  ;;  %v1067_v46 = vsel %vm1064_vm9, %v1066_v43, %v1062_v40  ;;  %vm1104_vm11 = vmor %vm1102_vm10, %vm1103_vm8 }
 0x472   :  { %v1099_v36 = vsub.f32 1.0, %v1098_v31  ;;  %v1181_v55 = vmul.f32 %v3072_v52, %v1067_v46 }
 0x473   :  { %v1168_v53 = vmul.f32 %v3068_v25, %v1167_v44 }
 0x474   :  { %v1100_v41 = vmul.f32 %v3070_v27, %v1099_v36 }
 0x475   :  { %v1169_v60 = vadd.f32 %v3068_v25, %v1168_v53 }
 0x476   :  { %v1101_v45 = vadd.f32 %v3070_v27, %v1100_v41 }
 0x477   :  { %v1173_v63 = vsel %vm1172_vm15, %v3068_v25, %v1169_v60 }
 0x478   :  { %v1105_v49 = vsel %vm1104_vm11, %v3070_v27, %v1101_v45  ;;  %v1178_v2 = vsel %vm1175_vm0, %v1177_v0, %v1173_v63  ;;  %v1282_v27 = vld [vmem:[#allocation4 + $0x8] sm:$0xff] }
 0x479   :  { %v1110_v54 = vsel %vm1107_vm12, %v1109_v48, %v1105_v49 }
 0x47a   :  { %v1180_v58 = vmul.f32 %v1110_v54, %v1022_v47 }
 0x47c   :  { %v1182_v59 = vadd.f32 %v1181_v55, %v1180_v58 }
 0x47e   :  { %3073 = vtanh.f32 %v1182_v59  ;;  %1186 = vst.msk [vmem:[#allocation8] sm:$0xff] %vm780_vm4, %v1182_v59 }
 0x484   :  { %v3074_v1 = vpop.eup %3073 }
 0x485   :  { %v1184_v3 = vmul.f32 %v3074_v1, %v1178_v2  ;;  %v1189_v54 = vld [vmem:[#allocation8] sm:$0xff] }
 0x487   :  { %1187 = vst.msk [vmem:[#allocation6] sm:$0xff] %vm780_vm4, %v1184_v3 }
 0x488   :  { %1185 = vst.msk [vmem:[#allocation7] sm:$0xff] %vm780_vm4, %v1184_v3 }
 0x48f   :  { %v1188_v50 = vld [vmem:[#allocation7] sm:$0xff] }
 0x490   :  { %2918 = vmatmul.msk.f32.vlgmr.msra.gmra.mxu1 %vm780_vm4, %v1188_v50  ;;  %2920 = vmatmul.msk.f32.vlgmr.msrb.gmra.mxu2 %vm780_vm4, %v1188_v50 }
 0x491   :  { %2922 = vmatmul.msk.f32.vlgmr.msrb.gmra.mxu3 %vm780_vm4, %v1188_v50  ;;  %1471 = vmatpush.msra.mxu1 %v3997_v17 }
 0x492   :  { %1497 = vmatpush.msrb.mxu2 %v3994_v16  ;;  %1555 = vmatpush.msrb.mxu3 %v3990_v15 }
 0x493   :  { %1472 = vmatpush.msra.mxu1 %v4026_v33 }
 0x494   :  { %1498 = vmatpush.msrb.mxu2 %v4017_v29  ;;  %1556 = vmatpush.msrb.mxu3 %v4007_v22 }
 0x498   :  { %2923 = vmatmul.msk.f32.vlgmr.msrb.gmra.mxu1 %vm780_vm4, %v1188_v50 }
 0x499   :  { %1599 = vmatpush.msrb.mxu1 %v4039_v38 }
 0x49b   :  { %1600 = vmatpush.msrb.mxu1 %v4043_v39 }
 0x50d   :  { %v1214_v51 = vpop.f32.mrf.mxu1 }
 0x50e   :  { %v1217_v5 = vadd.f32 %v1214_v51, %v1191_v4 }
 0x510   :  { %v2919_v6 = vmul.f32 -1.442695, %v1217_v5  ;;  %v1363_v5 = vld [vmem:[#allocation2 + $0x10] sm:$0xff] }
 0x512   :  { %3075 = vpow2.f32 %v2919_v6 }
 0x513   :  { %v1258_v8 = vpop.f32.mrf.mxu2 }
 0x514   :  { %v1261_v15 = vadd.f32 %v1258_v8, %v1238_v7  ;;  %v1302_v25 = vpop.f32.mrf.mxu3  ;;  %v1410_v7 = vld [vmem:[#allocation3 + $0x10] sm:$0xff] }
 0x515   :  { %v1328_v10 = vpop.f32.mrf.mxu1  ;;  %v1305_v30 = vadd.f32 %v1302_v25, %v1282_v27 }
 0x516   :  { %v2921_v56 = vmul.f32 -1.442695, %v1261_v15  ;;  %v1331_v11 = vadd.f32 %v1328_v10, %v1308_v9 }
 0x518   :  { %v3076_v12 = vpop.eup %3075  ;;  %3077 = vpow2.f32 %v2921_v56  ;;  %v2924_v57 = vmul.f32 -1.442695, %v1331_v11 }
 0x519   :  { %v1221_v13 = vadd.f32 1.0, %v3076_v12 }
 0x51a   :  { %3079 = vpow2.f32 %v2924_v57 }
 0x51b   :  { %3081 = vrcp.f32 %v1221_v13  ;;  %v1233_v34 = vand.u32 2147483648, %v1221_v13  ;;  %vm1227_vm3 = vweird.f32 %v1221_v13  ;;  %v1231_v37 = vand.u32 2147483647, %v1221_v13 }
 0x51d   :  { %v1234_v45 = vor.u32 1.1754944e-38, %v1233_v34  ;;  %vm1232_vm8 = vcmp.eq.f32.partialorder %v1231_v37, 8.507059e+37 }
 0x51e   :  { %v3078_v14 = vpop.eup %3077 }
 0x51f   :  { %v1265_v18 = vadd.f32 1.0, %v3078_v14 }
 0x520   :  { %v3080_v19 = vpop.eup %3079 }
 0x521   :  { %v3082_v20 = vpop.eup %3081  ;;  %3083 = vrcp.f32 %v1265_v18  ;;  %v1335_v23 = vadd.f32 1.0, %v3080_v19  ;;  %v1277_v40 = vand.u32 2147483648, %v1265_v18  ;;  %v1275_v44 = vand.u32 2147483647, %v1265_v18  ;;  %v1454_v19 = vld [vmem:[#allocation4 + $0x10] sm:$0xff] }
 0x522   :  { %v1223_v21 = vmul.f32 %v3082_v20, %v1221_v13  ;;  %vm1228_vm1 = vweird.f32 %v3082_v20  ;;  %vm1271_vm7 = vweird.f32 %v1265_v18 }
 0x523   :  { %3085 = vrcp.f32 %v1335_v23  ;;  %vm1229_vm5 = vmor %vm1227_vm3, %vm1228_vm1  ;;  %v1278_v48 = vor.u32 1.1754944e-38, %v1277_v40  ;;  %vm1276_vm10 = vcmp.eq.f32.partialorder %v1275_v44, 8.507059e+37  ;;  %v1347_v63 = vand.u32 2147483648, %v1335_v23 }
 0x524   :  { %v1224_v24 = vsub.f32 1.0, %v1223_v21  ;;  %3087 = vtanh.f32 %v1305_v30  ;;  %vm1341_vm12 = vweird.f32 %v1335_v23  ;;  %v1345_v0 = vand.u32 2147483647, %v1335_v23 }
 0x525   :  { %v1348_v2 = vor.u32 1.1754944e-38, %v1347_v63 }
 0x526   :  { %v1225_v26 = vmul.f32 %v3082_v20, %v1224_v24  ;;  %vm1346_vm14 = vcmp.eq.f32.partialorder %v1345_v0, 8.507059e+37 }
 0x527   :  { %v3084_v28 = vpop.eup %3083 }
 0x528   :  { %v1267_v31 = vmul.f32 %v3084_v28, %v1265_v18  ;;  %v1226_v32 = vadd.f32 %v3082_v20, %v1225_v26  ;;  %vm1272_vm6 = vweird.f32 %v3084_v28 }
 0x529   :  { %v3086_v35 = vpop.eup %3085  ;;  %vm1273_vm9 = vmor %vm1271_vm7, %vm1272_vm6 }
 0x52a   :  { %v1268_v36 = vsub.f32 1.0, %v1267_v31  ;;  %v1337_v41 = vmul.f32 %v3086_v35, %v1335_v23  ;;  %v1230_v43 = vsel %vm1229_vm5, %v3082_v20, %v1226_v32  ;;  %v3088_v53 = vpop.eup %3087  ;;  %vm1342_vm11 = vweird.f32 %v3086_v35 }
 0x52b   :  { %v1235_v49 = vsel %vm1232_vm8, %v1234_v45, %v1230_v43  ;;  %vm1343_vm13 = vmor %vm1341_vm12, %vm1342_vm11 }
 0x52c   :  { %v1269_v42 = vmul.f32 %v3084_v28, %v1268_v36  ;;  %v1338_v46 = vsub.f32 1.0, %v1337_v41  ;;  %v1352_v60 = vmul.f32 %v3088_v53, %v1235_v49 }
 0x52e   :  { %v1270_v47 = vadd.f32 %v3084_v28, %v1269_v42  ;;  %v1339_v58 = vmul.f32 %v3086_v35, %v1338_v46 }
 0x530   :  { %v1274_v52 = vsel %vm1273_vm9, %v3084_v28, %v1270_v47  ;;  %v1340_v62 = vadd.f32 %v3086_v35, %v1339_v58 }
 0x531   :  { %v1279_v55 = vsel %vm1276_vm10, %v1278_v48, %v1274_v52 }
 0x532   :  { %v1351_v59 = vmul.f32 %v1279_v55, %v1189_v54  ;;  %v1344_v1 = vsel %vm1343_vm13, %v3086_v35, %v1340_v62 }
 0x533   :  { %v1349_v50 = vsel %vm1346_vm14, %v1348_v2, %v1344_v1 }
 0x534   :  { %v1353_v61 = vadd.f32 %v1352_v60, %v1351_v59 }
 0x536   :  { %3089 = vtanh.f32 %v1353_v61  ;;  %1357 = vst.msk [vmem:[#allocation8] sm:$0xff] %vm780_vm4, %v1353_v61 }
 0x53c   :  { %v3090_v3 = vpop.eup %3089 }
 0x53d   :  { %v1355_v4 = vmul.f32 %v3090_v3, %v1349_v50  ;;  %v1361_v52 = vld [vmem:[#allocation8] sm:$0xff] }
 0x53f   :  { %1356 = vst.msk [vmem:[#allocation7] sm:$0xff] %vm780_vm4, %v1355_v4 }
 0x540   :  { %1359 = vst.msk [vmem:[#allocation6 + $0x8] sm:$0xff] %vm780_vm4, %v1355_v4  ;;  %v1582_v4 = vld [vmem:[#allocation3 + $0x18] sm:$0xff] }
 0x546   :  { %v1360_v51 = vld [vmem:[#allocation7] sm:$0xff] }
 0x547   :  { %2925 = vmatmul.msk.f32.vlgmr.msra.gmra.mxu2 %vm780_vm4, %v1360_v51  ;;  %2927 = vmatmul.msk.f32.vlgmr.msra.gmra.mxu3 %vm780_vm4, %v1360_v51 }
 0x548   :  { %2929 = vmatmul.msk.f32.vlgmr.msra.gmra.mxu1 %vm780_vm4, %v1360_v51  ;;  %1643 = vmatpush.msra.mxu2 %v3997_v17 }
 0x549   :  { %1669 = vmatpush.msra.mxu3 %v3994_v16  ;;  %v1480_v16 = vld [vmem:[#allocation5 + $0x10] sm:$0xff] }
 0x54a   :  { %1644 = vmatpush.msra.mxu2 %v4026_v33 }
 0x54b   :  { %1670 = vmatpush.msra.mxu3 %v4017_v29 }
 0x54f   :  { %2930 = vmatmul.msk.f32.vlgmr.msrb.gmra.mxu2 %vm780_vm4, %v1360_v51 }
 0x550   :  { %1771 = vmatpush.msrb.mxu2 %v4039_v38 }
 0x552   :  { %1772 = vmatpush.msrb.mxu2 %v4043_v39 }
 0x5c5   :  { %v1474_v39 = vpop.f32.mrf.mxu1 }
 0x5c6   :  { %v1477_v21 = vadd.f32 %v1474_v39, %v1454_v19 }
 0x5ca   :  { %v1386_v6 = vpop.f32.mrf.mxu2  ;;  %v1430_v8 = vpop.f32.mrf.mxu3 }
 0x5cb   :  { %v1389_v15 = vadd.f32 %v1386_v6, %v1363_v5  ;;  %v1433_v9 = vadd.f32 %v1430_v8, %v1410_v7  ;;  %v1535_v7 = vld [vmem:[#allocation2 + $0x18] sm:$0xff] }
 0x5cd   :  { %v2926_v10 = vmul.f32 -1.442695, %v1389_v15  ;;  %v2928_v17 = vmul.f32 -1.442695, %v1433_v9 }
 0x5cf   :  { %3091 = vpow2.f32 %v2926_v10 }
 0x5d0   :  { %3093 = vpow2.f32 %v2928_v17 }
 0x5d2   :  { %v1500_v56 = vpop.f32.mrf.mxu2 }
 0x5d3   :  { %v1503_v11 = vadd.f32 %v1500_v56, %v1480_v16  ;;  %v1652_v16 = vld [vmem:[#allocation5 + $0x18] sm:$0xff] }
 0x5d5   :  { %v3092_v12 = vpop.eup %3091  ;;  %v2931_v57 = vmul.f32 -1.442695, %v1503_v11 }
 0x5d6   :  { %v3094_v13 = vpop.eup %3093  ;;  %v1393_v14 = vadd.f32 1.0, %v3092_v12 }
 0x5d7   :  { %v1437_v38 = vadd.f32 1.0, %v3094_v13  ;;  %3095 = vpow2.f32 %v2931_v57 }
 0x5d8   :  { %3097 = vrcp.f32 %v1393_v14  ;;  %v1405_v28 = vand.u32 2147483648, %v1393_v14  ;;  %v1403_v32 = vand.u32 2147483647, %v1393_v14  ;;  %vm1399_vm1 = vweird.f32 %v1393_v14 }
 0x5d9   :  { %3099 = vrcp.f32 %v1437_v38  ;;  %v1449_v34 = vand.u32 2147483648, %v1437_v38  ;;  %v1447_v36 = vand.u32 2147483647, %v1437_v38  ;;  %vm1443_vm5 = vweird.f32 %v1437_v38 }
 0x5da   :  { %v1406_v41 = vor.u32 1.1754944e-38, %v1405_v28  ;;  %vm1404_vm6 = vcmp.eq.f32.partialorder %v1403_v32, 8.507059e+37 }
 0x5db   :  { %v1450_v44 = vor.u32 1.1754944e-38, %v1449_v34  ;;  %vm1448_vm8 = vcmp.eq.f32.partialorder %v1447_v36, 8.507059e+37 }
 0x5dd   :  { %v3096_v18 = vpop.eup %3095 }
 0x5de   :  { %v3098_v20 = vpop.eup %3097  ;;  %v1507_v23 = vadd.f32 1.0, %v3096_v18 }
 0x5df   :  { %v3100_v24 = vpop.eup %3099  ;;  %v1395_v25 = vmul.f32 %v3098_v20, %v1393_v14  ;;  %vm1400_vm15 = vweird.f32 %v3098_v20  ;;  %v4185_v14 = vld [vmem:[#allocation22 + $0x8] sm:$0xff] }
 0x5e0   :  { %v1439_v26 = vmul.f32 %v3100_v24, %v1437_v38  ;;  %3101 = vrcp.f32 %v1507_v23  ;;  %vm1444_vm0 = vweird.f32 %v3100_v24  ;;  %vm1401_vm3 = vmor %vm1399_vm1, %vm1400_vm15  ;;  %v1519_v61 = vand.u32 2147483648, %v1507_v23  ;;  %v4187_v38 = vld [vmem:[#allocation25 + $0x8] sm:$0xff]  ;;  %1727 = vmatpush.msra.mxu1 %v4185_v14 }
 0x5e1   :  { %v1396_v27 = vsub.f32 1.0, %v1395_v25  ;;  %3103 = vtanh.f32 %v1477_v21  ;;  %vm1445_vm7 = vmor %vm1443_vm5, %vm1444_vm0  ;;  %vm1513_vm10 = vweird.f32 %v1507_v23  ;;  %v1517_v62 = vand.u32 2147483647, %v1507_v23  ;;  %1987 = vmatpush.msrb.mxu0 %v4187_v38 }
 0x5e2   :  { %v1440_v30 = vsub.f32 1.0, %v1439_v26  ;;  %v1520_v0 = vor.u32 1.1754944e-38, %v1519_v61  ;;  %1728 = vmatpush.msra.mxu1 %v4007_v22 }
 0x5e3   :  { %v1397_v31 = vmul.f32 %v3098_v20, %v1396_v27  ;;  %vm1518_vm12 = vcmp.eq.f32.partialorder %v1517_v62, 8.507059e+37 }
 0x5e4   :  { %v1441_v35 = vmul.f32 %v3100_v24, %v1440_v30 }
 0x5e5   :  { %v1398_v37 = vadd.f32 %v3098_v20, %v1397_v31  ;;  %v4196_v31 = vld [vmem:[%s4415_s16 + $0x8] sm:$0xff] }
 0x5e6   :  { %v3102_v40 = vpop.eup %3101  ;;  %v1442_v42 = vadd.f32 %v3100_v24, %v1441_v35 }
 0x5e7   :  { %v1402_v43 = vsel %vm1401_vm3, %v3098_v20, %v1398_v37  ;;  %v1509_v45 = vmul.f32 %v3102_v40, %v1507_v23  ;;  %v3104_v46 = vpop.eup %3103  ;;  %vm1514_vm9 = vweird.f32 %v3102_v40 }
 0x5e8   :  { %v1407_v47 = vsel %vm1404_vm6, %v1406_v41, %v1402_v43  ;;  %v1446_v48 = vsel %vm1445_vm7, %v3100_v24, %v1442_v42  ;;  %vm1515_vm11 = vmor %vm1513_vm10, %vm1514_vm9  ;;  %v1626_v24 = vld [vmem:[#allocation4 + $0x18] sm:$0xff] }
 0x5e9   :  { %v1524_v49 = vmul.f32 %v3104_v46, %v1407_v47  ;;  %v1451_v53 = vsel %vm1448_vm8, %v1450_v44, %v1446_v48  ;;  %v1510_v54 = vsub.f32 1.0, %v1509_v45 }
 0x5ea   :  { %v1523_v55 = vmul.f32 %v1451_v53, %v1361_v52 }
 0x5eb   :  { %v1511_v58 = vmul.f32 %v3102_v40, %v1510_v54 }
 0x5ec   :  { %v1525_v59 = vadd.f32 %v1524_v49, %v1523_v55 }
 0x5ed   :  { %v1512_v60 = vadd.f32 %v3102_v40, %v1511_v58 }
 0x5ee   :  { %3105 = vtanh.f32 %v1525_v59  ;;  %1529 = vst.msk [vmem:[#allocation8] sm:$0xff] %vm780_vm4, %v1525_v59 }
 0x5ef   :  { %v1516_v63 = vsel %vm1515_vm11, %v3102_v40, %v1512_v60 }
 0x5f0   :  { %v1521_v2 = vsel %vm1518_vm12, %v1520_v0, %v1516_v63 }
 0x5f4   :  { %v3106_v1 = vpop.eup %3105 }
 0x5f5   :  { %v1527_v3 = vmul.f32 %v3106_v1, %v1521_v2  ;;  %v1533_v49 = vld [vmem:[#allocation8] sm:$0xff] }
 0x5f7   :  { %1528 = vst.msk [vmem:[#allocation7] sm:$0xff] %vm780_vm4, %v1527_v3 }
 0x5f8   :  { %1531 = vst.msk [vmem:[#allocation6 + $0x10] sm:$0xff] %vm780_vm4, %v1527_v3 }
 0x5fe   :  { %v1532_v50 = vld [vmem:[#allocation7] sm:$0xff] }
 0x5ff   :  { %2932 = vmatmul.msk.f32.vlgmr.msrb.gmra.mxu3 %vm780_vm4, %v1532_v50  ;;  %2934 = vmatmul.msk.f32.vlgmr.msrb.gmra.mxu1 %vm780_vm4, %v1532_v50 }
 0x600   :  { %2936 = vmatmul.msk.f32.vlgmr.msra.gmra.mxu2 %vm780_vm4, %v1532_v50  ;;  %1815 = vmatpush.msrb.mxu3 %v4187_v38 }
 0x601   :  { %1899 = vmatpush.msra.mxu2 %v4185_v14  ;;  %1841 = vmatpush.msrb.mxu1 %v4196_v31 }
 0x602   :  { %1816 = vmatpush.msrb.mxu3 %v4026_v33 }
 0x603   :  { %1842 = vmatpush.msrb.mxu1 %v4017_v29 }
 0x607   :  { %2937 = vmatmul.msk.f32.vlgmr.msra.gmra.mxu3 %vm780_vm4, %v1532_v50  ;;  %v1707_v50 = vld [vmem:[#allocation2 + $0x20] sm:$0xff] }
 0x67c   :  { %v1602_v51 = vpop.f32.mrf.mxu1 }
 0x67d   :  { %v1605_v5 = vadd.f32 %v1602_v51, %v1582_v4 }
 0x67f   :  { %v2935_v6 = vmul.f32 -1.442695, %v1605_v5 }
 0x681   :  { %3107 = vpow2.f32 %v2935_v6  ;;  %v1754_v6 = vld [vmem:[#allocation3 + $0x20] sm:$0xff] }
 0x682   :  { %v1558_v8 = vpop.f32.mrf.mxu3 }
 0x683   :  { %v1561_v15 = vadd.f32 %v1558_v8, %v1535_v7  ;;  %v1646_v20 = vpop.f32.mrf.mxu2 }
 0x684   :  { %v1649_v26 = vadd.f32 %v1646_v20, %v1626_v24 }
 0x685   :  { %v2933_v9 = vmul.f32 -1.442695, %v1561_v15  ;;  %v1824_v15 = vld [vmem:[#allocation5 + $0x20] sm:$0xff] }
 0x687   :  { %v3108_v10 = vpop.eup %3107  ;;  %3109 = vpow2.f32 %v2933_v9 }
 0x688   :  { %v1609_v17 = vadd.f32 1.0, %v3108_v10 }
 0x68a   :  { %3111 = vrcp.f32 %v1609_v17  ;;  %v1672_v56 = vpop.f32.mrf.mxu3  ;;  %v1621_v32 = vand.u32 2147483648, %v1609_v17  ;;  %vm1615_vm14 = vweird.f32 %v1609_v17  ;;  %v1619_v33 = vand.u32 2147483647, %v1609_v17 }
 0x68b   :  { %v1675_v11 = vadd.f32 %v1672_v56, %v1652_v16 }
 0x68c   :  { %v1622_v41 = vor.u32 1.1754944e-38, %v1621_v32  ;;  %vm1620_vm3 = vcmp.eq.f32.partialorder %v1619_v33, 8.507059e+37 }
 0x68d   :  { %v3110_v12 = vpop.eup %3109  ;;  %v2938_v57 = vmul.f32 -1.442695, %v1675_v11 }
 0x68e   :  { %v1565_v13 = vadd.f32 1.0, %v3110_v12 }
 0x68f   :  { %3113 = vpow2.f32 %v2938_v57 }
 0x690   :  { %v3112_v39 = vpop.eup %3111  ;;  %3115 = vrcp.f32 %v1565_v13  ;;  %v1577_v35 = vand.u32 2147483648, %v1565_v13  ;;  %v1575_v37 = vand.u32 2147483647, %v1565_v13  ;;  %vm1571_vm1 = vweird.f32 %v1565_v13 }
 0x691   :  { %v1611_v18 = vmul.f32 %v3112_v39, %v1609_v17  ;;  %vm1616_vm13 = vweird.f32 %v3112_v39 }
 0x692   :  { %vm4199_vm15 = vmor %vm1615_vm14, %vm1616_vm13  ;;  %v1578_v44 = vor.u32 1.1754944e-38, %v1577_v35  ;;  %vm1576_vm6 = vcmp.eq.f32.partialorder %v1575_v37, 8.507059e+37 }
 0x693   :  { %v1612_v19 = vsub.f32 1.0, %v1611_v18  ;;  %v4216_v18 = vld [vmem:[#allocation25] sm:$0xff] }
 0x694   :  { %1988 = vmatpush.msrb.mxu0 %v4216_v18 }
 0x695   :  { %v3114_v21 = vpop.eup %3113  ;;  %v1613_v23 = vmul.f32 %v3112_v39, %v1612_v19  ;;  %v4218_v19 = vld [vmem:[#allocation22] sm:$0xff] }
 0x696   :  { %v3116_v25 = vpop.eup %3115  ;;  %v1679_v27 = vadd.f32 1.0, %v3114_v21  ;;  %v4222_v21 = vld [vmem:[#allocation23] sm:$0xff]  ;;  %1900 = vmatpush.msra.mxu2 %v4218_v19  ;;  %2159 = vmatpush.msra.mxu0 %v4187_v38 }
 0x697   :  { %v1567_v28 = vmul.f32 %v3116_v25, %v1565_v13  ;;  %v1614_v30 = vadd.f32 %v3112_v39, %v1613_v23  ;;  %vm1572_vm0 = vweird.f32 %v3116_v25  ;;  %v4225_v23 = vld [vmem:[%s4415_s16] sm:$0xff] }
 0x698   :  { %3117 = vrcp.f32 %v1679_v27  ;;  %vm1573_vm5 = vmor %vm1571_vm1, %vm1572_vm0  ;;  %v1691_v60 = vand.u32 2147483648, %v1679_v27  ;;  %vm1685_vm8 = vweird.f32 %v1679_v27  ;;  %v1689_v61 = vand.u32 2147483647, %v1679_v27  ;;  %2160 = vmatpush.msra.mxu0 %v4216_v18 }
 0x699   :  { %v1568_v22 = vsub.f32 1.0, %v1567_v28  ;;  %3119 = vtanh.f32 %v1649_v26  ;;  %v1618_v40 = vsel %vm4199_vm15, %v3112_v39, %v1614_v30  ;;  %v4214_v39 = vld [vmem:[#allocation23 + $0x8] sm:$0xff]  ;;  %v1798_v30 = vld [vmem:[#allocation4 + $0x20] sm:$0xff] }
 0x69a   :  { %v1623_v45 = vsel %vm1620_vm3, %v1622_v41, %v1618_v40  ;;  %v1692_v63 = vor.u32 1.1754944e-38, %v1691_v60  ;;  %vm1690_vm10 = vcmp.eq.f32.partialorder %v1689_v61, 8.507059e+37  ;;  %1943 = vmatpush.msra.mxu3 %v4214_v39 }
 0x69b   :  { %v1569_v36 = vmul.f32 %v3116_v25, %v1568_v22  ;;  %v1695_v52 = vmul.f32 %v1623_v45, %v1533_v49 }
 0x69c   :  { %1944 = vmatpush.msra.mxu3 %v4222_v21 }
 0x69d   :  { %v1570_v42 = vadd.f32 %v3116_v25, %v1569_v36 }
 0x69e   :  { %v3118_v43 = vpop.eup %3117 }
 0x69f   :  { %v1574_v46 = vsel %vm1573_vm5, %v3116_v25, %v1570_v42  ;;  %v1681_v47 = vmul.f32 %v3118_v43, %v1679_v27  ;;  %v3120_v48 = vpop.eup %3119  ;;  %vm1686_vm7 = vweird.f32 %v3118_v43 }
 0x6a0   :  { %v1579_v29 = vsel %vm1576_vm6, %v1578_v44, %v1574_v46  ;;  %vm1687_vm9 = vmor %vm1685_vm8, %vm1686_vm7 }
 0x6a1   :  { %v1696_v53 = vmul.f32 %v3120_v48, %v1579_v29  ;;  %v1682_v54 = vsub.f32 1.0, %v1681_v47 }
 0x6a3   :  { %v1697_v55 = vadd.f32 %v1696_v53, %v1695_v52  ;;  %v1683_v58 = vmul.f32 %v3118_v43, %v1682_v54 }
 0x6a5   :  { %3121 = vtanh.f32 %v1697_v55  ;;  %1701 = vst.msk [vmem:[#allocation8] sm:$0xff] %vm780_vm4, %v1697_v55  ;;  %v1684_v59 = vadd.f32 %v3118_v43, %v1683_v58 }
 0x6a7   :  { %v1688_v62 = vsel %vm1687_vm9, %v3118_v43, %v1684_v59 }
 0x6a8   :  { %v1693_v1 = vsel %vm1690_vm10, %v1692_v63, %v1688_v62 }
 0x6ab   :  { %v3122_v0 = vpop.eup %3121 }
 0x6ac   :  { %v1699_v2 = vmul.f32 %v3122_v0, %v1693_v1  ;;  %v1705_v54 = vld [vmem:[#allocation8] sm:$0xff] }
 0x6ae   :  { %1700 = vst.msk [vmem:[#allocation7] sm:$0xff] %vm780_vm4, %v1699_v2 }
 0x6af   :  { %1703 = vst.msk [vmem:[#allocation6 + $0x18] sm:$0xff] %vm780_vm4, %v1699_v2 }
 0x6b5   :  { %v1704_v3 = vld [vmem:[#allocation7] sm:$0xff] }
 0x6b6   :  { %2939 = vmatmul.msk.f32.vlgmr.msra.gmra.mxu1 %vm780_vm4, %v1704_v3  ;;  %2941 = vmatmul.msk.f32.vlgmr.msrb.gmra.mxu2 %vm780_vm4, %v1704_v3 }
 0x6b7   :  { %2943 = vmatmul.msk.f32.vlgmr.msrb.gmra.mxu3 %vm780_vm4, %v1704_v3  ;;  %2013 = vmatpush.msra.mxu1 %v4196_v31 }
 0x6b8   :  { %2071 = vmatpush.msrb.mxu2 %v4185_v14  ;;  %2115 = vmatpush.msrb.mxu3 %v4214_v39 }
 0x6b9   :  { %2014 = vmatpush.msra.mxu1 %v4225_v23 }
 0x6ba   :  { %2072 = vmatpush.msrb.mxu2 %v4218_v19  ;;  %2116 = vmatpush.msrb.mxu3 %v4222_v21 }
 0x6be   :  { %2944 = vmatmul.msk.f32.vlgmr.msrb.gmra.mxu1 %vm780_vm4, %v1704_v3 }
 0x6bf   :  { %2185 = vmatpush.msrb.mxu1 %v4196_v31 }
 0x6c1   :  { %2186 = vmatpush.msrb.mxu1 %v4225_v23 }
 0x733   :  { %v1730_v4 = vpop.f32.mrf.mxu1 }
 0x734   :  { %v1733_v51 = vadd.f32 %v1730_v4, %v1707_v50 }
 0x736   :  { %v2940_v5 = vmul.f32 -1.442695, %v1733_v51 }
 0x738   :  { %3123 = vpow2.f32 %v2940_v5  ;;  %v1996_v5 = vld [vmem:[#allocation5 + $0x28] sm:$0xff] }
 0x739   :  { %v1774_v7 = vpop.f32.mrf.mxu2 }
 0x73a   :  { %v1777_v8 = vadd.f32 %v1774_v7, %v1754_v6  ;;  %v1818_v27 = vpop.f32.mrf.mxu3 }
 0x73b   :  { %v1844_v9 = vpop.f32.mrf.mxu1  ;;  %v1821_v22 = vadd.f32 %v1818_v27, %v1798_v30 }
 0x73c   :  { %v2942_v10 = vmul.f32 -1.442695, %v1777_v8  ;;  %v1847_v17 = vadd.f32 %v1844_v9, %v1824_v15  ;;  %v1926_v9 = vld [vmem:[#allocation3 + $0x28] sm:$0xff] }
 0x73e   :  { %v3124_v16 = vpop.eup %3123  ;;  %3125 = vpow2.f32 %v2942_v10  ;;  %v2945_v56 = vmul.f32 -1.442695, %v1847_v17 }
 0x73f   :  { %v1737_v11 = vadd.f32 1.0, %v3124_v16 }
 0x740   :  { %3127 = vpow2.f32 %v2945_v56 }
 0x741   :  { %3129 = vrcp.f32 %v1737_v11  ;;  %v1749_v35 = vand.u32 2147483648, %v1737_v11  ;;  %vm1743_vm12 = vweird.f32 %v1737_v11  ;;  %v1747_v40 = vand.u32 2147483647, %v1737_v11 }
 0x743   :  { %v1750_v46 = vor.u32 1.1754944e-38, %v1749_v35  ;;  %vm1748_vm0 = vcmp.eq.f32.partialorder %v1747_v40, 8.507059e+37 }
 0x744   :  { %v3126_v12 = vpop.eup %3125 }
 0x745   :  { %v1781_v57 = vadd.f32 1.0, %v3126_v12 }
 0x746   :  { %v3128_v13 = vpop.eup %3127 }
 0x747   :  { %v3130_v20 = vpop.eup %3129  ;;  %3131 = vrcp.f32 %v1781_v57  ;;  %v1851_v25 = vadd.f32 1.0, %v3128_v13  ;;  %v1793_v41 = vand.u32 2147483648, %v1781_v57  ;;  %v1791_v45 = vand.u32 2147483647, %v1781_v57 }
 0x748   :  { %v1739_v24 = vmul.f32 %v3130_v20, %v1737_v11  ;;  %vm1744_vm11 = vweird.f32 %v3130_v20  ;;  %vm1787_vm15 = vweird.f32 %v1781_v57 }
 0x749   :  { %3133 = vrcp.f32 %v1851_v25  ;;  %vm1745_vm13 = vmor %vm1743_vm12, %vm1744_vm11  ;;  %v1794_v49 = vor.u32 1.1754944e-38, %v1793_v41  ;;  %vm1792_vm3 = vcmp.eq.f32.partialorder %v1791_v45, 8.507059e+37  ;;  %v1863_v63 = vand.u32 2147483648, %v1851_v25 }
 0x74a   :  { %v1740_v26 = vsub.f32 1.0, %v1739_v24  ;;  %3135 = vtanh.f32 %v1821_v22  ;;  %vm1857_vm6 = vweird.f32 %v1851_v25  ;;  %v1861_v0 = vand.u32 2147483647, %v1851_v25 }
 0x74b   :  { %v1864_v2 = vor.u32 1.1754944e-38, %v1863_v63 }
 0x74c   :  { %v1741_v28 = vmul.f32 %v3130_v20, %v1740_v26  ;;  %vm1862_vm8 = vcmp.eq.f32.partialorder %v1861_v0, 8.507059e+37 }
 0x74d   :  { %v3132_v32 = vpop.eup %3131 }
 0x74e   :  { %v1783_v33 = vmul.f32 %v3132_v32, %v1781_v57  ;;  %v1742_v34 = vadd.f32 %v3130_v20, %v1741_v28  ;;  %vm1788_vm14 = vweird.f32 %v3132_v32 }
 0x74f   :  { %v3134_v36 = vpop.eup %3133  ;;  %vm1789_vm1 = vmor %vm1787_vm15, %vm1788_vm14 }
 0x750   :  { %v1784_v37 = vsub.f32 1.0, %v1783_v33  ;;  %v1853_v42 = vmul.f32 %v3134_v36, %v1851_v25  ;;  %v1746_v44 = vsel %vm1745_vm13, %v3130_v20, %v1742_v34  ;;  %v3136_v53 = vpop.eup %3135  ;;  %vm1858_vm5 = vweird.f32 %v3134_v36  ;;  %v1970_v20 = vld [vmem:[#allocation4 + $0x28] sm:$0xff] }
 0x751   :  { %v1751_v29 = vsel %vm1748_vm0, %v1750_v46, %v1746_v44  ;;  %vm1859_vm7 = vmor %vm1857_vm6, %vm1858_vm5 }
 0x752   :  { %v1785_v43 = vmul.f32 %v3132_v32, %v1784_v37  ;;  %v1854_v47 = vsub.f32 1.0, %v1853_v42  ;;  %v1868_v60 = vmul.f32 %v3136_v53, %v1751_v29 }
 0x754   :  { %v1786_v48 = vadd.f32 %v3132_v32, %v1785_v43  ;;  %v1855_v58 = vmul.f32 %v3134_v36, %v1854_v47 }
 0x756   :  { %v1790_v52 = vsel %vm1789_vm1, %v3132_v32, %v1786_v48  ;;  %v1856_v62 = vadd.f32 %v3134_v36, %v1855_v58 }
 0x757   :  { %v1795_v55 = vsel %vm1792_vm3, %v1794_v49, %v1790_v52 }
 0x758   :  { %v1867_v59 = vmul.f32 %v1795_v55, %v1705_v54  ;;  %v1860_v1 = vsel %vm1859_vm7, %v3134_v36, %v1856_v62 }
 0x759   :  { %v1865_v50 = vsel %vm1862_vm8, %v1864_v2, %v1860_v1  ;;  %v2168_v2 = vld [vmem:[#allocation5 + $0x30] sm:$0xff] }
 0x75a   :  { %v1869_v61 = vadd.f32 %v1868_v60, %v1867_v59 }
 0x75c   :  { %3137 = vtanh.f32 %v1869_v61  ;;  %1873 = vst.msk [vmem:[#allocation8] sm:$0xff] %vm780_vm4, %v1869_v61 }
 0x762   :  { %v3138_v3 = vpop.eup %3137 }
 0x763   :  { %v1871_v4 = vmul.f32 %v3138_v3, %v1865_v50  ;;  %v1877_v29 = vld [vmem:[#allocation8] sm:$0xff] }
 0x765   :  { %1872 = vst.msk [vmem:[#allocation7] sm:$0xff] %vm780_vm4, %v1871_v4 }
 0x766   :  { %1875 = vst.msk [vmem:[#allocation6 + $0x20] sm:$0xff] %vm780_vm4, %v1871_v4 }
 0x76c   :  { %v1876_v51 = vld [vmem:[#allocation7] sm:$0xff] }
 0x76d   :  { %2946 = vmatmul.msk.f32.vlgmr.msra.gmra.mxu2 %vm780_vm4, %v1876_v51  ;;  %2948 = vmatmul.msk.f32.vlgmr.msra.gmra.mxu3 %vm780_vm4, %v1876_v51 }
 0x76e   :  { %2950 = vmatmul.msk.f32.vlgmr.msrb.gmra.mxu0 %vm780_vm4, %v1876_v51  ;;  %2951 = vmatmul.msk.f32.vlgmr.msra.gmra.mxu1 %vm780_vm4, %v1876_v51  ;;  %v2051_v51 = vld [vmem:[#allocation2 + $0x30] sm:$0xff] }
 0x76f   :  { %2243 = vmatpush.msra.mxu2 %v4185_v14  ;;  %2287 = vmatpush.msra.mxu3 %v4214_v39  ;;  %v1879_v14 = vld [vmem:[#allocation2 + $0x28] sm:$0xff] }
 0x770   :  { %2331 = vmatpush.msrb.mxu0 %v4187_v38  ;;  %2357 = vmatpush.msra.mxu1 %v4196_v31 }
 0x771   :  { %2244 = vmatpush.msra.mxu2 %v4218_v19  ;;  %2288 = vmatpush.msra.mxu3 %v4222_v21 }
 0x772   :  { %2332 = vmatpush.msrb.mxu0 %v4216_v18  ;;  %2358 = vmatpush.msra.mxu1 %v4225_v23 }
 0x7eb   :  { %v2016_v6 = vpop.f32.mrf.mxu1  ;;  %v1990_v18 = vpop.f32.mrf.mxu0 }
 0x7ec   :  { %v2019_v7 = vadd.f32 %v2016_v6, %v1996_v5  ;;  %v1993_v23 = vadd.f32 %v1990_v18, %v1970_v20  ;;  %v2098_v6 = vld [vmem:[#allocation3 + $0x30] sm:$0xff] }
 0x7ee   :  { %v2952_v8 = vmul.f32 -1.442695, %v2019_v7 }
 0x7f0   :  { %3139 = vpow2.f32 %v2952_v8  ;;  %v1902_v15 = vpop.f32.mrf.mxu2  ;;  %v1946_v10 = vpop.f32.mrf.mxu3 }
 0x7f1   :  { %v1905_v38 = vadd.f32 %v1902_v15, %v1879_v14  ;;  %v1949_v17 = vadd.f32 %v1946_v10, %v1926_v9 }
 0x7f3   :  { %v2947_v31 = vmul.f32 -1.442695, %v1905_v38  ;;  %v2949_v16 = vmul.f32 -1.442695, %v1949_v17 }
 0x7f5   :  { %3141 = vpow2.f32 %v2947_v31 }
 0x7f6   :  { %v3140_v56 = vpop.eup %3139  ;;  %3143 = vpow2.f32 %v2949_v16 }
 0x7f7   :  { %v2023_v11 = vadd.f32 1.0, %v3140_v56 }
 0x7f9   :  { %3145 = vrcp.f32 %v2023_v11  ;;  %v2035_v58 = vand.u32 2147483648, %v2023_v11  ;;  %vm2029_vm3 = vweird.f32 %v2023_v11  ;;  %v2033_v59 = vand.u32 2147483647, %v2023_v11 }
 0x7fb   :  { %v3142_v12 = vpop.eup %3141  ;;  %v2036_v61 = vor.u32 1.1754944e-38, %v2035_v58  ;;  %vm2034_vm6 = vcmp.eq.f32.partialorder %v2033_v59, 8.507059e+37 }
 0x7fc   :  { %v3144_v57 = vpop.eup %3143  ;;  %v1909_v13 = vadd.f32 1.0, %v3142_v12 }
 0x7fd   :  { %v1953_v39 = vadd.f32 1.0, %v3144_v57  ;;  %v2142_v57 = vld [vmem:[#allocation4 + $0x30] sm:$0xff] }
 0x7fe   :  { %3147 = vrcp.f32 %v1909_v13  ;;  %v1921_v30 = vand.u32 2147483648, %v1909_v13  ;;  %v1919_v33 = vand.u32 2147483647, %v1909_v13  ;;  %vm1915_vm11 = vweird.f32 %v1909_v13 }
 0x7ff   :  { %3149 = vrcp.f32 %v1953_v39  ;;  %v3146_v19 = vpop.eup %3145  ;;  %v1965_v34 = vand.u32 2147483648, %v1953_v39  ;;  %v1963_v36 = vand.u32 2147483647, %v1953_v39  ;;  %vm1959_vm13 = vweird.f32 %v1953_v39 }
 0x800   :  { %v2025_v27 = vmul.f32 %v3146_v19, %v2023_v11  ;;  %3151 = vtanh.f32 %v1993_v23  ;;  %v1922_v41 = vor.u32 1.1754944e-38, %v1921_v30  ;;  %vm1920_vm14 = vcmp.eq.f32.partialorder %v1919_v33, 8.507059e+37 }
 0x801   :  { %v1966_v44 = vor.u32 1.1754944e-38, %v1965_v34  ;;  %vm1964_vm0 = vcmp.eq.f32.partialorder %v1963_v36, 8.507059e+37  ;;  %vm2030_vm1 = vweird.f32 %v3146_v19 }
 0x802   :  { %v2026_v37 = vsub.f32 1.0, %v2025_v27  ;;  %vm2031_vm5 = vmor %vm2029_vm3, %vm2030_vm1 }
 0x804   :  { %v3148_v21 = vpop.eup %3147  ;;  %v2027_v48 = vmul.f32 %v3146_v19, %v2026_v37 }
 0x805   :  { %v3150_v24 = vpop.eup %3149  ;;  %v1911_v25 = vmul.f32 %v3148_v21, %v1909_v13  ;;  %vm1916_vm9 = vweird.f32 %v3148_v21 }
 0x806   :  { %v1955_v26 = vmul.f32 %v3150_v24, %v1953_v39  ;;  %vm1960_vm10 = vweird.f32 %v3150_v24  ;;  %vm1917_vm12 = vmor %vm1915_vm11, %vm1916_vm9  ;;  %v3152_v45 = vpop.eup %3151  ;;  %v2028_v55 = vadd.f32 %v3146_v19, %v2027_v48 }
 0x807   :  { %v1912_v28 = vsub.f32 1.0, %v1911_v25  ;;  %vm1961_vm15 = vmor %vm1959_vm13, %vm1960_vm10  ;;  %v2400_v25 = vld [vmem:[#allocation29] sm:$0xff] }
 0x808   :  { %v1956_v32 = vsub.f32 1.0, %v1955_v26  ;;  %v2032_v60 = vsel %vm2031_vm5, %v3146_v19, %v2028_v55 }
 0x809   :  { %v1913_v22 = vmul.f32 %v3148_v21, %v1912_v28  ;;  %v2037_v63 = vsel %vm2034_vm6, %v2036_v61, %v2032_v60 }
 0x80a   :  { %v1957_v35 = vmul.f32 %v3150_v24, %v1956_v32 }
 0x80b   :  { %v1914_v40 = vadd.f32 %v3148_v21, %v1913_v22 }
 0x80c   :  { %v1958_v42 = vadd.f32 %v3150_v24, %v1957_v35 }
 0x80d   :  { %v1918_v43 = vsel %vm1917_vm12, %v3148_v21, %v1914_v40 }
 0x80e   :  { %v1923_v46 = vsel %vm1920_vm14, %v1922_v41, %v1918_v43  ;;  %v1962_v47 = vsel %vm1961_vm15, %v3150_v24, %v1958_v42  ;;  %v2401_v24 = vld [vmem:[#allocation29 + $0x8] sm:$0xff] }
 0x80f   :  { %v2040_v49 = vmul.f32 %v3152_v45, %v1923_v46  ;;  %v1967_v52 = vsel %vm1964_vm0, %v1966_v44, %v1962_v47 }
 0x810   :  { %v2039_v53 = vmul.f32 %v1967_v52, %v1877_v29 }
 0x812   :  { %v2041_v54 = vadd.f32 %v2040_v49, %v2039_v53 }
 0x814   :  { %3153 = vtanh.f32 %v2041_v54  ;;  %2045 = vst.msk [vmem:[#allocation8] sm:$0xff] %vm780_vm4, %v2041_v54 }
 0x81a   :  { %v3154_v62 = vpop.eup %3153 }
 0x81b   :  { %v2043_v0 = vmul.f32 %v3154_v62, %v2037_v63  ;;  %v2049_v47 = vld [vmem:[#allocation8] sm:$0xff]  ;;  %v2392_v63 = vld [vmem:[#allocation6] sm:$0xff] }
 0x81d   :  { %2047 = vst.msk [vmem:[#allocation6 + $0x28] sm:$0xff] %vm780_vm4, %v2043_v0 }
 0x81e   :  { %2044 = vst.msk [vmem:[#allocation7] sm:$0xff] %vm780_vm4, %v2043_v0  ;;  %v2393_v0 = vld [vmem:[#allocation6 + $0x8] sm:$0xff] }
 0x825   :  { %v2048_v1 = vld [vmem:[#allocation7] sm:$0xff] }
 0x826   :  { %2953 = vmatmul.msk.f32.vlgmr.msrb.gmra.mxu2 %vm780_vm4, %v2048_v1  ;;  %2955 = vmatmul.msk.f32.vlgmr.msrb.gmra.mxu3 %vm780_vm4, %v2048_v1 }
 0x827   :  { %2957 = vmatmul.msk.f32.vlgmr.msra.gmra.mxu0 %vm780_vm4, %v2048_v1  ;;  %2958 = vmatmul.msk.f32.vlgmr.msrb.gmra.mxu1 %vm780_vm4, %v2048_v1  ;;  %v2394_v1 = vld [vmem:[#allocation6 + $0x10] sm:$0xff] }
 0x828   :  { %2444 = vmatpush.msrb.mxu2 %v2401_v24 }
 0x82a   :  { %2445 = vmatpush.msrb.mxu2 %v2400_v25 }
 0x8a4   :  { %v2188_v3 = vpop.f32.mrf.mxu1  ;;  %v2162_v11 = vpop.f32.mrf.mxu0 }
 0x8a5   :  { %v2191_v50 = vadd.f32 %v2188_v3, %v2168_v2  ;;  %v2165_v39 = vadd.f32 %v2162_v11, %v2142_v57  ;;  %v2395_v2 = vld [vmem:[#allocation6 + $0x18] sm:$0xff]  ;;  %v2396_v3 = vld [vmem:[#allocation6 + $0x20] sm:$0xff] }
 0x8a7   :  { %v2959_v4 = vmul.f32 -1.442695, %v2191_v50  ;;  %v2397_v50 = vld [vmem:[#allocation6 + $0x28] sm:$0xff] }
 0x8a9   :  { %3155 = vpow2.f32 %v2959_v4  ;;  %v2074_v5 = vpop.f32.mrf.mxu2  ;;  %v2118_v7 = vpop.f32.mrf.mxu3 }
 0x8aa   :  { %v2077_v8 = vadd.f32 %v2074_v5, %v2051_v51  ;;  %v2121_v14 = vadd.f32 %v2118_v7, %v2098_v6  ;;  %v2480_v51 = vld [vmem:[#allocation31 + $0x8] sm:$0xff]  ;;  %v2479_v5 = vld [vmem:[#allocation31] sm:$0xff]  ;;  %v2340_v6 = vld [vmem:[#allocation5 + $0x38] sm:$0xff] }
 0x8ab   :  { %2523 = vmatpush.msrb.mxu3 %v2480_v51 }
 0x8ac   :  { %v2954_v15 = vmul.f32 -1.442695, %v2077_v8  ;;  %v2956_v9 = vmul.f32 -1.442695, %v2121_v14 }
 0x8ad   :  { %2524 = vmatpush.msrb.mxu3 %v2479_v5 }
 0x8ae   :  { %3157 = vpow2.f32 %v2954_v15  ;;  %v2223_v15 = vld [vmem:[#allocation2 + $0x38] sm:$0xff] }
 0x8af   :  { %v3156_v10 = vpop.eup %3155  ;;  %3159 = vpow2.f32 %v2956_v9 }
 0x8b0   :  { %v4260_v38 = vadd.f32 1.0, %v3156_v10  ;;  %v2270_v10 = vld [vmem:[#allocation3 + $0x38] sm:$0xff] }
 0x8b2   :  { %3161 = vrcp.f32 %v4260_v38  ;;  %v2207_v53 = vand.u32 2147483648, %v4260_v38  ;;  %vm2201_vm0 = vweird.f32 %v4260_v38  ;;  %v2205_v54 = vand.u32 2147483647, %v4260_v38 }
 0x8b4   :  { %v3158_v17 = vpop.eup %3157  ;;  %v2208_v58 = vor.u32 1.1754944e-38, %v2207_v53  ;;  %vm2206_vm3 = vcmp.eq.f32.partialorder %v2205_v54, 8.507059e+37 }
 0x8b5   :  { %v3160_v31 = vpop.eup %3159  ;;  %v2081_v16 = vadd.f32 1.0, %v3158_v17 }
 0x8b6   :  { %v2125_v56 = vadd.f32 1.0, %v3160_v31 }
 0x8b7   :  { %3163 = vrcp.f32 %v2081_v16  ;;  %v2093_v26 = vand.u32 2147483648, %v2081_v16  ;;  %v2091_v30 = vand.u32 2147483647, %v2081_v16  ;;  %vm2087_vm9 = vweird.f32 %v2081_v16 }
 0x8b8   :  { %3165 = vrcp.f32 %v2125_v56  ;;  %v3162_v12 = vpop.eup %3161  ;;  %v2137_v32 = vand.u32 2147483648, %v2125_v56  ;;  %v2135_v33 = vand.u32 2147483647, %v2125_v56  ;;  %vm2131_vm11 = vweird.f32 %v2125_v56 }
 0x8b9   :  { %v2197_v21 = vmul.f32 %v3162_v12, %v4260_v38  ;;  %3167 = vtanh.f32 %v2165_v39  ;;  %v2094_v36 = vor.u32 1.1754944e-38, %v2093_v26  ;;  %vm2092_vm12 = vcmp.eq.f32.partialorder %v2091_v30, 8.507059e+37 }
 0x8ba   :  { %v2138_v41 = vor.u32 1.1754944e-38, %v2137_v32  ;;  %vm2136_vm14 = vcmp.eq.f32.partialorder %v2135_v33, 8.507059e+37  ;;  %vm2202_vm15 = vweird.f32 %v3162_v12 }
 0x8bb   :  { %v2198_v34 = vsub.f32 1.0, %v2197_v21  ;;  %vm2203_vm1 = vmor %vm2201_vm0, %vm2202_vm15 }
 0x8bd   :  { %v3164_v13 = vpop.eup %3163  ;;  %v2199_v45 = vmul.f32 %v3162_v12, %v2198_v34 }
 0x8be   :  { %v3166_v18 = vpop.eup %3165  ;;  %v2083_v19 = vmul.f32 %v3164_v13, %v2081_v16  ;;  %vm2088_vm7 = vweird.f32 %v3164_v13 }
 0x8bf   :  { %v2127_v20 = vmul.f32 %v3166_v18, %v2125_v56  ;;  %vm2132_vm8 = vweird.f32 %v3166_v18  ;;  %vm2089_vm10 = vmor %vm2087_vm9, %vm2088_vm7  ;;  %v3168_v42 = vpop.eup %3167  ;;  %v2200_v52 = vadd.f32 %v3162_v12, %v2199_v45 }
 0x8c0   :  { %v2084_v23 = vsub.f32 1.0, %v2083_v19  ;;  %vm2133_vm13 = vmor %vm2131_vm11, %vm2132_vm8 }
 0x8c1   :  { %v2128_v27 = vsub.f32 1.0, %v2127_v20  ;;  %v2204_v55 = vsel %vm2203_vm1, %v3162_v12, %v2200_v52  ;;  %v4282_v12 = vld [vmem:[%s4420_s26] ss:$0 sm:$0xff] }
 0x8c2   :  { %v2085_v28 = vmul.f32 %v3164_v13, %v2084_v23  ;;  %v2209_v60 = vsel %vm2206_vm3, %v2208_v58, %v2204_v55 }
 0x8c3   :  { %v2129_v22 = vmul.f32 %v3166_v18, %v2128_v27 }
 0x8c4   :  { %v2086_v35 = vadd.f32 %v3164_v13, %v2085_v28  ;;  %v2314_v28 = vld [vmem:[#allocation4 + $0x38] sm:$0xff] }
 0x8c5   :  { %v2130_v37 = vadd.f32 %v3166_v18, %v2129_v22 }
 0x8c6   :  { %v2090_v40 = vsel %vm2089_vm10, %v3164_v13, %v2086_v35 }
 0x8c7   :  { %v2095_v43 = vsel %vm2092_vm12, %v2094_v36, %v2090_v40  ;;  %v2134_v44 = vsel %vm2133_vm13, %v3166_v18, %v2130_v37 }
 0x8c8   :  { %v2212_v46 = vmul.f32 %v3168_v42, %v2095_v43  ;;  %v2139_v48 = vsel %vm2136_vm14, %v2138_v41, %v2134_v44 }
 0x8c9   :  { %v2211_v49 = vmul.f32 %v2139_v48, %v2049_v47 }
 0x8cb   :  { %v2213_v29 = vadd.f32 %v2212_v46, %v2211_v49 }
 0x8cd   :  { %3169 = vtanh.f32 %v2213_v29  ;;  %2217 = vst.msk [vmem:[#allocation8] sm:$0xff] %vm780_vm4, %v2213_v29 }
 0x8d3   :  { %v3170_v59 = vpop.eup %3169 }
 0x8d4   :  { %v2215_v61 = vmul.f32 %v3170_v59, %v2209_v60 }
 0x8d6   :  { %2219 = vst.msk [vmem:[#allocation6 + $0x30] sm:$0xff] %vm780_vm4, %v2215_v61 }
 0x8d7   :  { %2216 = vst.msk [vmem:[#allocation7] sm:$0xff] %vm780_vm4, %v2215_v61 }
 0x8dd   :  { %v2398_v4 = vld [vmem:[#allocation6 + $0x30] sm:$0xff] }
 0x8de   :  { %v2220_v62 = vld [vmem:[#allocation7] sm:$0xff] }
 0x8df   :  { %2960 = vmatmul.msk.f32.vlgmr.msra.gmra.mxu2 %vm780_vm4, %v2220_v62  ;;  %2962 = vmatmul.msk.f32.vlgmr.msra.gmra.mxu3 %vm780_vm4, %v2220_v62 }
 0x8e0   :  { %2964 = vmatmul.msk.f32.vlgmr.msrb.gmra.mxu0 %vm780_vm4, %v2220_v62  ;;  %2965 = vmatmul.msk.f32.vlgmr.msra.gmra.mxu1 %vm780_vm4, %v2220_v62  ;;  %v2561_v62 = vld [vmem:[%s3802_s5 + $0x18] sm:$0xff] }
 0x8e1   :  { %2602 = vmatpush.msra.mxu0 %v2561_v62 }
 0x8e7   :  { %2967 = vmatmul.msk.f32.vlgmr.msrb.gmra.mxu2 %vm780_vm4, %v2392_v63 }
 0x8ef   :  { %2968 = vmatmul.msk.f32.gmra.mxu2 %vm780_vm4, %v2393_v0 }
 0x8f7   :  { %2969 = vmatmul.msk.f32.gmra.mxu2 %vm780_vm4, %v2394_v1  ;;  %v2221_v1 = vld [vmem:[#allocation8] sm:$0xff] }
 0x8ff   :  { %2970 = vmatmul.msk.f32.gmra.mxu2 %vm780_vm4, %v2395_v2 }
 0x907   :  { %2971 = vmatmul.msk.f32.gmra.mxu2 %vm780_vm4, %v2396_v3 }
 0x90f   :  { %2972 = vmatmul.msk.f32.gmra.mxu2 %vm780_vm4, %v2397_v50 }
 0x917   :  { %2973 = vmatmul.msk.f32.gmra.mxu2 %vm780_vm4, %v2398_v4 }
 0x95d   :  { %v2360_v7 = vpop.f32.mrf.mxu1  ;;  %v2334_v25 = vpop.f32.mrf.mxu0 }
 0x95e   :  { %v2363_v8 = vadd.f32 %v2360_v7, %v2340_v6  ;;  %v2337_v22 = vadd.f32 %v2334_v25, %v2314_v28 }
 0x960   :  { %v2966_v14 = vmul.f32 -1.442695, %v2363_v8 }
 0x962   :  { %3171 = vpow2.f32 %v2966_v14  ;;  %v2246_v9 = vpop.f32.mrf.mxu2  ;;  %v2290_v38 = vpop.f32.mrf.mxu3 }
 0x963   :  { %v2249_v17 = vadd.f32 %v2246_v9, %v2223_v15  ;;  %v2293_v31 = vadd.f32 %v2290_v38, %v2270_v10 }
 0x965   :  { %v2961_v16 = vmul.f32 -1.442695, %v2249_v17  ;;  %v2963_v56 = vmul.f32 -1.442695, %v2293_v31 }
 0x967   :  { %3173 = vpow2.f32 %v2961_v16 }
 0x968   :  { %v3172_v11 = vpop.eup %3171  ;;  %3175 = vpow2.f32 %v2963_v56 }
 0x969   :  { %v4284_v13 = vadd.f32 1.0, %v3172_v11 }
 0x96a   :  { %v2447_v57 = vpop.f32.mrf.mxu2 }
 0x96b   :  { %v2448_v39 = vadd.f32 %v4282_v12, %v2447_v57  ;;  %3177 = vrcp.f32 %v4284_v13  ;;  %v2379_v7 = vand.u32 2147483648, %v4284_v13  ;;  %vm2373_vm14 = vweird.f32 %v4284_v13 }
 0x96c   :  { %v2377_v8 = vand.u32 2147483647, %v4284_v13 }
 0x96d   :  { %v3174_v18 = vpop.eup %3173  ;;  %v2471_v21 = vmax.f32 %v2448_v39, 0.0  ;;  %v2380_v15 = vor.u32 1.1754944e-38, %v2379_v7 }
 0x96e   :  { %v3176_v19 = vpop.eup %3175  ;;  %v2253_v20 = vadd.f32 1.0, %v3174_v18  ;;  %vm2378_vm0 = vcmp.eq.f32.partialorder %v2377_v8, 8.507059e+37 }
 0x96f   :  { %v2297_v23 = vadd.f32 1.0, %v3176_v19  ;;  %2975 = vmatmul.msk.f32.vlgmr.msrb.gmra.mxu3 %vm780_vm4, %v2471_v21  ;;  %v2559_v21 = vld [vmem:[%s3802_s5 + $0x8] sm:$0xff] }
 0x970   :  { %3179 = vrcp.f32 %v2253_v20  ;;  %v2263_v40 = vand.u32 2147483647, %v2253_v20  ;;  %v2265_v41 = vand.u32 2147483648, %v2253_v20  ;;  %vm2259_vm7 = vweird.f32 %v2253_v20 }
 0x971   :  { %3181 = vrcp.f32 %v2297_v23  ;;  %v4290_v27 = vpop.eup %3177  ;;  %v2309_v45 = vand.u32 2147483648, %v2297_v23  ;;  %v2307_v48 = vand.u32 2147483647, %v2297_v23  ;;  %vm2303_vm9 = vweird.f32 %v2297_v23 }
 0x972   :  { %v2450_v24 = vpop.f32.mrf.mxu2  ;;  %v2369_v36 = vmul.f32 %v4290_v27, %v4284_v13  ;;  %3183 = vtanh.f32 %v2337_v22  ;;  %v2266_v53 = vor.u32 1.1754944e-38, %v2265_v41  ;;  %vm2264_vm10 = vcmp.eq.f32.partialorder %v2263_v40, 8.507059e+37 }
 0x973   :  { %v2451_v26 = vadd.f32 %v4282_v12, %v2450_v24  ;;  %v2310_v58 = vor.u32 1.1754944e-38, %v2309_v45  ;;  %vm2308_vm12 = vcmp.eq.f32.partialorder %v2307_v48, 8.507059e+37  ;;  %vm2374_vm13 = vweird.f32 %v4290_v27  ;;  %v3057_v24 = vld [vmem:[%s4421_s9] ss:$0 sm:$0xff] }
 0x974   :  { %v2370_v49 = vsub.f32 1.0, %v2369_v36  ;;  %vm2375_vm15 = vmor %vm2373_vm14, %vm2374_vm13  ;;  %v2633_v36 = vld [vmem:[%s3812_s21 + $0x10] sm:$0xff] }
 0x975   :  { %v2472_v30 = vmax.f32 %v2451_v26, 0.0 }
 0x976   :  { %v3180_v32 = vpop.eup %3179  ;;  %v2371_v63 = vmul.f32 %v4290_v27, %v2370_v49 }
 0x977   :  { %v3182_v33 = vpop.eup %3181  ;;  %v2255_v34 = vmul.f32 %v3180_v32, %v2253_v20  ;;  %2976 = vmatmul.msk.f32.gmra.mxu3 %vm780_vm4, %v2472_v30  ;;  %vm2260_vm5 = vweird.f32 %v3180_v32  ;;  %v2560_v20 = vld [vmem:[%s3802_s5 + $0x10] sm:$0xff] }
 0x978   :  { %v2299_v35 = vmul.f32 %v3182_v33, %v2297_v23  ;;  %vm2304_vm6 = vweird.f32 %v3182_v33  ;;  %vm2261_vm8 = vmor %vm2259_vm7, %vm2260_vm5  ;;  %v3184_v59 = vpop.eup %3183  ;;  %v2372_v5 = vadd.f32 %v4290_v27, %v2371_v63  ;;  %2603 = vmatpush.msra.mxu0 %v2560_v20  ;;  %v2558_v23 = vld [vmem:[%s3802_s5] sm:$0xff] }
 0x979   :  { %v2256_v37 = vsub.f32 1.0, %v2255_v34  ;;  %vm2305_vm11 = vmor %vm2303_vm9, %vm2304_vm6 }
 0x97a   :  { %v2300_v42 = vsub.f32 1.0, %v2299_v35  ;;  %v2453_v43 = vpop.f32.mrf.mxu2  ;;  %v2376_v14 = vsel %vm2375_vm15, %v4290_v27, %v2372_v5  ;;  %2604 = vmatpush.msra.mxu0 %v2559_v21  ;;  %v2634_v35 = vld [vmem:[%s3812_s21 + $0x18] sm:$0xff] }
 0x97b   :  { %v2257_v44 = vmul.f32 %v3180_v32, %v2256_v37  ;;  %v2454_v46 = vadd.f32 %v4282_v12, %v2453_v43  ;;  %v2381_v17 = vsel %vm2378_vm0, %v2380_v15, %v2376_v14  ;;  %2671 = vmatpush.msrb.mxu1 %v2634_v35 }
 0x97c   :  { %v2301_v47 = vmul.f32 %v3182_v33, %v2300_v42  ;;  %2605 = vmatpush.msra.mxu0 %v2558_v23 }
 0x97d   :  { %v2258_v29 = vadd.f32 %v3180_v32, %v2257_v44  ;;  %v2473_v52 = vmax.f32 %v2454_v46, 0.0  ;;  %2672 = vmatpush.msrb.mxu1 %v2633_v36 }
 0x97e   :  { %v2302_v54 = vadd.f32 %v3182_v33, %v2301_v47 }
 0x97f   :  { %v2262_v55 = vsel %vm2261_vm8, %v3180_v32, %v2258_v29  ;;  %2977 = vmatmul.msk.f32.gmra.mxu3 %vm780_vm4, %v2473_v52 }
 0x980   :  { %v2267_v60 = vsel %vm2264_vm10, %v2266_v53, %v2262_v55  ;;  %v2306_v61 = vsel %vm2305_vm11, %v3182_v33, %v2302_v54  ;;  %v2632_v55 = vld [vmem:[%s3812_s21 + $0x8] sm:$0xff] }
 0x981   :  { %v2384_v0 = vmul.f32 %v3184_v59, %v2267_v60  ;;  %v2311_v2 = vsel %vm2308_vm12, %v2310_v58, %v2306_v61  ;;  %2673 = vmatpush.msrb.mxu1 %v2632_v55  ;;  %v2631_v58 = vld [vmem:[%s3812_s21] sm:$0xff] }
 0x982   :  { %v2383_v3 = vmul.f32 %v2311_v2, %v2221_v1  ;;  %v2456_v50 = vpop.f32.mrf.mxu2  ;;  %v4335_v59 = vld [vmem:[%s3807_s17] ss:$0 sm:$0xff] }
 0x983   :  { %v2457_v4 = vadd.f32 %v4282_v12, %v2456_v50  ;;  %2674 = vmatpush.msrb.mxu1 %v2631_v58 }
 0x984   :  { %v2385_v51 = vadd.f32 %v2384_v0, %v2383_v3 }
 0x985   :  { %v2474_v6 = vmax.f32 %v2457_v4, 0.0 }
 0x986   :  { %3185 = vtanh.f32 %v2385_v51  ;;  %2389 = vst.msk [vmem:[#allocation8] sm:$0xff] %vm780_vm4, %v2385_v51 }
 0x987   :  { %2978 = vmatmul.msk.f32.gmra.mxu3 %vm780_vm4, %v2474_v6 }
 0x98a   :  { %v2459_v9 = vpop.f32.mrf.mxu2 }
 0x98b   :  { %v2460_v10 = vadd.f32 %v4282_v12, %v2459_v9 }
 0x98c   :  { %v3186_v38 = vpop.eup %3185 }
 0x98d   :  { %v2387_v31 = vmul.f32 %v3186_v38, %v2381_v17  ;;  %v2475_v16 = vmax.f32 %v2460_v10, 0.0 }
 0x98f   :  { %2388 = vst.msk [vmem:[#allocation7] sm:$0xff] %vm780_vm4, %v2387_v31  ;;  %2979 = vmatmul.msk.f32.gmra.mxu3 %vm780_vm4, %v2475_v16 }
 0x990   :  { %2391 = vst.msk [vmem:[#allocation6 + $0x38] sm:$0xff] %vm780_vm4, %v2387_v31 }
 0x992   :  { %v2462_v56 = vpop.f32.mrf.mxu2 }
 0x993   :  { %v2463_v11 = vadd.f32 %v4282_v12, %v2462_v56 }
 0x995   :  { %v2476_v57 = vmax.f32 %v2463_v11, 0.0 }
 0x997   :  { %v2399_v13 = vld [vmem:[#allocation6 + $0x38] sm:$0xff]  ;;  %2980 = vmatmul.msk.f32.gmra.mxu3 %vm780_vm4, %v2476_v57 }
 0x998   :  { %2974 = vmatmul.msk.f32.gmra.mxu2 %vm780_vm4, %v2399_v13 }
 0x99a   :  { %v2465_v39 = vpop.f32.mrf.mxu2 }
 0x99b   :  { %v2466_v18 = vadd.f32 %v4282_v12, %v2465_v39 }
 0x99d   :  { %v2477_v19 = vmax.f32 %v2466_v18, 0.0 }
 0x99f   :  { %2981 = vmatmul.msk.f32.gmra.mxu3 %vm780_vm4, %v2477_v19 }
 0x9f2   :  { %v2526_v25 = vpop.f32.mrf.mxu3 }
 0x9f3   :  { %v2527_v26 = vadd.f32 %v3057_v24, %v2526_v25 }
 0x9f5   :  { %v2550_v27 = vmax.f32 %v2527_v26, 0.0 }
 0x9f7   :  { %2983 = vmatmul.msk.f32.vlgmr.msra.gmra.mxu0 %vm448_vm2, %v2550_v27 }
 0x9fa   :  { %v2529_v28 = vpop.f32.mrf.mxu3 }
 0x9fb   :  { %v2530_v30 = vadd.f32 %v3057_v24, %v2529_v28 }
 0x9fd   :  { %v2551_v32 = vmax.f32 %v2530_v30, 0.0 }
 0x9ff   :  { %2984 = vmatmul.msk.f32.gmra.mxu0 %vm448_vm2, %v2551_v32 }
 0xa02   :  { %v2532_v22 = vpop.f32.mrf.mxu3 }
 0xa03   :  { %v2533_v33 = vadd.f32 %v3057_v24, %v2532_v22 }
 0xa05   :  { %v2552_v34 = vmax.f32 %v2533_v33, 0.0 }
 0xa07   :  { %2985 = vmatmul.msk.f32.gmra.mxu0 %vm448_vm2, %v2552_v34 }
 0xa0a   :  { %v2535_v37 = vpop.f32.mrf.mxu3 }
 0xa0b   :  { %v2536_v40 = vadd.f32 %v3057_v24, %v2535_v37 }
 0xa0d   :  { %v2553_v41 = vmax.f32 %v2536_v40, 0.0 }
 0xa0f   :  { %2986 = vmatmul.msk.f32.gmra.mxu0 %vm448_vm2, %v2553_v41 }
 0xa12   :  { %v2538_v42 = vpop.f32.mrf.mxu3 }
 0xa13   :  { %v2539_v43 = vadd.f32 %v3057_v24, %v2538_v42 }
 0xa15   :  { %v2554_v44 = vmax.f32 %v2539_v43, 0.0 }
 0xa17   :  { %2987 = vmatmul.msk.f32.gmra.mxu0 %vm448_vm2, %v2554_v44 }
 0xa1a   :  { %v2541_v46 = vpop.f32.mrf.mxu3 }
 0xa1b   :  { %v2468_v45 = vpop.f32.mrf.mxu2  ;;  %v2542_v48 = vadd.f32 %v3057_v24, %v2541_v46 }
 0xa1c   :  { %v2469_v47 = vadd.f32 %v4282_v12, %v2468_v45 }
 0xa1d   :  { %v2555_v29 = vmax.f32 %v2542_v48, 0.0 }
 0xa1e   :  { %v2478_v49 = vmax.f32 %v2469_v47, 0.0 }
 0xa1f   :  { %2988 = vmatmul.msk.f32.gmra.mxu0 %vm448_vm2, %v2555_v29 }
 0xa20   :  { %2982 = vmatmul.msk.f32.gmra.mxu3 %vm780_vm4, %v2478_v49 }
 0xa22   :  { %v2544_v52 = vpop.f32.mrf.mxu3 }
 0xa23   :  { %v2545_v53 = vadd.f32 %v3057_v24, %v2544_v52 }
 0xa25   :  { %v2556_v54 = vmax.f32 %v2545_v53, 0.0 }
 0xa27   :  { %2989 = vmatmul.msk.f32.gmra.mxu0 %vm448_vm2, %v2556_v54 }
 0xa74   :  { %v2607_v60 = vpop.f32.mrf.mxu0 }
 0xa75   :  { %v2608_v12 = vadd.f32 %v4335_v59, %v2607_v60 }
 0xa77   :  { %2991 = vmatmul.msk.f32.vlgmr.msrb.gmra.mxu1 %vm448_vm2, %v2608_v12 }
 0xa7c   :  { %v2610_v61 = vpop.f32.mrf.mxu0 }
 0xa7d   :  { %v2611_v62 = vadd.f32 %v4335_v59, %v2610_v61 }
 0xa7f   :  { %2992 = vmatmul.msk.f32.gmra.mxu1 %vm448_vm2, %v2611_v62 }
 0xa84   :  { %v2613_v63 = vpop.f32.mrf.mxu0 }
 0xa85   :  { %v2614_v0 = vadd.f32 %v4335_v59, %v2613_v63 }
 0xa87   :  { %2993 = vmatmul.msk.f32.gmra.mxu1 %vm448_vm2, %v2614_v0 }
 0xa8c   :  { %v2616_v1 = vpop.f32.mrf.mxu0 }
 0xa8d   :  { %v2617_v2 = vadd.f32 %v4335_v59, %v2616_v1 }
 0xa8f   :  { %2994 = vmatmul.msk.f32.gmra.mxu1 %vm448_vm2, %v2617_v2 }
 0xa94   :  { %v2619_v3 = vpop.f32.mrf.mxu0 }
 0xa95   :  { %v4346_v50 = vadd.f32 %v4335_v59, %v2619_v3 }
 0xa97   :  { %2995 = vmatmul.msk.f32.gmra.mxu1 %vm448_vm2, %v4346_v50 }
 0xa9c   :  { %v2622_v4 = vpop.f32.mrf.mxu0 }
 0xa9d   :  { %v4351_v51 = vadd.f32 %v4335_v59, %v2622_v4 }
 0xa9f   :  { %2996 = vmatmul.msk.f32.gmra.mxu1 %vm448_vm2, %v4351_v51 }
 0xaa3   :  { %v2547_v5 = vpop.f32.mrf.mxu3 }
 0xaa4   :  { %v2548_v6 = vadd.f32 %v3057_v24, %v2547_v5  ;;  %v2625_v7 = vpop.f32.mrf.mxu0 }
 0xaa5   :  { %v4356_v14 = vadd.f32 %v4335_v59, %v2625_v7 }
 0xaa6   :  { %v2557_v8 = vmax.f32 %v2548_v6, 0.0 }
 0xaa7   :  { %2997 = vmatmul.msk.f32.gmra.mxu1 %vm448_vm2, %v4356_v14 }
 0xaa8   :  { %2990 = vmatmul.msk.f32.gmra.mxu0 %vm448_vm2, %v2557_v8 }
 0xaf4   :  { %v2676_v15 = vpop.f32.mrf.mxu1 }
 0xaf5   :  { %v2700_v9 = vmax.f32 %v2608_v12, %v2676_v15 }
 0xaf7   :  { %v2708_v10 = vsub.f32 %v2608_v12, %v2700_v9  ;;  %v2732_v38 = vsub.f32 %v2676_v15, %v2700_v9 }
 0xaf9   :  { %v2716_v17 = vmul.f32 1.442695, %v2708_v10  ;;  %v2740_v31 = vmul.f32 1.442695, %v2732_v38 }
 0xafb   :  { %3187 = vpow2.f32 %v2716_v17 }
 0xafc   :  { %3189 = vpow2.f32 %v2740_v31  ;;  %v2679_v16 = vpop.f32.mrf.mxu1 }
 0xafd   :  { %v2701_v56 = vmax.f32 %v2611_v62, %v2679_v16 }
 0xaff   :  { %v2709_v11 = vsub.f32 %v2611_v62, %v2701_v56  ;;  %v2733_v57 = vsub.f32 %v2679_v16, %v2701_v56 }
 0xb01   :  { %v3188_v13 = vpop.eup %3187  ;;  %v2718_v39 = vmul.f32 1.442695, %v2709_v11  ;;  %v2742_v18 = vmul.f32 1.442695, %v2733_v57 }
 0xb02   :  { %v3190_v19 = vpop.eup %3189 }
 0xb03   :  { %v2756_v20 = vadd.f32 %v3190_v19, %v3188_v13  ;;  %3191 = vpow2.f32 %v2718_v39 }
 0xb04   :  { %3193 = vpow2.f32 %v2742_v18  ;;  %v2682_v21 = vpop.f32.mrf.mxu1 }
 0xb05   :  { %3195 = vlog2.f32 %v2756_v20  ;;  %v2702_v23 = vmax.f32 %v2614_v0, %v2682_v21 }
 0xb07   :  { %v2710_v24 = vsub.f32 %v2614_v0, %v2702_v23  ;;  %v2734_v25 = vsub.f32 %v2682_v21, %v2702_v23 }
 0xb09   :  { %v3192_v26 = vpop.eup %3191  ;;  %v2720_v27 = vmul.f32 1.442695, %v2710_v24  ;;  %v2744_v28 = vmul.f32 1.442695, %v2734_v25 }
 0xb0a   :  { %v3194_v30 = vpop.eup %3193 }
 0xb0b   :  { %v3196_v32 = vpop.eup %3195  ;;  %v2757_v22 = vadd.f32 %v3194_v30, %v3192_v26  ;;  %3197 = vpow2.f32 %v2720_v27 }
 0xb0c   :  { %v2765_v33 = vmul.f32 0.6931472, %v3196_v32  ;;  %3199 = vpow2.f32 %v2744_v28  ;;  %v2685_v34 = vpop.f32.mrf.mxu1 }
 0xb0d   :  { %3201 = vlog2.f32 %v2757_v22  ;;  %v2703_v35 = vmax.f32 %v2617_v2, %v2685_v34 }
 0xb0e   :  { %v2780_v36 = vsub.f32 %v2708_v10, %v2765_v33 }
 0xb0f   :  { %v2711_v37 = vsub.f32 %v2617_v2, %v2703_v35  ;;  %v2735_v40 = vsub.f32 %v2685_v34, %v2703_v35 }
 0xb10   :  { %2788 = vst.msk [vmem:[%s3817_s24] sm:$0xff] %vm448_vm2, %v2780_v36 }
 0xb11   :  { %v3198_v41 = vpop.eup %3197  ;;  %v2722_v42 = vmul.f32 1.442695, %v2711_v37  ;;  %v2746_v43 = vmul.f32 1.442695, %v2735_v40 }
 0xb12   :  { %v3200_v44 = vpop.eup %3199 }
 0xb13   :  { %v3202_v45 = vpop.eup %3201  ;;  %v2758_v46 = vadd.f32 %v3200_v44, %v3198_v41  ;;  %3203 = vpow2.f32 %v2722_v42 }
 0xb14   :  { %v2767_v47 = vmul.f32 0.6931472, %v3202_v45  ;;  %3205 = vpow2.f32 %v2746_v43  ;;  %v2688_v48 = vpop.f32.mrf.mxu1 }
 0xb15   :  { %3207 = vlog2.f32 %v2758_v46  ;;  %v2704_v49 = vmax.f32 %v4346_v50, %v2688_v48 }
 0xb16   :  { %v2781_v29 = vsub.f32 %v2709_v11, %v2767_v47 }
 0xb17   :  { %v2712_v52 = vsub.f32 %v4346_v50, %v2704_v49  ;;  %v2736_v53 = vsub.f32 %v2688_v48, %v2704_v49 }
 0xb18   :  { %2789 = vst.msk [vmem:[%s3817_s24 + $0x8] sm:$0xff] %vm448_vm2, %v2781_v29 }
 0xb19   :  { %v3204_v54 = vpop.eup %3203  ;;  %v2724_v55 = vmul.f32 1.442695, %v2712_v52  ;;  %v2748_v58 = vmul.f32 1.442695, %v2736_v53 }
 0xb1a   :  { %v3206_v60 = vpop.eup %3205 }
 0xb1b   :  { %v3208_v12 = vpop.eup %3207  ;;  %v2759_v61 = vadd.f32 %v3206_v60, %v3204_v54  ;;  %3209 = vpow2.f32 %v2724_v55 }
 0xb1c   :  { %v2769_v62 = vmul.f32 0.6931472, %v3208_v12  ;;  %3211 = vpow2.f32 %v2748_v58  ;;  %v2691_v63 = vpop.f32.mrf.mxu1 }
 0xb1d   :  { %3213 = vlog2.f32 %v2759_v61  ;;  %v2705_v0 = vmax.f32 %v4351_v51, %v2691_v63 }
 0xb1e   :  { %v2782_v1 = vsub.f32 %v2710_v24, %v2769_v62 }
 0xb1f   :  { %v2713_v2 = vsub.f32 %v4351_v51, %v2705_v0  ;;  %v2737_v3 = vsub.f32 %v2691_v63, %v2705_v0 }
 0xb20   :  { %2790 = vst.msk [vmem:[%s3817_s24 + $0x10] sm:$0xff] %vm448_vm2, %v2782_v1 }
 0xb21   :  { %v3210_v50 = vpop.eup %3209  ;;  %v2726_v4 = vmul.f32 1.442695, %v2713_v2  ;;  %v2750_v5 = vmul.f32 1.442695, %v2737_v3 }
 0xb22   :  { %v3212_v6 = vpop.eup %3211 }
 0xb23   :  { %v3214_v7 = vpop.eup %3213  ;;  %v2760_v8 = vadd.f32 %v3212_v6, %v3210_v50  ;;  %3215 = vpow2.f32 %v2726_v4 }
 0xb24   :  { %v2771_v15 = vmul.f32 0.6931472, %v3214_v7  ;;  %3217 = vpow2.f32 %v2750_v5  ;;  %v2694_v10 = vpop.f32.mrf.mxu1 }
 0xb25   :  { %v2628_v9 = vpop.f32.mrf.mxu0  ;;  %3219 = vlog2.f32 %v2760_v8  ;;  %v2706_v51 = vmax.f32 %v4356_v14, %v2694_v10 }
 0xb26   :  { %v2629_v38 = vadd.f32 %v4335_v59, %v2628_v9  ;;  %v2783_v17 = vsub.f32 %v2711_v37, %v2771_v15 }
 0xb27   :  { %v2714_v31 = vsub.f32 %v4356_v14, %v2706_v51  ;;  %v2738_v16 = vsub.f32 %v2694_v10, %v2706_v51 }
 0xb28   :  { %2998 = vmatmul.msk.f32.gmra.mxu1 %vm448_vm2, %v2629_v38  ;;  %2791 = vst.msk [vmem:[%s3817_s24 + $0x18] sm:$0xff] %vm448_vm2, %v2783_v17 }
 0xb29   :  { %v3216_v56 = vpop.eup %3215  ;;  %v2728_v11 = vmul.f32 1.442695, %v2714_v31  ;;  %v2752_v57 = vmul.f32 1.442695, %v2738_v16 }
 0xb2a   :  { %v3218_v13 = vpop.eup %3217 }
 0xb2b   :  { %v3220_v39 = vpop.eup %3219  ;;  %v2761_v18 = vadd.f32 %v3218_v13, %v3216_v56  ;;  %3221 = vpow2.f32 %v2728_v11 }
 0xb2c   :  { %v2773_v59 = vmul.f32 0.6931472, %v3220_v39  ;;  %3223 = vpow2.f32 %v2752_v57 }
 0xb2d   :  { %3225 = vlog2.f32 %v2761_v18 }
 0xb2e   :  { %v2784_v19 = vsub.f32 %v2712_v52, %v2773_v59 }
 0xb30   :  { %2792 = vst.msk [vmem:[%s3817_s24 + $0x20] sm:$0xff] %vm448_vm2, %v2784_v19 }
 0xb31   :  { %v3222_v14 = vpop.eup %3221 }
 0xb32   :  { %v3224_v20 = vpop.eup %3223 }
 0xb33   :  { %v3226_v21 = vpop.eup %3225  ;;  %v2762_v23 = vadd.f32 %v3224_v20, %v3222_v14 }
 0xb34   :  { %v2775_v24 = vmul.f32 0.6931472, %v3226_v21 }
 0xb35   :  { %3227 = vlog2.f32 %v2762_v23 }
 0xb36   :  { %v2785_v25 = vsub.f32 %v2713_v2, %v2775_v24 }
 0xb38   :  { %2793 = vst.msk [vmem:[%s3817_s24 + $0x28] sm:$0xff] %vm448_vm2, %v2785_v25 }
 0xb3b   :  { %v3228_v26 = vpop.eup %3227 }
 0xb3c   :  { %v2777_v27 = vmul.f32 0.6931472, %v3228_v26 }
 0xb3e   :  { %v2786_v28 = vsub.f32 %v2714_v31, %v2777_v27 }
 0xb40   :  { %2794 = vst.msk [vmem:[%s3817_s24 + $0x30] sm:$0xff] %vm448_vm2, %v2786_v28 }
 0xba5   :  { %v2697_v30 = vpop.f32.mrf.mxu1 }
 0xba6   :  { %v2707_v32 = vmax.f32 %v2629_v38, %v2697_v30 }
 0xba8   :  { %v2715_v22 = vsub.f32 %v2629_v38, %v2707_v32  ;;  %v2739_v33 = vsub.f32 %v2697_v30, %v2707_v32 }
 0xbaa   :  { %v2730_v34 = vmul.f32 1.442695, %v2715_v22  ;;  %v2754_v35 = vmul.f32 1.442695, %v2739_v33 }
 0xbac   :  { %3229 = vpow2.f32 %v2730_v34 }
 0xbad   :  { %3231 = vpow2.f32 %v2754_v35 }
 0xbb2   :  { %v3230_v36 = vpop.eup %3229 }
 0xbb3   :  { %v3232_v37 = vpop.eup %3231 }
 0xbb4   :  { %v2763_v40 = vadd.f32 %v3232_v37, %v3230_v36 }
 0xbb6   :  { %3233 = vlog2.f32 %v2763_v40 }
 0xbbc   :  { %v3234_v41 = vpop.eup %3233 }
 0xbbd   :  { %v2779_v42 = vmul.f32 0.6931472, %v3234_v41 }
 0xbbf   :  { %v2787_v43 = vsub.f32 %v2715_v22, %v2779_v42 }
 0xbc1   :  { %2795 = vst.msk [vmem:[%s3817_s24 + $0x38] sm:$0xff] %vm448_vm2, %v2787_v43 }
 0xbc2   :  { %2800 = vsyncpa [#allocation10], 1 }
 0xbc3   :  { %2801 = vsyncpa [#allocation12], 1 }
 0xbc4   :  { %2802 = vsyncpa [#allocation15], 1 }
 0xbc5   :  { %2803 = vsyncpa [#allocation18], 1 }
 0xbc6   :  { %2804 = vsyncpa [#allocation21], 1 }
 0xbc7   :  { %2805 = vsyncpa [#allocation24], 1 }
 0xbc8   :  { %2806 = vsyncpa [#allocation27], 1 }
 0xbc9   :  { %2807 = vsyncpa [#allocation30], 1 }

</bundles_post_ra>
